<compile_context>
chip_gen: v6e
topology: v6e:2x2x1
jax: 0.10.0
libtpu: 0.0.40
codegen_flags: <defaults>
</compile_context>

<pallas_src>
import numpy as np
import jax
import jax.numpy as jnp
from jax import lax
from jax.experimental import pallas as pl
from jax.experimental.pallas import tpu as pltpu

# ----------------------------- configuration --------------------------------
B = 2
EMBED_DIM = 16     # embed_dim
HIDDEN_DIM = 32    # hidden_dim
Q_DIM = 32         # q_dim
V_DIM = 16         # v_dim
NUM_HEADS = 4
H = W = 8          # internal_resolution
S = H * W          # spatial positions per sample (64)
ROWS = B * S       # flattened columns (128) -> lane dimension
KV_K = 3           # kv_kernel_size
N_TAP = KV_K * KV_K
DQH = Q_DIM // NUM_HEADS
DVH = V_DIM // NUM_HEADS
EPS = 1e-5
KV_ABS_MAX = 32.0 / (KV_K * KV_K)

# 3x3 taps (pad=1, dilation=1): tap t = kh*3 + kw reads spatial offset
# (dh, dw) = (kh-1, kw-1), i.e. flattened column offset off = dh*W + dw.
# pltpu.roll matches jnp.roll (out[p] = in[p - shift]), so reading p + off
# means shift = (-off) % ROWS.  Edge / batch-boundary wrap is zeroed by masks.
_TAP_OFFS = [(kh - 1) * W + (kw - 1) for kh in range(KV_K) for kw in range(KV_K)]
TAP_SHIFTS = [(-off) % ROWS for off in _TAP_OFFS]


# --------------------------- in-kernel helpers -------------------------------
def _mm(a, b):
    """MXU matmul: bf16 operands, f32 accumulation."""
    return jnp.dot(a.astype(jnp.bfloat16), b.astype(jnp.bfloat16),
                   preferred_element_type=jnp.float32)


def _erf(x):
    """Abramowitz & Stegun 7.1.26 polynomial erf (|err| < 1.5e-7)."""
    sgn = jnp.where(x >= 0.0, 1.0, -1.0)
    ax = jnp.abs(x)
    t = 1.0 / (1.0 + 0.3275911 * ax)
    poly = ((((1.061405429 * t - 1.453152027) * t + 1.421413741) * t
             - 0.284496736) * t + 0.254829592) * t
    return sgn * (1.0 - poly * jnp.exp(-ax * ax))


def _gelu(x):
    return 0.5 * x * (1.0 + _erf(x * (1.0 / np.sqrt(2.0))))


def _phi(x):
    """phi(x) = relu(x)^2 * ||relu(x)||_F / ||relu(x)^2||_F (batch-global norms)."""
    r = jnp.maximum(x, 0.0)
    rp = r * r
    num = jnp.sqrt(jnp.sum(r * r, keepdims=True))
    den = jnp.sqrt(jnp.sum(rp * rp, keepdims=True))
    return rp * (num / jnp.maximum(den, 1e-30))   # guard 0/0 -> 0


def _ln_per_sample(x, bsels, inv_n, scale=None, shift=None):
    """LayerNorm over all C*H*W elements of each sample, using the batch
    selector masks (1, ROWS) so the whole op stays lane-dense (no slicing)."""
    mean_b = jnp.zeros_like(bsels[0])
    for sel in bsels:
        m = jnp.sum(x * sel, keepdims=True) * inv_n       # (1, 1) per-sample mean
        mean_b = mean_b + m * sel
    c = x - mean_b
    c2 = c * c
    var_b = jnp.zeros_like(bsels[0])
    for sel in bsels:
        v = jnp.sum(c2 * sel, keepdims=True) * inv_n
        var_b = var_b + v * sel
    y = c * lax.rsqrt(var_b + EPS)
    if scale is not None:
        y = y * scale + shift
    return y


# ------------------------------ fused kernel ---------------------------------
def _fc_block_kernel(
    # inputs (all channels-first, columns = b*S + y*W + x)
    x_ref,                     # (D, ROWS)        input
    bsel_ref,                  # (B, 1, ROWS)     per-sample column selectors (0/1)
    masks_ref,                 # (9, 1, ROWS)     3x3 edge / batch-boundary masks (0/1)
    wpool_ref,                 # (9, 1, ROWS)     bilinear pooling weights per tap
    ln1w_ref, ln1b_ref,        # (D, ROWS)        LayerNorm1 affine (tiled over batch)
    ln2w_ref, ln2b_ref,        # (D, ROWS)        LayerNorm2 affine
    wqkv_ref, bqkv_ref,        # (2Dq+Dv, 9D) bf16, (2Dq+Dv, 1)  fused Q/K/V im2col weights
    hmask_ref,                 # (9*Dq, Dv)       same-head block mask, tap-tiled
    wbias_ref, bbias_ref,      # (Dv, D) bf16, (Dv, 1)   attention-bias Linear
    wu_ref, bu_ref,            # (D, 9*Dv) bf16, (D, 1)  head-unification im2col weights
    wff1_ref, bff1_ref,        # (Dh, D) bf16, (Dh, 1)   FFN conv1 (1x1)
    wff2_ref, bff2_ref,        # (D, Dh) bf16, (D, 1)    FFN conv2 (1x1)
    # output
    o_ref,                     # (D, ROWS)
):
    x = x_ref[...]
    bsel = bsel_ref[...]
    bsels = [bsel[b] for b in range(B)]                   # each (1, ROWS)
    masks = masks_ref[...]                                # (9, 1, ROWS)
    wp = wpool_ref[...]                                   # (9, 1, ROWS)

    def tap_stack(a):
        """Stack the 9 spatially-shifted (zero-padded) copies of `a` along the
        sublane axis -> (9*C, ROWS).  Shift = lane roll (XLU) + edge mask."""
        parts = []
        for t in range(N_TAP):
            shifted = a if TAP_SHIFTS[t] == 0 else pltpu.roll(a, TAP_SHIFTS[t], axis=1)
            parts.append(masks[t] * shifted)
        return jnp.concatenate(parts, axis=0)

    inv_dhw = 1.0 / float(EMBED_DIM * S)

    # ---- layer_norm_1 (per sample over all D*H*W elements, affine) ----
    xn = _ln_per_sample(x, bsels, inv_dhw, ln1w_ref[...], ln1b_ref[...])

    # ---- fused Q (1x1) + K/V (3x3, pad=1) projection: one K=144 matmul ----
    xcol = tap_stack(xn)                                   # (9*D, ROWS)
    qkv_p = _mm(wqkv_ref[...], xcol) + bqkv_ref[...]       # (2*Dq+Dv, ROWS)
    q = qkv_p[:Q_DIM]                                      # (Dq, ROWS)
    k = qkv_p[Q_DIM:2 * Q_DIM]                             # (Dq, ROWS)
    v = qkv_p[2 * Q_DIM:]                                  # (Dv, ROWS)

    # ---- phi (batch-global Frobenius-norm scaling, as in the reference) ----
    phi_q = _phi(q)
    phi_k = _phi(k)

    # ---- bilinear-pooled KV + per-head grouped conv, tap-stacked ----
    phikw = jnp.concatenate([phi_k * wp[t] for t in range(N_TAP)], axis=0)  # (9Dq, ROWS)
    pq = tap_stack(phi_q)                                                   # (9Dq, ROWS)
    hm = hmask_ref[...]                                                     # (9Dq, Dv)
    v_bf = v.astype(jnp.bfloat16)
    kv_blocks, pq_blocks = [], []
    for b in range(B):
        sel = bsels[b]
        kv_b = lax.dot_general(                      # per-sample pooled KV (all head pairs)
            (phikw * sel).astype(jnp.bfloat16), v_bf,
            dimension_numbers=(((1,), (1,)), ((), ())),
            preferred_element_type=jnp.float32)                             # (9Dq, Dv)
        kv_blocks.append(jnp.clip(kv_b, -KV_ABS_MAX, KV_ABS_MAX) * hm)
        pq_blocks.append(pq * sel)
    kv_all = jnp.concatenate(kv_blocks, axis=0)                             # (B*9Dq, Dv)
    pq_all = jnp.concatenate(pq_blocks, axis=0)                             # (B*9Dq, ROWS)
    qkv = lax.dot_general(                           # K=576 contraction, both samples at once
        kv_all.astype(jnp.bfloat16), pq_all.astype(jnp.bfloat16),
        dimension_numbers=(((0,), (0,)), ((), ())),
        preferred_element_type=jnp.float32)                                 # (Dv, ROWS)

    # ---- attention bias: per-sample spatial mean of xn -> Linear, broadcast ----
    inv_s = 1.0 / float(S)
    sq_b = jnp.zeros((EMBED_DIM, ROWS), jnp.float32)
    for b in range(B):
        sel = bsels[b]
        s_b = jnp.sum(xn * sel, axis=1, keepdims=True) * inv_s              # (D, 1)
        sq_b = sq_b + s_b * sel
    qkv = qkv + _mm(wbias_ref[...], sq_b) + bbias_ref[...]

    # ---- head unification (3x3 conv, pad=1): one K=144 matmul ----
    ucol = tap_stack(qkv)                                                   # (9*Dv, ROWS)
    attn = _mm(wu_ref[...], ucol) + bu_ref[...]                             # (D, ROWS)

    # ---- functional LN (no affine) -> residual (original x) -> layer_norm_2 ----
    attn = _ln_per_sample(attn, bsels, inv_dhw)
    x1 = x + attn
    x2 = _ln_per_sample(x1, bsels, inv_dhw, ln2w_ref[...], ln2b_ref[...])

    # ---- feed-forward (1x1 conv -> exact GELU -> 1x1 conv) + residual ----
    h1 = _gelu(_mm(wff1_ref[...], x2) + bff1_ref[...])                      # (Dh, ROWS)
    h2 = _mm(wff2_ref[...], h1) + bff2_ref[...]                             # (D, ROWS)
    o_ref[...] = x2 + h2


# --------------------------- constant builders --------------------------------
def _edge_masks_np():
    """(9, 1, ROWS) 0/1 masks: 1 where the 3x3 tap's source pixel is in-bounds
    (pad=1, dilation=1).  Also kills roll wrap-around across the batch boundary."""
    m = np.zeros((N_TAP, 1, ROWS), np.float32)
    for kh in range(KV_K):
        for kw in range(KV_K):
            t = kh * KV_K + kw
            dh, dw = kh - 1, kw - 1
            for b in range(B):
                for y in range(H):
                    for x in range(W):
                        if 0 <= y + dh < H and 0 <= x + dw < W:
                            m[t, 0, b * S + y * W + x] = 1.0
    return m


def _bilinear_matrix_np(in_size, out_size):
    """Row matrix equal to F.interpolate(mode='bilinear', align_corners=False)."""
    A = np.zeros((out_size, in_size), np.float32)
    scale = in_size / out_size
    for o in range(out_size):
        src = max(scale * (o + 0.5) - 0.5, 0.0)
        i0 = min(int(np.floor(src)), in_size - 1)
        i1 = min(i0 + 1, in_size - 1)
        lam = min(max(src - i0, 0.0), 1.0)
        A[o, i0] += 1.0 - lam
        A[o, i1] += lam
    return A


def _pool_weights_np():
    A_h = _bilinear_matrix_np(H, KV_K)     # (3, H)
    A_w = _bilinear_matrix_np(W, KV_K)     # (3, W)
    wp = (A_h[:, None, :, None] * A_w[None, :, None, :]).reshape(N_TAP, S)
    return np.tile(wp, (1, B)).reshape(N_TAP, 1, ROWS).astype(np.float32)


def _head_mask_np():
    m = np.zeros((Q_DIM, V_DIM), np.float32)
    for g in range(NUM_HEADS):
        m[g * DQH:(g + 1) * DQH, g * DVH:(g + 1) * DVH] = 1.0
    return np.tile(m, (N_TAP, 1))          # (9*Dq, Dv)


def _batch_select_np():
    s = np.zeros((B, 1, ROWS), np.float32)
    for b in range(B):
        s[b, 0, b * S:(b + 1) * S] = 1.0
    return s


# ------------------------- parameter preparation ------------------------------
def _conv_flat(w):
    """(Cout, Cin, 3, 3) -> (Cout, 9*Cin), column block t = kh*3 + kw."""
    cout, cin = w.shape[0], w.shape[1]
    return jnp.transpose(w, (0, 2, 3, 1)).reshape(cout, N_TAP * cin)


def _ln_cols(w):
    """(D, H, W) -> (D, ROWS): flatten spatial, tile over batch."""
    return jnp.tile(w.reshape(EMBED_DIM, S), (1, B))


def prepare_params(p):
    """Rearrange PyTorch-layout parameters into the kernel's channels-first,
    tap-concatenated matmul layouts (weights pre-cast to bf16 -- identical to
    the in-kernel bf16 operand cast)."""
    # Fused Q/K/V weight: Q (1x1) lives in the center-tap (t=4) column block.
    wq_flat = jnp.concatenate(
        [jnp.zeros((Q_DIM, 4 * EMBED_DIM), jnp.float32),
         p["wq"][:, :, 0, 0],
         jnp.zeros((Q_DIM, 4 * EMBED_DIM), jnp.float32)], axis=1)
    wqkv = jnp.concatenate([wq_flat, _conv_flat(p["wk"]), _conv_flat(p["wv"])], axis=0)
    bqkv = jnp.concatenate([p["bq"], p["bk"], p["bv"]]).reshape(-1, 1)
    return dict(
        bsel=jnp.asarray(_batch_select_np()),
        masks=jnp.asarray(_edge_masks_np()),
        wpool=jnp.asarray(_pool_weights_np()),
        ln1w=_ln_cols(p["ln1_w"]), ln1b=_ln_cols(p["ln1_b"]),
        ln2w=_ln_cols(p["ln2_w"]), ln2b=_ln_cols(p["ln2_b"]),
        wqkv=wqkv.astype(jnp.bfloat16), bqkv=bqkv,
        hmask=jnp.asarray(_head_mask_np()),
        wbias=p["wbias"].astype(jnp.bfloat16), bbias=p["bbias"].reshape(-1, 1),
        wu=_conv_flat(p["wu"]).astype(jnp.bfloat16), bu=p["bu"].reshape(-1, 1),
        wff1=p["wff1"][:, :, 0, 0].astype(jnp.bfloat16), bff1=p["bff1"].reshape(-1, 1),
        wff2=p["wff2"][:, :, 0, 0].astype(jnp.bfloat16), bff2=p["bff2"].reshape(-1, 1),
    )


# ------------------------------ forward pass ----------------------------------
@jax.jit
def fc_transformer_block(x_nchw, kp):
    # NCHW -> channels-first flat columns (D, B*H*W): lane-dense everywhere.
    x_cf = jnp.transpose(x_nchw, (1, 0, 2, 3)).reshape(EMBED_DIM, ROWS)
    args = (x_cf, kp["bsel"], kp["masks"], kp["wpool"],
            kp["ln1w"], kp["ln1b"], kp["ln2w"], kp["ln2b"],
            kp["wqkv"], kp["bqkv"], kp["hmask"],
            kp["wbias"], kp["bbias"], kp["wu"], kp["bu"],
            kp["wff1"], kp["bff1"], kp["wff2"], kp["bff2"])
    out_cf = pl.pallas_call(
        _fc_block_kernel,
        out_shape=jax.ShapeDtypeStruct((EMBED_DIM, ROWS), jnp.float32),
        # Whole arrays, VMEM-resident, single grid-less kernel invocation.
        in_specs=[pl.BlockSpec(memory_space=pltpu.MemorySpace.VMEM)
                  for _ in range(len(args))],
        out_specs=pl.BlockSpec(memory_space=pltpu.MemorySpace.VMEM),
    )(*args)
    out = out_cf.reshape(EMBED_DIM, B, H, W)
    return jnp.transpose(out, (1, 0, 2, 3))               # back to NCHW


# --------------------------------- params -------------------------------------
def init_params(key):
    keys = jax.random.split(key, 12)

    def w(k, shape, scale=0.05):
        return scale * jax.random.normal(k, shape, dtype=jnp.float32)

    return {
        "ln1_w": jnp.ones((EMBED_DIM, H, W), jnp.float32),
        "ln1_b": jnp.zeros((EMBED_DIM, H, W), jnp.float32),
        "ln2_w": jnp.ones((EMBED_DIM, H, W), jnp.float32),
        "ln2_b": jnp.zeros((EMBED_DIM, H, W), jnp.float32),
        "wq": w(keys[0], (Q_DIM, EMBED_DIM, 1, 1)), "bq": w(keys[1], (Q_DIM,), 0.01),
        "wk": w(keys[2], (Q_DIM, EMBED_DIM, 3, 3)), "bk": w(keys[3], (Q_DIM,), 0.01),
        "wv": w(keys[4], (V_DIM, EMBED_DIM, 3, 3)), "bv": w(keys[5], (V_DIM,), 0.01),
        "wbias": w(keys[6], (V_DIM, EMBED_DIM)), "bbias": w(keys[7], (V_DIM,), 0.01),
        "wu": w(keys[8], (EMBED_DIM, V_DIM, 3, 3)), "bu": w(keys[9], (EMBED_DIM,), 0.01),
        "wff1": w(keys[10], (HIDDEN_DIM, EMBED_DIM, 1, 1)),
        "bff1": jnp.zeros((HIDDEN_DIM,), jnp.float32),
        "wff2": w(keys[11], (EMBED_DIM, HIDDEN_DIM, 1, 1)),
        "bff2": jnp.zeros((EMBED_DIM,), jnp.float32),
    }


if __name__ == "__main__":
    key = jax.random.PRNGKey(0)
    pkey, xkey = jax.random.split(key)
    params = init_params(pkey)
    kparams = prepare_params(params)
    x = jax.random.normal(xkey, (B, EMBED_DIM, H, W), dtype=jnp.float32)

    out = fc_transformer_block(x, kparams)
    out = jax.block_until_ready(out)

    assert out.shape == (B, EMBED_DIM, H, W), out.shape
    assert bool(jnp.all(jnp.isfinite(out)))
    print("KERNEL_OK")
</pallas_src>

<mosaic_0001>
module attributes {stable_mosaic.version = 11 : i64} {
  func.func @_fc_block_kernel(%arg0: memref<16x128xf32, #tpu.memory_space<vmem>>, %arg1: memref<2x1x128xf32, #tpu.memory_space<vmem>>, %arg2: memref<9x1x128xf32, #tpu.memory_space<vmem>>, %arg3: memref<9x1x128xf32, #tpu.memory_space<vmem>>, %arg4: memref<16x128xf32, #tpu.memory_space<vmem>>, %arg5: memref<16x128xf32, #tpu.memory_space<vmem>>, %arg6: memref<16x128xf32, #tpu.memory_space<vmem>>, %arg7: memref<16x128xf32, #tpu.memory_space<vmem>>, %arg8: memref<80x144xbf16, #tpu.memory_space<vmem>>, %arg9: memref<80x1xf32, #tpu.memory_space<vmem>>, %arg10: memref<288x16xf32, #tpu.memory_space<vmem>>, %arg11: memref<16x16xbf16, #tpu.memory_space<vmem>>, %arg12: memref<16x1xf32, #tpu.memory_space<vmem>>, %arg13: memref<16x144xbf16, #tpu.memory_space<vmem>>, %arg14: memref<16x1xf32, #tpu.memory_space<vmem>>, %arg15: memref<32x16xbf16, #tpu.memory_space<vmem>>, %arg16: memref<32x1xf32, #tpu.memory_space<vmem>>, %arg17: memref<16x32xbf16, #tpu.memory_space<vmem>>, %arg18: memref<16x1xf32, #tpu.memory_space<vmem>>, %arg19: memref<16x128xf32, #tpu.memory_space<vmem>>) attributes {dimension_semantics = [], scalar_prefetch = 0 : i64, scratch_operands = 0 : i64, tpu.core_type = #tpu.core_type<tc>} {
    %c0 = arith.constant 0 : index
    %c0_0 = arith.constant 0 : index
    %0 = vector.load %arg0[%c0, %c0_0] : memref<16x128xf32, #tpu.memory_space<vmem>>, vector<16x128xf32>
    %c0_1 = arith.constant 0 : index
    %c0_2 = arith.constant 0 : index
    %c0_3 = arith.constant 0 : index
    %1 = vector.load %arg1[%c0_1, %c0_2, %c0_3] : memref<2x1x128xf32, #tpu.memory_space<vmem>>, vector<2x1x128xf32>
    %2 = vector.extract_strided_slice %1 {offsets = [0, 0, 0], sizes = [1, 1, 128], strides = [1, 1, 1]} : vector<2x1x128xf32> to vector<1x1x128xf32>
    %3 = vector.shape_cast %2 : vector<1x1x128xf32> to vector<1x128xf32>
    %4 = vector.extract_strided_slice %1 {offsets = [1, 0, 0], sizes = [1, 1, 128], strides = [1, 1, 1]} : vector<2x1x128xf32> to vector<1x1x128xf32>
    %5 = vector.shape_cast %4 : vector<1x1x128xf32> to vector<1x128xf32>
    %c0_4 = arith.constant 0 : index
    %c0_5 = arith.constant 0 : index
    %c0_6 = arith.constant 0 : index
    %6 = vector.load %arg2[%c0_4, %c0_5, %c0_6] : memref<9x1x128xf32, #tpu.memory_space<vmem>>, vector<9x1x128xf32>
    %c0_7 = arith.constant 0 : index
    %c0_8 = arith.constant 0 : index
    %c0_9 = arith.constant 0 : index
    %7 = vector.load %arg3[%c0_7, %c0_8, %c0_9] : memref<9x1x128xf32, #tpu.memory_space<vmem>>, vector<9x1x128xf32>
    %c0_10 = arith.constant 0 : index
    %c0_11 = arith.constant 0 : index
    %8 = vector.load %arg4[%c0_10, %c0_11] : memref<16x128xf32, #tpu.memory_space<vmem>>, vector<16x128xf32>
    %c0_12 = arith.constant 0 : index
    %c0_13 = arith.constant 0 : index
    %9 = vector.load %arg5[%c0_12, %c0_13] : memref<16x128xf32, #tpu.memory_space<vmem>>, vector<16x128xf32>
    %cst = arith.constant 0.000000e+00 : f32
    %10 = vector.broadcast %cst : f32 to vector<1x128xf32>
    %11 = vector.broadcast %3 : vector<1x128xf32> to vector<16x128xf32>
    %12 = arith.mulf %0, %11 : vector<16x128xf32>
    %13 = vector.shape_cast %12 : vector<16x128xf32> to vector<1x16x128xf32>
    %cst_14 = arith.constant dense<0.000000e+00> : vector<1xf32>
    %14 = vector.multi_reduction <add>, %13, %cst_14 [1, 2] : vector<1x16x128xf32> to vector<1xf32>
    %15 = vector.shape_cast %14 : vector<1xf32> to vector<1x1x1xf32>
    %16 = vector.extract %15[0, 0, 0] : f32 from vector<1x1x1xf32>
    %17 = vector.broadcast %16 : f32 to vector<1x1xf32>
    %cst_15 = arith.constant 9.765625E-4 : f32
    %18 = vector.broadcast %cst_15 : f32 to vector<1x1xf32>
    %19 = arith.mulf %17, %18 : vector<1x1xf32>
    %20 = vector.broadcast %19 : vector<1x1xf32> to vector<1x128xf32>
    %21 = arith.mulf %20, %3 : vector<1x128xf32>
    %22 = arith.addf %10, %21 : vector<1x128xf32>
    %23 = vector.broadcast %5 : vector<1x128xf32> to vector<16x128xf32>
    %24 = arith.mulf %0, %23 : vector<16x128xf32>
    %25 = vector.shape_cast %24 : vector<16x128xf32> to vector<1x16x128xf32>
    %cst_16 = arith.constant dense<0.000000e+00> : vector<1xf32>
    %26 = vector.multi_reduction <add>, %25, %cst_16 [1, 2] : vector<1x16x128xf32> to vector<1xf32>
    %27 = vector.shape_cast %26 : vector<1xf32> to vector<1x1x1xf32>
    %28 = vector.extract %27[0, 0, 0] : f32 from vector<1x1x1xf32>
    %29 = vector.broadcast %28 : f32 to vector<1x1xf32>
    %cst_17 = arith.constant 9.765625E-4 : f32
    %30 = vector.broadcast %cst_17 : f32 to vector<1x1xf32>
    %31 = arith.mulf %29, %30 : vector<1x1xf32>
    %32 = vector.broadcast %31 : vector<1x1xf32> to vector<1x128xf32>
    %33 = arith.mulf %32, %5 : vector<1x128xf32>
    %34 = arith.addf %22, %33 : vector<1x128xf32>
    %35 = vector.broadcast %34 : vector<1x128xf32> to vector<16x128xf32>
    %36 = arith.subf %0, %35 : vector<16x128xf32>
    %37 = arith.mulf %36, %36 : vector<16x128xf32>
    %cst_18 = arith.constant 0.000000e+00 : f32
    %38 = vector.broadcast %cst_18 : f32 to vector<1x128xf32>
    %39 = vector.broadcast %3 : vector<1x128xf32> to vector<16x128xf32>
    %40 = arith.mulf %37, %39 : vector<16x128xf32>
    %41 = vector.shape_cast %40 : vector<16x128xf32> to vector<1x16x128xf32>
    %cst_19 = arith.constant dense<0.000000e+00> : vector<1xf32>
    %42 = vector.multi_reduction <add>, %41, %cst_19 [1, 2] : vector<1x16x128xf32> to vector<1xf32>
    %43 = vector.shape_cast %42 : vector<1xf32> to vector<1x1x1xf32>
    %44 = vector.extract %43[0, 0, 0] : f32 from vector<1x1x1xf32>
    %45 = vector.broadcast %44 : f32 to vector<1x1xf32>
    %cst_20 = arith.constant 9.765625E-4 : f32
    %46 = vector.broadcast %cst_20 : f32 to vector<1x1xf32>
    %47 = arith.mulf %45, %46 : vector<1x1xf32>
    %48 = vector.broadcast %47 : vector<1x1xf32> to vector<1x128xf32>
    %49 = arith.mulf %48, %3 : vector<1x128xf32>
    %50 = arith.addf %38, %49 : vector<1x128xf32>
    %51 = vector.broadcast %5 : vector<1x128xf32> to vector<16x128xf32>
    %52 = arith.mulf %37, %51 : vector<16x128xf32>
    %53 = vector.shape_cast %52 : vector<16x128xf32> to vector<1x16x128xf32>
    %cst_21 = arith.constant dense<0.000000e+00> : vector<1xf32>
    %54 = vector.multi_reduction <add>, %53, %cst_21 [1, 2] : vector<1x16x128xf32> to vector<1xf32>
    %55 = vector.shape_cast %54 : vector<1xf32> to vector<1x1x1xf32>
    %56 = vector.extract %55[0, 0, 0] : f32 from vector<1x1x1xf32>
    %57 = vector.broadcast %56 : f32 to vector<1x1xf32>
    %cst_22 = arith.constant 9.765625E-4 : f32
    %58 = vector.broadcast %cst_22 : f32 to vector<1x1xf32>
    %59 = arith.mulf %57, %58 : vector<1x1xf32>
    %60 = vector.broadcast %59 : vector<1x1xf32> to vector<1x128xf32>
    %61 = arith.mulf %60, %5 : vector<1x128xf32>
    %62 = arith.addf %50, %61 : vector<1x128xf32>
    %cst_23 = arith.constant 9.99999974E-6 : f32
    %63 = vector.broadcast %cst_23 : f32 to vector<1x128xf32>
    %64 = arith.addf %62, %63 : vector<1x128xf32>
    %65 = math.rsqrt %64 : vector<1x128xf32>
    %66 = vector.broadcast %65 : vector<1x128xf32> to vector<16x128xf32>
    %67 = arith.mulf %36, %66 : vector<16x128xf32>
    %68 = arith.mulf %67, %8 : vector<16x128xf32>
    %69 = arith.addf %68, %9 : vector<16x128xf32>
    %c9_i32 = arith.constant 9 : i32
    %70 = tpu.dynamic_rotate %69 by %c9_i32 dim 1 : vector<16x128xf32>, i32 -> vector<16x128xf32>
    %71 = vector.extract_strided_slice %6 {offsets = [0, 0, 0], sizes = [1, 1, 128], strides = [1, 1, 1]} : vector<9x1x128xf32> to vector<1x1x128xf32>
    %72 = vector.shape_cast %71 : vector<1x1x128xf32> to vector<1x128xf32>
    %73 = vector.broadcast %72 : vector<1x128xf32> to vector<16x128xf32>
    %74 = arith.mulf %73, %70 : vector<16x128xf32>
    %c8_i32 = arith.constant 8 : i32
    %75 = tpu.dynamic_rotate %69 by %c8_i32 dim 1 : vector<16x128xf32>, i32 -> vector<16x128xf32>
    %76 = vector.extract_strided_slice %6 {offsets = [1, 0, 0], sizes = [1, 1, 128], strides = [1, 1, 1]} : vector<9x1x128xf32> to vector<1x1x128xf32>
    %77 = vector.shape_cast %76 : vector<1x1x128xf32> to vector<1x128xf32>
    %78 = vector.broadcast %77 : vector<1x128xf32> to vector<16x128xf32>
    %79 = arith.mulf %78, %75 : vector<16x128xf32>
    %c7_i32 = arith.constant 7 : i32
    %80 = tpu.dynamic_rotate %69 by %c7_i32 dim 1 : vector<16x128xf32>, i32 -> vector<16x128xf32>
    %81 = vector.extract_strided_slice %6 {offsets = [2, 0, 0], sizes = [1, 1, 128], strides = [1, 1, 1]} : vector<9x1x128xf32> to vector<1x1x128xf32>
    %82 = vector.shape_cast %81 : vector<1x1x128xf32> to vector<1x128xf32>
    %83 = vector.broadcast %82 : vector<1x128xf32> to vector<16x128xf32>
    %84 = arith.mulf %83, %80 : vector<16x128xf32>
    %c1_i32 = arith.constant 1 : i32
    %85 = tpu.dynamic_rotate %69 by %c1_i32 dim 1 : vector<16x128xf32>, i32 -> vector<16x128xf32>
    %86 = vector.extract_strided_slice %6 {offsets = [3, 0, 0], sizes = [1, 1, 128], strides = [1, 1, 1]} : vector<9x1x128xf32> to vector<1x1x128xf32>
    %87 = vector.shape_cast %86 : vector<1x1x128xf32> to vector<1x128xf32>
    %88 = vector.broadcast %87 : vector<1x128xf32> to vector<16x128xf32>
    %89 = arith.mulf %88, %85 : vector<16x128xf32>
    %90 = vector.extract_strided_slice %6 {offsets = [4, 0, 0], sizes = [1, 1, 128], strides = [1, 1, 1]} : vector<9x1x128xf32> to vector<1x1x128xf32>
    %91 = vector.shape_cast %90 : vector<1x1x128xf32> to vector<1x128xf32>
    %92 = vector.broadcast %91 : vector<1x128xf32> to vector<16x128xf32>
    %93 = arith.mulf %92, %69 : vector<16x128xf32>
    %c127_i32 = arith.constant 127 : i32
    %94 = tpu.dynamic_rotate %69 by %c127_i32 dim 1 : vector<16x128xf32>, i32 -> vector<16x128xf32>
    %95 = vector.extract_strided_slice %6 {offsets = [5, 0, 0], sizes = [1, 1, 128], strides = [1, 1, 1]} : vector<9x1x128xf32> to vector<1x1x128xf32>
    %96 = vector.shape_cast %95 : vector<1x1x128xf32> to vector<1x128xf32>
    %97 = vector.broadcast %96 : vector<1x128xf32> to vector<16x128xf32>
    %98 = arith.mulf %97, %94 : vector<16x128xf32>
    %c121_i32 = arith.constant 121 : i32
    %99 = tpu.dynamic_rotate %69 by %c121_i32 dim 1 : vector<16x128xf32>, i32 -> vector<16x128xf32>
    %100 = vector.extract_strided_slice %6 {offsets = [6, 0, 0], sizes = [1, 1, 128], strides = [1, 1, 1]} : vector<9x1x128xf32> to vector<1x1x128xf32>
    %101 = vector.shape_cast %100 : vector<1x1x128xf32> to vector<1x128xf32>
    %102 = vector.broadcast %101 : vector<1x128xf32> to vector<16x128xf32>
    %103 = arith.mulf %102, %99 : vector<16x128xf32>
    %c120_i32 = arith.constant 120 : i32
    %104 = tpu.dynamic_rotate %69 by %c120_i32 dim 1 : vector<16x128xf32>, i32 -> vector<16x128xf32>
    %105 = vector.extract_strided_slice %6 {offsets = [7, 0, 0], sizes = [1, 1, 128], strides = [1, 1, 1]} : vector<9x1x128xf32> to vector<1x1x128xf32>
    %106 = vector.shape_cast %105 : vector<1x1x128xf32> to vector<1x128xf32>
    %107 = vector.broadcast %106 : vector<1x128xf32> to vector<16x128xf32>
    %108 = arith.mulf %107, %104 : vector<16x128xf32>
    %c119_i32 = arith.constant 119 : i32
    %109 = tpu.dynamic_rotate %69 by %c119_i32 dim 1 : vector<16x128xf32>, i32 -> vector<16x128xf32>
    %110 = vector.extract_strided_slice %6 {offsets = [8, 0, 0], sizes = [1, 1, 128], strides = [1, 1, 1]} : vector<9x1x128xf32> to vector<1x1x128xf32>
    %111 = vector.shape_cast %110 : vector<1x1x128xf32> to vector<1x128xf32>
    %112 = vector.broadcast %111 : vector<1x128xf32> to vector<16x128xf32>
    %113 = arith.mulf %112, %109 : vector<16x128xf32>
    %114 = tpu.concatenate %74, %79, %84, %89, %93, %98, %103, %108, %113 in 0 : vector<16x128xf32>, vector<16x128xf32>, vector<16x128xf32>, vector<16x128xf32>, vector<16x128xf32>, vector<16x128xf32>, vector<16x128xf32>, vector<16x128xf32>, vector<16x128xf32> -> vector<144x128xf32>
    %c0_24 = arith.constant 0 : index
    %c0_25 = arith.constant 0 : index
    %115 = vector.load %arg8[%c0_24, %c0_25] : memref<80x144xbf16, #tpu.memory_space<vmem>>, vector<80x144xbf16>
    %116 = arith.truncf %114 : vector<144x128xf32> to vector<144x128xbf16>
    %cst_26 = arith.constant dense<0.000000e+00> : vector<80x128xf32>
    %117 = tpu.matmul %115, %116, %cst_26 {dimension_numbers = #tpu.dot_dimension_numbers<[1], [0], [0], [1], [0, 0, 1, 1], [], []>} : vector<80x144xbf16>, vector<144x128xbf16>, vector<80x128xf32> -> vector<80x128xf32>
    %c0_27 = arith.constant 0 : index
    %c0_28 = arith.constant 0 : index
    %118 = vector.load %arg9[%c0_27, %c0_28] : memref<80x1xf32, #tpu.memory_space<vmem>>, vector<80x1xf32>
    %119 = vector.broadcast %118 : vector<80x1xf32> to vector<80x128xf32>
    %120 = arith.addf %117, %119 : vector<80x128xf32>
    %121 = vector.extract_strided_slice %120 {offsets = [0, 0], sizes = [32, 128], strides = [1, 1]} : vector<80x128xf32> to vector<32x128xf32>
    %122 = vector.extract_strided_slice %120 {offsets = [32, 0], sizes = [32, 128], strides = [1, 1]} : vector<80x128xf32> to vector<32x128xf32>
    %123 = vector.extract_strided_slice %120 {offsets = [64, 0], sizes = [16, 128], strides = [1, 1]} : vector<80x128xf32> to vector<16x128xf32>
    %cst_29 = arith.constant 0.000000e+00 : f32
    %124 = vector.broadcast %cst_29 : f32 to vector<32x128xf32>
    %125 = arith.maximumf %121, %124 : vector<32x128xf32>
    %126 = arith.mulf %125, %125 : vector<32x128xf32>
    %127 = arith.mulf %125, %125 : vector<32x128xf32>
    %128 = vector.shape_cast %127 : vector<32x128xf32> to vector<1x32x128xf32>
    %cst_30 = arith.constant dense<0.000000e+00> : vector<1xf32>
    %129 = vector.multi_reduction <add>, %128, %cst_30 [1, 2] : vector<1x32x128xf32> to vector<1xf32>
    %130 = vector.shape_cast %129 : vector<1xf32> to vector<1x1x1xf32>
    %131 = vector.extract %130[0, 0, 0] : f32 from vector<1x1x1xf32>
    %132 = vector.broadcast %131 : f32 to vector<1x1xf32>
    %133 = math.sqrt %132 : vector<1x1xf32>
    %134 = arith.mulf %126, %126 : vector<32x128xf32>
    %135 = vector.shape_cast %134 : vector<32x128xf32> to vector<1x32x128xf32>
    %cst_31 = arith.constant dense<0.000000e+00> : vector<1xf32>
    %136 = vector.multi_reduction <add>, %135, %cst_31 [1, 2] : vector<1x32x128xf32> to vector<1xf32>
    %137 = vector.shape_cast %136 : vector<1xf32> to vector<1x1x1xf32>
    %138 = vector.extract %137[0, 0, 0] : f32 from vector<1x1x1xf32>
    %139 = vector.broadcast %138 : f32 to vector<1x1xf32>
    %140 = math.sqrt %139 : vector<1x1xf32>
    %cst_32 = arith.constant 1.000000e-30 : f32
    %141 = vector.broadcast %cst_32 : f32 to vector<1x1xf32>
    %142 = arith.maximumf %140, %141 : vector<1x1xf32>
    %143 = arith.divf %133, %142 : vector<1x1xf32>
    %144 = vector.broadcast %143 : vector<1x1xf32> to vector<32x128xf32>
    %145 = arith.mulf %126, %144 : vector<32x128xf32>
    %cst_33 = arith.constant 0.000000e+00 : f32
    %146 = vector.broadcast %cst_33 : f32 to vector<32x128xf32>
    %147 = arith.maximumf %122, %146 : vector<32x128xf32>
    %148 = arith.mulf %147, %147 : vector<32x128xf32>
    %149 = arith.mulf %147, %147 : vector<32x128xf32>
    %150 = vector.shape_cast %149 : vector<32x128xf32> to vector<1x32x128xf32>
    %cst_34 = arith.constant dense<0.000000e+00> : vector<1xf32>
    %151 = vector.multi_reduction <add>, %150, %cst_34 [1, 2] : vector<1x32x128xf32> to vector<1xf32>
    %152 = vector.shape_cast %151 : vector<1xf32> to vector<1x1x1xf32>
    %153 = vector.extract %152[0, 0, 0] : f32 from vector<1x1x1xf32>
    %154 = vector.broadcast %153 : f32 to vector<1x1xf32>
    %155 = math.sqrt %154 : vector<1x1xf32>
    %156 = arith.mulf %148, %148 : vector<32x128xf32>
    %157 = vector.shape_cast %156 : vector<32x128xf32> to vector<1x32x128xf32>
    %cst_35 = arith.constant dense<0.000000e+00> : vector<1xf32>
    %158 = vector.multi_reduction <add>, %157, %cst_35 [1, 2] : vector<1x32x128xf32> to vector<1xf32>
    %159 = vector.shape_cast %158 : vector<1xf32> to vector<1x1x1xf32>
    %160 = vector.extract %159[0, 0, 0] : f32 from vector<1x1x1xf32>
    %161 = vector.broadcast %160 : f32 to vector<1x1xf32>
    %162 = math.sqrt %161 : vector<1x1xf32>
    %cst_36 = arith.constant 1.000000e-30 : f32
    %163 = vector.broadcast %cst_36 : f32 to vector<1x1xf32>
    %164 = arith.maximumf %162, %163 : vector<1x1xf32>
    %165 = arith.divf %155, %164 : vector<1x1xf32>
    %166 = vector.broadcast %165 : vector<1x1xf32> to vector<32x128xf32>
    %167 = arith.mulf %148, %166 : vector<32x128xf32>
    %168 = vector.extract_strided_slice %7 {offsets = [0, 0, 0], sizes = [1, 1, 128], strides = [1, 1, 1]} : vector<9x1x128xf32> to vector<1x1x128xf32>
    %169 = vector.shape_cast %168 : vector<1x1x128xf32> to vector<1x128xf32>
    %170 = vector.broadcast %169 : vector<1x128xf32> to vector<32x128xf32>
    %171 = arith.mulf %167, %170 : vector<32x128xf32>
    %172 = vector.extract_strided_slice %7 {offsets = [1, 0, 0], sizes = [1, 1, 128], strides = [1, 1, 1]} : vector<9x1x128xf32> to vector<1x1x128xf32>
    %173 = vector.shape_cast %172 : vector<1x1x128xf32> to vector<1x128xf32>
    %174 = vector.broadcast %173 : vector<1x128xf32> to vector<32x128xf32>
    %175 = arith.mulf %167, %174 : vector<32x128xf32>
    %176 = vector.extract_strided_slice %7 {offsets = [2, 0, 0], sizes = [1, 1, 128], strides = [1, 1, 1]} : vector<9x1x128xf32> to vector<1x1x128xf32>
    %177 = vector.shape_cast %176 : vector<1x1x128xf32> to vector<1x128xf32>
    %178 = vector.broadcast %177 : vector<1x128xf32> to vector<32x128xf32>
    %179 = arith.mulf %167, %178 : vector<32x128xf32>
    %180 = vector.extract_strided_slice %7 {offsets = [3, 0, 0], sizes = [1, 1, 128], strides = [1, 1, 1]} : vector<9x1x128xf32> to vector<1x1x128xf32>
    %181 = vector.shape_cast %180 : vector<1x1x128xf32> to vector<1x128xf32>
    %182 = vector.broadcast %181 : vector<1x128xf32> to vector<32x128xf32>
    %183 = arith.mulf %167, %182 : vector<32x128xf32>
    %184 = vector.extract_strided_slice %7 {offsets = [4, 0, 0], sizes = [1, 1, 128], strides = [1, 1, 1]} : vector<9x1x128xf32> to vector<1x1x128xf32>
    %185 = vector.shape_cast %184 : vector<1x1x128xf32> to vector<1x128xf32>
    %186 = vector.broadcast %185 : vector<1x128xf32> to vector<32x128xf32>
    %187 = arith.mulf %167, %186 : vector<32x128xf32>
    %188 = vector.extract_strided_slice %7 {offsets = [5, 0, 0], sizes = [1, 1, 128], strides = [1, 1, 1]} : vector<9x1x128xf32> to vector<1x1x128xf32>
    %189 = vector.shape_cast %188 : vector<1x1x128xf32> to vector<1x128xf32>
    %190 = vector.broadcast %189 : vector<1x128xf32> to vector<32x128xf32>
    %191 = arith.mulf %167, %190 : vector<32x128xf32>
    %192 = vector.extract_strided_slice %7 {offsets = [6, 0, 0], sizes = [1, 1, 128], strides = [1, 1, 1]} : vector<9x1x128xf32> to vector<1x1x128xf32>
    %193 = vector.shape_cast %192 : vector<1x1x128xf32> to vector<1x128xf32>
    %194 = vector.broadcast %193 : vector<1x128xf32> to vector<32x128xf32>
    %195 = arith.mulf %167, %194 : vector<32x128xf32>
    %196 = vector.extract_strided_slice %7 {offsets = [7, 0, 0], sizes = [1, 1, 128], strides = [1, 1, 1]} : vector<9x1x128xf32> to vector<1x1x128xf32>
    %197 = vector.shape_cast %196 : vector<1x1x128xf32> to vector<1x128xf32>
    %198 = vector.broadcast %197 : vector<1x128xf32> to vector<32x128xf32>
    %199 = arith.mulf %167, %198 : vector<32x128xf32>
    %200 = vector.extract_strided_slice %7 {offsets = [8, 0, 0], sizes = [1, 1, 128], strides = [1, 1, 1]} : vector<9x1x128xf32> to vector<1x1x128xf32>
    %201 = vector.shape_cast %200 : vector<1x1x128xf32> to vector<1x128xf32>
    %202 = vector.broadcast %201 : vector<1x128xf32> to vector<32x128xf32>
    %203 = arith.mulf %167, %202 : vector<32x128xf32>
    %204 = tpu.concatenate %171, %175, %179, %183, %187, %191, %195, %199, %203 in 0 : vector<32x128xf32>, vector<32x128xf32>, vector<32x128xf32>, vector<32x128xf32>, vector<32x128xf32>, vector<32x128xf32>, vector<32x128xf32>, vector<32x128xf32>, vector<32x128xf32> -> vector<288x128xf32>
    %c9_i32_37 = arith.constant 9 : i32
    %205 = tpu.dynamic_rotate %145 by %c9_i32_37 dim 1 : vector<32x128xf32>, i32 -> vector<32x128xf32>
    %206 = vector.extract_strided_slice %6 {offsets = [0, 0, 0], sizes = [1, 1, 128], strides = [1, 1, 1]} : vector<9x1x128xf32> to vector<1x1x128xf32>
    %207 = vector.shape_cast %206 : vector<1x1x128xf32> to vector<1x128xf32>
    %208 = vector.broadcast %207 : vector<1x128xf32> to vector<32x128xf32>
    %209 = arith.mulf %208, %205 : vector<32x128xf32>
    %c8_i32_38 = arith.constant 8 : i32
    %210 = tpu.dynamic_rotate %145 by %c8_i32_38 dim 1 : vector<32x128xf32>, i32 -> vector<32x128xf32>
    %211 = vector.extract_strided_slice %6 {offsets = [1, 0, 0], sizes = [1, 1, 128], strides = [1, 1, 1]} : vector<9x1x128xf32> to vector<1x1x128xf32>
    %212 = vector.shape_cast %211 : vector<1x1x128xf32> to vector<1x128xf32>
    %213 = vector.broadcast %212 : vector<1x128xf32> to vector<32x128xf32>
    %214 = arith.mulf %213, %210 : vector<32x128xf32>
    %c7_i32_39 = arith.constant 7 : i32
    %215 = tpu.dynamic_rotate %145 by %c7_i32_39 dim 1 : vector<32x128xf32>, i32 -> vector<32x128xf32>
    %216 = vector.extract_strided_slice %6 {offsets = [2, 0, 0], sizes = [1, 1, 128], strides = [1, 1, 1]} : vector<9x1x128xf32> to vector<1x1x128xf32>
    %217 = vector.shape_cast %216 : vector<1x1x128xf32> to vector<1x128xf32>
    %218 = vector.broadcast %217 : vector<1x128xf32> to vector<32x128xf32>
    %219 = arith.mulf %218, %215 : vector<32x128xf32>
    %c1_i32_40 = arith.constant 1 : i32
    %220 = tpu.dynamic_rotate %145 by %c1_i32_40 dim 1 : vector<32x128xf32>, i32 -> vector<32x128xf32>
    %221 = vector.extract_strided_slice %6 {offsets = [3, 0, 0], sizes = [1, 1, 128], strides = [1, 1, 1]} : vector<9x1x128xf32> to vector<1x1x128xf32>
    %222 = vector.shape_cast %221 : vector<1x1x128xf32> to vector<1x128xf32>
    %223 = vector.broadcast %222 : vector<1x128xf32> to vector<32x128xf32>
    %224 = arith.mulf %223, %220 : vector<32x128xf32>
    %225 = vector.extract_strided_slice %6 {offsets = [4, 0, 0], sizes = [1, 1, 128], strides = [1, 1, 1]} : vector<9x1x128xf32> to vector<1x1x128xf32>
    %226 = vector.shape_cast %225 : vector<1x1x128xf32> to vector<1x128xf32>
    %227 = vector.broadcast %226 : vector<1x128xf32> to vector<32x128xf32>
    %228 = arith.mulf %227, %145 : vector<32x128xf32>
    %c127_i32_41 = arith.constant 127 : i32
    %229 = tpu.dynamic_rotate %145 by %c127_i32_41 dim 1 : vector<32x128xf32>, i32 -> vector<32x128xf32>
    %230 = vector.extract_strided_slice %6 {offsets = [5, 0, 0], sizes = [1, 1, 128], strides = [1, 1, 1]} : vector<9x1x128xf32> to vector<1x1x128xf32>
    %231 = vector.shape_cast %230 : vector<1x1x128xf32> to vector<1x128xf32>
    %232 = vector.broadcast %231 : vector<1x128xf32> to vector<32x128xf32>
    %233 = arith.mulf %232, %229 : vector<32x128xf32>
    %c121_i32_42 = arith.constant 121 : i32
    %234 = tpu.dynamic_rotate %145 by %c121_i32_42 dim 1 : vector<32x128xf32>, i32 -> vector<32x128xf32>
    %235 = vector.extract_strided_slice %6 {offsets = [6, 0, 0], sizes = [1, 1, 128], strides = [1, 1, 1]} : vector<9x1x128xf32> to vector<1x1x128xf32>
    %236 = vector.shape_cast %235 : vector<1x1x128xf32> to vector<1x128xf32>
    %237 = vector.broadcast %236 : vector<1x128xf32> to vector<32x128xf32>
    %238 = arith.mulf %237, %234 : vector<32x128xf32>
    %c120_i32_43 = arith.constant 120 : i32
    %239 = tpu.dynamic_rotate %145 by %c120_i32_43 dim 1 : vector<32x128xf32>, i32 -> vector<32x128xf32>
    %240 = vector.extract_strided_slice %6 {offsets = [7, 0, 0], sizes = [1, 1, 128], strides = [1, 1, 1]} : vector<9x1x128xf32> to vector<1x1x128xf32>
    %241 = vector.shape_cast %240 : vector<1x1x128xf32> to vector<1x128xf32>
    %242 = vector.broadcast %241 : vector<1x128xf32> to vector<32x128xf32>
    %243 = arith.mulf %242, %239 : vector<32x128xf32>
    %c119_i32_44 = arith.constant 119 : i32
    %244 = tpu.dynamic_rotate %145 by %c119_i32_44 dim 1 : vector<32x128xf32>, i32 -> vector<32x128xf32>
    %245 = vector.extract_strided_slice %6 {offsets = [8, 0, 0], sizes = [1, 1, 128], strides = [1, 1, 1]} : vector<9x1x128xf32> to vector<1x1x128xf32>
    %246 = vector.shape_cast %245 : vector<1x1x128xf32> to vector<1x128xf32>
    %247 = vector.broadcast %246 : vector<1x128xf32> to vector<32x128xf32>
    %248 = arith.mulf %247, %244 : vector<32x128xf32>
    %249 = tpu.concatenate %209, %214, %219, %224, %228, %233, %238, %243, %248 in 0 : vector<32x128xf32>, vector<32x128xf32>, vector<32x128xf32>, vector<32x128xf32>, vector<32x128xf32>, vector<32x128xf32>, vector<32x128xf32>, vector<32x128xf32>, vector<32x128xf32> -> vector<288x128xf32>
    %c0_45 = arith.constant 0 : index
    %c0_46 = arith.constant 0 : index
    %250 = vector.load %arg10[%c0_45, %c0_46] : memref<288x16xf32, #tpu.memory_space<vmem>>, vector<288x16xf32>
    %251 = arith.truncf %123 : vector<16x128xf32> to vector<16x128xbf16>
    %252 = vector.broadcast %3 : vector<1x128xf32> to vector<288x128xf32>
    %253 = arith.mulf %204, %252 : vector<288x128xf32>
    %254 = arith.truncf %253 : vector<288x128xf32> to vector<288x128xbf16>
    %cst_47 = arith.constant dense<0.000000e+00> : vector<288x16xf32>
    %255 = tpu.matmul %254, %251, %cst_47 {dimension_numbers = #tpu.dot_dimension_numbers<[1], [1], [0], [0], [0, 0, 1, 0], [], []>} : vector<288x128xbf16>, vector<16x128xbf16>, vector<288x16xf32> -> vector<288x16xf32>
    %cst_48 = arith.constant -3.55555558 : f32
    %cst_49 = arith.constant 3.55555558 : f32
    %256 = vector.broadcast %cst_48 : f32 to vector<288x16xf32>
    %257 = arith.maximumf %256, %255 : vector<288x16xf32>
    %258 = vector.broadcast %cst_49 : f32 to vector<288x16xf32>
    %259 = arith.minimumf %258, %257 : vector<288x16xf32>
    %260 = arith.mulf %259, %250 : vector<288x16xf32>
    %261 = vector.broadcast %3 : vector<1x128xf32> to vector<288x128xf32>
    %262 = arith.mulf %249, %261 : vector<288x128xf32>
    %263 = vector.broadcast %5 : vector<1x128xf32> to vector<288x128xf32>
    %264 = arith.mulf %204, %263 : vector<288x128xf32>
    %265 = arith.truncf %264 : vector<288x128xf32> to vector<288x128xbf16>
    %cst_50 = arith.constant dense<0.000000e+00> : vector<288x16xf32>
    %266 = tpu.matmul %265, %251, %cst_50 {dimension_numbers = #tpu.dot_dimension_numbers<[1], [1], [0], [0], [0, 0, 1, 0], [], []>} : vector<288x128xbf16>, vector<16x128xbf16>, vector<288x16xf32> -> vector<288x16xf32>
    %cst_51 = arith.constant -3.55555558 : f32
    %cst_52 = arith.constant 3.55555558 : f32
    %267 = vector.broadcast %cst_51 : f32 to vector<288x16xf32>
    %268 = arith.maximumf %267, %266 : vector<288x16xf32>
    %269 = vector.broadcast %cst_52 : f32 to vector<288x16xf32>
    %270 = arith.minimumf %269, %268 : vector<288x16xf32>
    %271 = arith.mulf %270, %250 : vector<288x16xf32>
    %272 = vector.broadcast %5 : vector<1x128xf32> to vector<288x128xf32>
    %273 = arith.mulf %249, %272 : vector<288x128xf32>
    %274 = tpu.concatenate %260, %271 in 0 : vector<288x16xf32>, vector<288x16xf32> -> vector<576x16xf32>
    %275 = tpu.concatenate %262, %273 in 0 : vector<288x128xf32>, vector<288x128xf32> -> vector<576x128xf32>
    %276 = arith.truncf %274 : vector<576x16xf32> to vector<576x16xbf16>
    %277 = arith.truncf %275 : vector<576x128xf32> to vector<576x128xbf16>
    %cst_53 = arith.constant dense<0.000000e+00> : vector<16x128xf32>
    %278 = tpu.matmul %276, %277, %cst_53 {dimension_numbers = #tpu.dot_dimension_numbers<[0], [0], [1], [1], [0, 1, 1, 1], [], []>} : vector<576x16xbf16>, vector<576x128xbf16>, vector<16x128xf32> -> vector<16x128xf32>
    %cst_54 = arith.constant 0.000000e+00 : f32
    %279 = vector.broadcast %cst_54 : f32 to vector<16x128xf32>
    %280 = vector.broadcast %3 : vector<1x128xf32> to vector<16x128xf32>
    %281 = arith.mulf %69, %280 : vector<16x128xf32>
    %cst_55 = arith.constant dense<0.000000e+00> : vector<16xf32>
    %282 = vector.multi_reduction <add>, %281, %cst_55 [1] : vector<16x128xf32> to vector<16xf32>
    %283 = vector.shape_cast %282 : vector<16xf32> to vector<16x1xf32>
    %cst_56 = arith.constant 1.562500e-02 : f32
    %284 = vector.broadcast %cst_56 : f32 to vector<16x1xf32>
    %285 = arith.mulf %283, %284 : vector<16x1xf32>
    %286 = vector.broadcast %285 : vector<16x1xf32> to vector<16x128xf32>
    %287 = vector.broadcast %3 : vector<1x128xf32> to vector<16x128xf32>
    %288 = arith.mulf %286, %287 : vector<16x128xf32>
    %289 = arith.addf %279, %288 : vector<16x128xf32>
    %290 = vector.broadcast %5 : vector<1x128xf32> to vector<16x128xf32>
    %291 = arith.mulf %69, %290 : vector<16x128xf32>
    %cst_57 = arith.constant dense<0.000000e+00> : vector<16xf32>
    %292 = vector.multi_reduction <add>, %291, %cst_57 [1] : vector<16x128xf32> to vector<16xf32>
    %293 = vector.shape_cast %292 : vector<16xf32> to vector<16x1xf32>
    %cst_58 = arith.constant 1.562500e-02 : f32
    %294 = vector.broadcast %cst_58 : f32 to vector<16x1xf32>
    %295 = arith.mulf %293, %294 : vector<16x1xf32>
    %296 = vector.broadcast %295 : vector<16x1xf32> to vector<16x128xf32>
    %297 = vector.broadcast %5 : vector<1x128xf32> to vector<16x128xf32>
    %298 = arith.mulf %296, %297 : vector<16x128xf32>
    %299 = arith.addf %289, %298 : vector<16x128xf32>
    %c0_59 = arith.constant 0 : index
    %c0_60 = arith.constant 0 : index
    %300 = vector.load %arg11[%c0_59, %c0_60] : memref<16x16xbf16, #tpu.memory_space<vmem>>, vector<16x16xbf16>
    %301 = arith.truncf %299 : vector<16x128xf32> to vector<16x128xbf16>
    %cst_61 = arith.constant dense<0.000000e+00> : vector<16x128xf32>
    %302 = tpu.matmul %300, %301, %cst_61 {dimension_numbers = #tpu.dot_dimension_numbers<[1], [0], [0], [1], [0, 0, 1, 1], [], []>} : vector<16x16xbf16>, vector<16x128xbf16>, vector<16x128xf32> -> vector<16x128xf32>
    %303 = arith.addf %278, %302 : vector<16x128xf32>
    %c0_62 = arith.constant 0 : index
    %c0_63 = arith.constant 0 : index
    %304 = vector.load %arg12[%c0_62, %c0_63] : memref<16x1xf32, #tpu.memory_space<vmem>>, vector<16x1xf32>
    %305 = vector.broadcast %304 : vector<16x1xf32> to vector<16x128xf32>
    %306 = arith.addf %303, %305 : vector<16x128xf32>
    %c9_i32_64 = arith.constant 9 : i32
    %307 = tpu.dynamic_rotate %306 by %c9_i32_64 dim 1 : vector<16x128xf32>, i32 -> vector<16x128xf32>
    %308 = vector.extract_strided_slice %6 {offsets = [0, 0, 0], sizes = [1, 1, 128], strides = [1, 1, 1]} : vector<9x1x128xf32> to vector<1x1x128xf32>
    %309 = vector.shape_cast %308 : vector<1x1x128xf32> to vector<1x128xf32>
    %310 = vector.broadcast %309 : vector<1x128xf32> to vector<16x128xf32>
    %311 = arith.mulf %310, %307 : vector<16x128xf32>
    %c8_i32_65 = arith.constant 8 : i32
    %312 = tpu.dynamic_rotate %306 by %c8_i32_65 dim 1 : vector<16x128xf32>, i32 -> vector<16x128xf32>
    %313 = vector.extract_strided_slice %6 {offsets = [1, 0, 0], sizes = [1, 1, 128], strides = [1, 1, 1]} : vector<9x1x128xf32> to vector<1x1x128xf32>
    %314 = vector.shape_cast %313 : vector<1x1x128xf32> to vector<1x128xf32>
    %315 = vector.broadcast %314 : vector<1x128xf32> to vector<16x128xf32>
    %316 = arith.mulf %315, %312 : vector<16x128xf32>
    %c7_i32_66 = arith.constant 7 : i32
    %317 = tpu.dynamic_rotate %306 by %c7_i32_66 dim 1 : vector<16x128xf32>, i32 -> vector<16x128xf32>
    %318 = vector.extract_strided_slice %6 {offsets = [2, 0, 0], sizes = [1, 1, 128], strides = [1, 1, 1]} : vector<9x1x128xf32> to vector<1x1x128xf32>
    %319 = vector.shape_cast %318 : vector<1x1x128xf32> to vector<1x128xf32>
    %320 = vector.broadcast %319 : vector<1x128xf32> to vector<16x128xf32>
    %321 = arith.mulf %320, %317 : vector<16x128xf32>
    %c1_i32_67 = arith.constant 1 : i32
    %322 = tpu.dynamic_rotate %306 by %c1_i32_67 dim 1 : vector<16x128xf32>, i32 -> vector<16x128xf32>
    %323 = vector.extract_strided_slice %6 {offsets = [3, 0, 0], sizes = [1, 1, 128], strides = [1, 1, 1]} : vector<9x1x128xf32> to vector<1x1x128xf32>
    %324 = vector.shape_cast %323 : vector<1x1x128xf32> to vector<1x128xf32>
    %325 = vector.broadcast %324 : vector<1x128xf32> to vector<16x128xf32>
    %326 = arith.mulf %325, %322 : vector<16x128xf32>
    %327 = vector.extract_strided_slice %6 {offsets = [4, 0, 0], sizes = [1, 1, 128], strides = [1, 1, 1]} : vector<9x1x128xf32> to vector<1x1x128xf32>
    %328 = vector.shape_cast %327 : vector<1x1x128xf32> to vector<1x128xf32>
    %329 = vector.broadcast %328 : vector<1x128xf32> to vector<16x128xf32>
    %330 = arith.mulf %329, %306 : vector<16x128xf32>
    %c127_i32_68 = arith.constant 127 : i32
    %331 = tpu.dynamic_rotate %306 by %c127_i32_68 dim 1 : vector<16x128xf32>, i32 -> vector<16x128xf32>
    %332 = vector.extract_strided_slice %6 {offsets = [5, 0, 0], sizes = [1, 1, 128], strides = [1, 1, 1]} : vector<9x1x128xf32> to vector<1x1x128xf32>
    %333 = vector.shape_cast %332 : vector<1x1x128xf32> to vector<1x128xf32>
    %334 = vector.broadcast %333 : vector<1x128xf32> to vector<16x128xf32>
    %335 = arith.mulf %334, %331 : vector<16x128xf32>
    %c121_i32_69 = arith.constant 121 : i32
    %336 = tpu.dynamic_rotate %306 by %c121_i32_69 dim 1 : vector<16x128xf32>, i32 -> vector<16x128xf32>
    %337 = vector.extract_strided_slice %6 {offsets = [6, 0, 0], sizes = [1, 1, 128], strides = [1, 1, 1]} : vector<9x1x128xf32> to vector<1x1x128xf32>
    %338 = vector.shape_cast %337 : vector<1x1x128xf32> to vector<1x128xf32>
    %339 = vector.broadcast %338 : vector<1x128xf32> to vector<16x128xf32>
    %340 = arith.mulf %339, %336 : vector<16x128xf32>
    %c120_i32_70 = arith.constant 120 : i32
    %341 = tpu.dynamic_rotate %306 by %c120_i32_70 dim 1 : vector<16x128xf32>, i32 -> vector<16x128xf32>
    %342 = vector.extract_strided_slice %6 {offsets = [7, 0, 0], sizes = [1, 1, 128], strides = [1, 1, 1]} : vector<9x1x128xf32> to vector<1x1x128xf32>
    %343 = vector.shape_cast %342 : vector<1x1x128xf32> to vector<1x128xf32>
    %344 = vector.broadcast %343 : vector<1x128xf32> to vector<16x128xf32>
    %345 = arith.mulf %344, %341 : vector<16x128xf32>
    %c119_i32_71 = arith.constant 119 : i32
    %346 = tpu.dynamic_rotate %306 by %c119_i32_71 dim 1 : vector<16x128xf32>, i32 -> vector<16x128xf32>
    %347 = vector.extract_strided_slice %6 {offsets = [8, 0, 0], sizes = [1, 1, 128], strides = [1, 1, 1]} : vector<9x1x128xf32> to vector<1x1x128xf32>
    %348 = vector.shape_cast %347 : vector<1x1x128xf32> to vector<1x128xf32>
    %349 = vector.broadcast %348 : vector<1x128xf32> to vector<16x128xf32>
    %350 = arith.mulf %349, %346 : vector<16x128xf32>
    %351 = tpu.concatenate %311, %316, %321, %326, %330, %335, %340, %345, %350 in 0 : vector<16x128xf32>, vector<16x128xf32>, vector<16x128xf32>, vector<16x128xf32>, vector<16x128xf32>, vector<16x128xf32>, vector<16x128xf32>, vector<16x128xf32>, vector<16x128xf32> -> vector<144x128xf32>
    %c0_72 = arith.constant 0 : index
    %c0_73 = arith.constant 0 : index
    %352 = vector.load %arg13[%c0_72, %c0_73] : memref<16x144xbf16, #tpu.memory_space<vmem>>, vector<16x144xbf16>
    %353 = arith.truncf %351 : vector<144x128xf32> to vector<144x128xbf16>
    %cst_74 = arith.constant dense<0.000000e+00> : vector<16x128xf32>
    %354 = tpu.matmul %352, %353, %cst_74 {dimension_numbers = #tpu.dot_dimension_numbers<[1], [0], [0], [1], [0, 0, 1, 1], [], []>} : vector<16x144xbf16>, vector<144x128xbf16>, vector<16x128xf32> -> vector<16x128xf32>
    %c0_75 = arith.constant 0 : index
    %c0_76 = arith.constant 0 : index
    %355 = vector.load %arg14[%c0_75, %c0_76] : memref<16x1xf32, #tpu.memory_space<vmem>>, vector<16x1xf32>
    %356 = vector.broadcast %355 : vector<16x1xf32> to vector<16x128xf32>
    %357 = arith.addf %354, %356 : vector<16x128xf32>
    %cst_77 = arith.constant 0.000000e+00 : f32
    %358 = vector.broadcast %cst_77 : f32 to vector<1x128xf32>
    %359 = vector.broadcast %3 : vector<1x128xf32> to vector<16x128xf32>
    %360 = arith.mulf %357, %359 : vector<16x128xf32>
    %361 = vector.shape_cast %360 : vector<16x128xf32> to vector<1x16x128xf32>
    %cst_78 = arith.constant dense<0.000000e+00> : vector<1xf32>
    %362 = vector.multi_reduction <add>, %361, %cst_78 [1, 2] : vector<1x16x128xf32> to vector<1xf32>
    %363 = vector.shape_cast %362 : vector<1xf32> to vector<1x1x1xf32>
    %364 = vector.extract %363[0, 0, 0] : f32 from vector<1x1x1xf32>
    %365 = vector.broadcast %364 : f32 to vector<1x1xf32>
    %cst_79 = arith.constant 9.765625E-4 : f32
    %366 = vector.broadcast %cst_79 : f32 to vector<1x1xf32>
    %367 = arith.mulf %365, %366 : vector<1x1xf32>
    %368 = vector.broadcast %367 : vector<1x1xf32> to vector<1x128xf32>
    %369 = arith.mulf %368, %3 : vector<1x128xf32>
    %370 = arith.addf %358, %369 : vector<1x128xf32>
    %371 = vector.broadcast %5 : vector<1x128xf32> to vector<16x128xf32>
    %372 = arith.mulf %357, %371 : vector<16x128xf32>
    %373 = vector.shape_cast %372 : vector<16x128xf32> to vector<1x16x128xf32>
    %cst_80 = arith.constant dense<0.000000e+00> : vector<1xf32>
    %374 = vector.multi_reduction <add>, %373, %cst_80 [1, 2] : vector<1x16x128xf32> to vector<1xf32>
    %375 = vector.shape_cast %374 : vector<1xf32> to vector<1x1x1xf32>
    %376 = vector.extract %375[0, 0, 0] : f32 from vector<1x1x1xf32>
    %377 = vector.broadcast %376 : f32 to vector<1x1xf32>
    %cst_81 = arith.constant 9.765625E-4 : f32
    %378 = vector.broadcast %cst_81 : f32 to vector<1x1xf32>
    %379 = arith.mulf %377, %378 : vector<1x1xf32>
    %380 = vector.broadcast %379 : vector<1x1xf32> to vector<1x128xf32>
    %381 = arith.mulf %380, %5 : vector<1x128xf32>
    %382 = arith.addf %370, %381 : vector<1x128xf32>
    %383 = vector.broadcast %382 : vector<1x128xf32> to vector<16x128xf32>
    %384 = arith.subf %357, %383 : vector<16x128xf32>
    %385 = arith.mulf %384, %384 : vector<16x128xf32>
    %cst_82 = arith.constant 0.000000e+00 : f32
    %386 = vector.broadcast %cst_82 : f32 to vector<1x128xf32>
    %387 = vector.broadcast %3 : vector<1x128xf32> to vector<16x128xf32>
    %388 = arith.mulf %385, %387 : vector<16x128xf32>
    %389 = vector.shape_cast %388 : vector<16x128xf32> to vector<1x16x128xf32>
    %cst_83 = arith.constant dense<0.000000e+00> : vector<1xf32>
    %390 = vector.multi_reduction <add>, %389, %cst_83 [1, 2] : vector<1x16x128xf32> to vector<1xf32>
    %391 = vector.shape_cast %390 : vector<1xf32> to vector<1x1x1xf32>
    %392 = vector.extract %391[0, 0, 0] : f32 from vector<1x1x1xf32>
    %393 = vector.broadcast %392 : f32 to vector<1x1xf32>
    %cst_84 = arith.constant 9.765625E-4 : f32
    %394 = vector.broadcast %cst_84 : f32 to vector<1x1xf32>
    %395 = arith.mulf %393, %394 : vector<1x1xf32>
    %396 = vector.broadcast %395 : vector<1x1xf32> to vector<1x128xf32>
    %397 = arith.mulf %396, %3 : vector<1x128xf32>
    %398 = arith.addf %386, %397 : vector<1x128xf32>
    %399 = vector.broadcast %5 : vector<1x128xf32> to vector<16x128xf32>
    %400 = arith.mulf %385, %399 : vector<16x128xf32>
    %401 = vector.shape_cast %400 : vector<16x128xf32> to vector<1x16x128xf32>
    %cst_85 = arith.constant dense<0.000000e+00> : vector<1xf32>
    %402 = vector.multi_reduction <add>, %401, %cst_85 [1, 2] : vector<1x16x128xf32> to vector<1xf32>
    %403 = vector.shape_cast %402 : vector<1xf32> to vector<1x1x1xf32>
    %404 = vector.extract %403[0, 0, 0] : f32 from vector<1x1x1xf32>
    %405 = vector.broadcast %404 : f32 to vector<1x1xf32>
    %cst_86 = arith.constant 9.765625E-4 : f32
    %406 = vector.broadcast %cst_86 : f32 to vector<1x1xf32>
    %407 = arith.mulf %405, %406 : vector<1x1xf32>
    %408 = vector.broadcast %407 : vector<1x1xf32> to vector<1x128xf32>
    %409 = arith.mulf %408, %5 : vector<1x128xf32>
    %410 = arith.addf %398, %409 : vector<1x128xf32>
    %cst_87 = arith.constant 9.99999974E-6 : f32
    %411 = vector.broadcast %cst_87 : f32 to vector<1x128xf32>
    %412 = arith.addf %410, %411 : vector<1x128xf32>
    %413 = math.rsqrt %412 : vector<1x128xf32>
    %414 = vector.broadcast %413 : vector<1x128xf32> to vector<16x128xf32>
    %415 = arith.mulf %384, %414 : vector<16x128xf32>
    %416 = arith.addf %0, %415 : vector<16x128xf32>
    %c0_88 = arith.constant 0 : index
    %c0_89 = arith.constant 0 : index
    %417 = vector.load %arg6[%c0_88, %c0_89] : memref<16x128xf32, #tpu.memory_space<vmem>>, vector<16x128xf32>
    %c0_90 = arith.constant 0 : index
    %c0_91 = arith.constant 0 : index
    %418 = vector.load %arg7[%c0_90, %c0_91] : memref<16x128xf32, #tpu.memory_space<vmem>>, vector<16x128xf32>
    %cst_92 = arith.constant 0.000000e+00 : f32
    %419 = vector.broadcast %cst_92 : f32 to vector<1x128xf32>
    %420 = vector.broadcast %3 : vector<1x128xf32> to vector<16x128xf32>
    %421 = arith.mulf %416, %420 : vector<16x128xf32>
    %422 = vector.shape_cast %421 : vector<16x128xf32> to vector<1x16x128xf32>
    %cst_93 = arith.constant dense<0.000000e+00> : vector<1xf32>
    %423 = vector.multi_reduction <add>, %422, %cst_93 [1, 2] : vector<1x16x128xf32> to vector<1xf32>
    %424 = vector.shape_cast %423 : vector<1xf32> to vector<1x1x1xf32>
    %425 = vector.extract %424[0, 0, 0] : f32 from vector<1x1x1xf32>
    %426 = vector.broadcast %425 : f32 to vector<1x1xf32>
    %cst_94 = arith.constant 9.765625E-4 : f32
    %427 = vector.broadcast %cst_94 : f32 to vector<1x1xf32>
    %428 = arith.mulf %426, %427 : vector<1x1xf32>
    %429 = vector.broadcast %428 : vector<1x1xf32> to vector<1x128xf32>
    %430 = arith.mulf %429, %3 : vector<1x128xf32>
    %431 = arith.addf %419, %430 : vector<1x128xf32>
    %432 = vector.broadcast %5 : vector<1x128xf32> to vector<16x128xf32>
    %433 = arith.mulf %416, %432 : vector<16x128xf32>
    %434 = vector.shape_cast %433 : vector<16x128xf32> to vector<1x16x128xf32>
    %cst_95 = arith.constant dense<0.000000e+00> : vector<1xf32>
    %435 = vector.multi_reduction <add>, %434, %cst_95 [1, 2] : vector<1x16x128xf32> to vector<1xf32>
    %436 = vector.shape_cast %435 : vector<1xf32> to vector<1x1x1xf32>
    %437 = vector.extract %436[0, 0, 0] : f32 from vector<1x1x1xf32>
    %438 = vector.broadcast %437 : f32 to vector<1x1xf32>
    %cst_96 = arith.constant 9.765625E-4 : f32
    %439 = vector.broadcast %cst_96 : f32 to vector<1x1xf32>
    %440 = arith.mulf %438, %439 : vector<1x1xf32>
    %441 = vector.broadcast %440 : vector<1x1xf32> to vector<1x128xf32>
    %442 = arith.mulf %441, %5 : vector<1x128xf32>
    %443 = arith.addf %431, %442 : vector<1x128xf32>
    %444 = vector.broadcast %443 : vector<1x128xf32> to vector<16x128xf32>
    %445 = arith.subf %416, %444 : vector<16x128xf32>
    %446 = arith.mulf %445, %445 : vector<16x128xf32>
    %cst_97 = arith.constant 0.000000e+00 : f32
    %447 = vector.broadcast %cst_97 : f32 to vector<1x128xf32>
    %448 = vector.broadcast %3 : vector<1x128xf32> to vector<16x128xf32>
    %449 = arith.mulf %446, %448 : vector<16x128xf32>
    %450 = vector.shape_cast %449 : vector<16x128xf32> to vector<1x16x128xf32>
    %cst_98 = arith.constant dense<0.000000e+00> : vector<1xf32>
    %451 = vector.multi_reduction <add>, %450, %cst_98 [1, 2] : vector<1x16x128xf32> to vector<1xf32>
    %452 = vector.shape_cast %451 : vector<1xf32> to vector<1x1x1xf32>
    %453 = vector.extract %452[0, 0, 0] : f32 from vector<1x1x1xf32>
    %454 = vector.broadcast %453 : f32 to vector<1x1xf32>
    %cst_99 = arith.constant 9.765625E-4 : f32
    %455 = vector.broadcast %cst_99 : f32 to vector<1x1xf32>
    %456 = arith.mulf %454, %455 : vector<1x1xf32>
    %457 = vector.broadcast %456 : vector<1x1xf32> to vector<1x128xf32>
    %458 = arith.mulf %457, %3 : vector<1x128xf32>
    %459 = arith.addf %447, %458 : vector<1x128xf32>
    %460 = vector.broadcast %5 : vector<1x128xf32> to vector<16x128xf32>
    %461 = arith.mulf %446, %460 : vector<16x128xf32>
    %462 = vector.shape_cast %461 : vector<16x128xf32> to vector<1x16x128xf32>
    %cst_100 = arith.constant dense<0.000000e+00> : vector<1xf32>
    %463 = vector.multi_reduction <add>, %462, %cst_100 [1, 2] : vector<1x16x128xf32> to vector<1xf32>
    %464 = vector.shape_cast %463 : vector<1xf32> to vector<1x1x1xf32>
    %465 = vector.extract %464[0, 0, 0] : f32 from vector<1x1x1xf32>
    %466 = vector.broadcast %465 : f32 to vector<1x1xf32>
    %cst_101 = arith.constant 9.765625E-4 : f32
    %467 = vector.broadcast %cst_101 : f32 to vector<1x1xf32>
    %468 = arith.mulf %466, %467 : vector<1x1xf32>
    %469 = vector.broadcast %468 : vector<1x1xf32> to vector<1x128xf32>
    %470 = arith.mulf %469, %5 : vector<1x128xf32>
    %471 = arith.addf %459, %470 : vector<1x128xf32>
    %cst_102 = arith.constant 9.99999974E-6 : f32
    %472 = vector.broadcast %cst_102 : f32 to vector<1x128xf32>
    %473 = arith.addf %471, %472 : vector<1x128xf32>
    %474 = math.rsqrt %473 : vector<1x128xf32>
    %475 = vector.broadcast %474 : vector<1x128xf32> to vector<16x128xf32>
    %476 = arith.mulf %445, %475 : vector<16x128xf32>
    %477 = arith.mulf %476, %417 : vector<16x128xf32>
    %478 = arith.addf %477, %418 : vector<16x128xf32>
    %c0_103 = arith.constant 0 : index
    %c0_104 = arith.constant 0 : index
    %479 = vector.load %arg15[%c0_103, %c0_104] : memref<32x16xbf16, #tpu.memory_space<vmem>>, vector<32x16xbf16>
    %480 = arith.truncf %478 : vector<16x128xf32> to vector<16x128xbf16>
    %cst_105 = arith.constant dense<0.000000e+00> : vector<32x128xf32>
    %481 = tpu.matmul %479, %480, %cst_105 {dimension_numbers = #tpu.dot_dimension_numbers<[1], [0], [0], [1], [0, 0, 1, 1], [], []>} : vector<32x16xbf16>, vector<16x128xbf16>, vector<32x128xf32> -> vector<32x128xf32>
    %c0_106 = arith.constant 0 : index
    %c0_107 = arith.constant 0 : index
    %482 = vector.load %arg16[%c0_106, %c0_107] : memref<32x1xf32, #tpu.memory_space<vmem>>, vector<32x1xf32>
    %483 = vector.broadcast %482 : vector<32x1xf32> to vector<32x128xf32>
    %484 = arith.addf %481, %483 : vector<32x128xf32>
    %cst_108 = arith.constant 5.000000e-01 : f32
    %485 = vector.broadcast %cst_108 : f32 to vector<32x128xf32>
    %486 = arith.mulf %485, %484 : vector<32x128xf32>
    %cst_109 = arith.constant 0.707106769 : f32
    %487 = vector.broadcast %cst_109 : f32 to vector<32x128xf32>
    %488 = arith.mulf %484, %487 : vector<32x128xf32>
    %cst_110 = arith.constant 0.000000e+00 : f32
    %489 = vector.broadcast %cst_110 : f32 to vector<32x128xf32>
    %490 = arith.cmpf oge, %488, %489 : vector<32x128xf32>
    %cst_111 = arith.constant 1.000000e+00 : f32
    %cst_112 = arith.constant -1.000000e+00 : f32
    %491 = vector.broadcast %cst_111 : f32 to vector<32x128xf32>
    %492 = vector.broadcast %cst_112 : f32 to vector<32x128xf32>
    %493 = arith.select %490, %491, %492 : vector<32x128xi1>, vector<32x128xf32>
    %494 = math.absf %488 : vector<32x128xf32>
    %cst_113 = arith.constant 0.327591091 : f32
    %495 = vector.broadcast %cst_113 : f32 to vector<32x128xf32>
    %496 = arith.mulf %495, %494 : vector<32x128xf32>
    %cst_114 = arith.constant 1.000000e+00 : f32
    %497 = vector.broadcast %cst_114 : f32 to vector<32x128xf32>
    %498 = arith.addf %497, %496 : vector<32x128xf32>
    %cst_115 = arith.constant 1.000000e+00 : f32
    %499 = vector.broadcast %cst_115 : f32 to vector<32x128xf32>
    %500 = arith.divf %499, %498 : vector<32x128xf32>
    %cst_116 = arith.constant 1.06140542 : f32
    %501 = vector.broadcast %cst_116 : f32 to vector<32x128xf32>
    %502 = arith.mulf %501, %500 : vector<32x128xf32>
    %cst_117 = arith.constant 1.45315206 : f32
    %503 = vector.broadcast %cst_117 : f32 to vector<32x128xf32>
    %504 = arith.subf %502, %503 : vector<32x128xf32>
    %505 = arith.mulf %504, %500 : vector<32x128xf32>
    %cst_118 = arith.constant 1.42141378 : f32
    %506 = vector.broadcast %cst_118 : f32 to vector<32x128xf32>
    %507 = arith.addf %505, %506 : vector<32x128xf32>
    %508 = arith.mulf %507, %500 : vector<32x128xf32>
    %cst_119 = arith.constant 0.284496725 : f32
    %509 = vector.broadcast %cst_119 : f32 to vector<32x128xf32>
    %510 = arith.subf %508, %509 : vector<32x128xf32>
    %511 = arith.mulf %510, %500 : vector<32x128xf32>
    %cst_120 = arith.constant 0.254829586 : f32
    %512 = vector.broadcast %cst_120 : f32 to vector<32x128xf32>
    %513 = arith.addf %511, %512 : vector<32x128xf32>
    %514 = arith.mulf %513, %500 : vector<32x128xf32>
    %cst_121 = arith.constant 0.000000e+00 : f32
    %515 = vector.broadcast %cst_121 : f32 to vector<32x128xf32>
    %516 = arith.subf %515, %494 : vector<32x128xf32>
    %517 = arith.mulf %516, %494 : vector<32x128xf32>
    %518 = math.exp %517 : vector<32x128xf32>
    %519 = arith.mulf %514, %518 : vector<32x128xf32>
    %cst_122 = arith.constant 1.000000e+00 : f32
    %520 = vector.broadcast %cst_122 : f32 to vector<32x128xf32>
    %521 = arith.subf %520, %519 : vector<32x128xf32>
    %522 = arith.mulf %493, %521 : vector<32x128xf32>
    %cst_123 = arith.constant 1.000000e+00 : f32
    %523 = vector.broadcast %cst_123 : f32 to vector<32x128xf32>
    %524 = arith.addf %523, %522 : vector<32x128xf32>
    %525 = arith.mulf %486, %524 : vector<32x128xf32>
    %c0_124 = arith.constant 0 : index
    %c0_125 = arith.constant 0 : index
    %526 = vector.load %arg17[%c0_124, %c0_125] : memref<16x32xbf16, #tpu.memory_space<vmem>>, vector<16x32xbf16>
    %527 = arith.truncf %525 : vector<32x128xf32> to vector<32x128xbf16>
    %cst_126 = arith.constant dense<0.000000e+00> : vector<16x128xf32>
    %528 = tpu.matmul %526, %527, %cst_126 {dimension_numbers = #tpu.dot_dimension_numbers<[1], [0], [0], [1], [0, 0, 1, 1], [], []>} : vector<16x32xbf16>, vector<32x128xbf16>, vector<16x128xf32> -> vector<16x128xf32>
    %c0_127 = arith.constant 0 : index
    %c0_128 = arith.constant 0 : index
    %529 = vector.load %arg18[%c0_127, %c0_128] : memref<16x1xf32, #tpu.memory_space<vmem>>, vector<16x1xf32>
    %530 = vector.broadcast %529 : vector<16x1xf32> to vector<16x128xf32>
    %531 = arith.addf %528, %530 : vector<16x128xf32>
    %532 = arith.addf %478, %531 : vector<16x128xf32>
    %c0_129 = arith.constant 0 : index
    %c0_130 = arith.constant 0 : index
    %533 = vector.load %arg19[%c0_129, %c0_130] : memref<16x128xf32, #tpu.memory_space<vmem>>, vector<16x128xf32>
    tpu.vector_store %arg19[%c0_129, %c0_130], %532 {strides = array<i32>} : memref<16x128xf32, #tpu.memory_space<vmem>>, vector<16x128xf32>,
    return
  }
}

</mosaic_0001>

<bundles_post_ra>
// kernel: fc_transformer_block.1
= control target key start
LH: loop header
LB: loop body
LE: loop exit
PB: predicated region body
PF: predicated region fallthrough
CT: control target
= control target key end

     0   :  { %v90_v0 = vlaneseq  ;;  %s3004_s29 = smov 121   ;;  %s4404_s21 = smov 7   ;;  %vm417_vm0 = vcmask 130048   ;;  %vm3012_vm9 = vmmov 0   ;;  %vm1829_vm10 = vcmask 523264   ;;  %s4372_s1 = inlined_call_operand.vmem [shape: f32[2,1,128], index: 1, kind: input, shape index: {}]   ;;  %s4373_s0 = inlined_call_operand.vmem [shape: f32[16,128], index: 0, kind: input, shape index: {}]   ;;  %s4374_s4 = inlined_call_operand.vmem [shape: f32[16,128], index: 4, kind: input, shape index: {}]   ;;  %s4375_s5 = inlined_call_operand.vmem [shape: f32[16,128], index: 5, kind: input, shape index: {}]   ;;  %s4376_s2 = inlined_call_operand.vmem [shape: f32[9,1,128], index: 2, kind: input, shape index: {}]   ;;  %s4377_s8 = inlined_call_operand.vmem [shape: bf16[80,144], index: 8, kind: input, shape index: {}]   ;;  %s4378_s9 = inlined_call_operand.vmem [shape: f32[80,1], index: 9, kind: input, shape index: {}]   ;;  %s4379_s11 = inlined_call_operand.vmem [shape: bf16[16,16], index: 11, kind: input, shape index: {}]   ;;  %s4380_s3 = inlined_call_operand.vmem [shape: f32[9,1,128], index: 3, kind: input, shape index: {}]   ;;  %s4381_s10 = inlined_call_operand.vmem [shape: f32[288,16], index: 10, kind: input, shape index: {}]   ;;  %s4382_s12 = inlined_call_operand.vmem [shape: f32[16,1], index: 12, kind: input, shape index: {}]   ;;  %s4383_s14 = inlined_call_operand.vmem [shape: f32[16,1], index: 14, kind: input, shape index: {}]   ;;  %s4384_s13 = inlined_call_operand.vmem [shape: bf16[16,144], index: 13, kind: input, shape index: {}]   ;;  %s4385_s16 = inlined_call_operand.vmem [shape: f32[32,1], index: 16, kind: input, shape index: {}]   ;;  %s4386_s18 = inlined_call_operand.vmem [shape: f32[16,1], index: 18, kind: input, shape index: {}]   ;;  %s4387_s15 = inlined_call_operand.vmem [shape: bf16[32,16], index: 15, kind: input, shape index: {}]   ;;  %s4388_s6 = inlined_call_operand.vmem [shape: f32[16,128], index: 6, kind: input, shape index: {}]   ;;  %s4389_s7 = inlined_call_operand.vmem [shape: f32[16,128], index: 7, kind: input, shape index: {}]   ;;  %s4390_s17 = inlined_call_operand.vmem [shape: bf16[16,32], index: 17, kind: input, shape index: {}]   ;;  %s4391_s19 = inlined_call_operand.vmem [shape: f32[16,128], index: 19, kind: output, shape index: {}]  }
   0x1   :  { %4433 = sst [smem:[#allocation21_spill]] %s4372_s1  ;;  %s4400_s1 = smov 127   ;;  %vm2497_vm15 = vcmask 261120  }
   0x2   :  { %4434 = sst [smem:[#allocation22_spill]] %s4373_s0  ;;  %v91_v1 = vshrl.u32 %v90_v0, 7  ;;  %s4396_s0 = smov 8  }
   0x3   :  { %4435 = sst [smem:[#allocation23_spill]] %s4374_s4  ;;  %s4398_s22 = smov 9  }
   0x4   :  { %4436 = sst [smem:[#allocation24_spill]] %s4375_s5  ;;  %v3124_v4 = vsub.s32 0, %v91_v1  ;;  %s4402_s4 = smov 119  }
   0x5   :  { %s4437_s20 = sld [smem:[#allocation21_spill]] }
   0x6   :  { %4438 = vst [vmem:[#allocation2_spill] sm:$0xff] %v3124_v4  ;;  %s4439_s23 = sld [smem:[#allocation22_spill]] }
   0x7   :  { %s4442_s30 = sld [smem:[#allocation23_spill]] }
   0x8   :  { %s4443_s24 = sld [smem:[#allocation24_spill]] }
   0xb   :  { %v3117_v2 = vld [vmem:[%s4437_s20] sm:$0x1]  ;;  %v3122_v3 = vld [vmem:[%s4437_s20 + $0x1] sm:$0x1] }
   0xc   :  { %v63_v5 = vld [vmem:[%s4439_s23] sm:$0xff]  ;;  %v64_v6 = vld [vmem:[%s4439_s23 + $0x8] sm:$0xff]  ;;  %v3134_v7 = vrot.slane %v3117_v2, %v3124_v4  ;;  %v3138_v8 = vrot.slane %v3122_v3, %v3124_v4 }
   0xe   :  { %4440 = vst [vmem:[#allocation3_spill] sm:$0xff] %v3134_v7  ;;  %4441 = vst [vmem:[#allocation4_spill] sm:$0xff] %v3138_v8  ;;  %v95_v9 = vmul.f32 %v3134_v7, %v63_v5  ;;  %v96_v10 = vmul.f32 %v3134_v7, %v64_v6  ;;  %v117_v11 = vmul.f32 %v3138_v8, %v63_v5 }
   0xf   :  { %v118_v12 = vmul.f32 %v3138_v8, %v64_v6 }
  0x10   :  { %v97_v13 = vadd.f32 %v96_v10, %v95_v9  ;;  %v4406_v10 = vmov 0  }
  0x11   :  { %v119_v14 = vadd.f32 %v118_v12, %v117_v11  ;;  %433 = vmatprep.subr.bf16.mxu0 %v4406_v10  ;;  %2925 = vset.pattern.permute.xlu1 %v4406_v10 }
  0x12   :  { %98 = vadd.xlane.f32.xlu0 %v97_v13  ;;  %v85_v13 = vld [vmem:[%s4442_s30] sm:$0xff] }
  0x13   :  { %2924 = vset.pattern.permute.xlu0 %v4406_v10 }
  0x16   :  { %120 = vadd.xlane.f32.xlu0 %v119_v14 }
  0x9b   :  { %v99_v15 = vpop.xlane.xlu0 %98 }
  0x9c   :  { %v100_v16 = vrot.slane %v99_v15, 4 }
  0x9e   :  { %v101_v17 = vadd.f32 %v100_v16, %v99_v15  ;;  %v87_v15 = vld [vmem:[%s4443_s24] sm:$0xff]  ;;  %v88_v16 = vld [vmem:[%s4443_s24 + $0x8] sm:$0xff]  ;;  %s4447_s24 = smov 7  }
  0x9f   :  { %v121_v18 = vpop.xlane.xlu0 %120 }
  0xa0   :  { %v122_v19 = vrot.slane %v121_v18, 4  ;;  %v102_v20 = vrot.slane %v101_v17, 2 }
  0xa2   :  { %v123_v21 = vadd.f32 %v122_v19, %v121_v18  ;;  %v103_v22 = vadd.f32 %v102_v20, %v101_v17  ;;  %v3172_v19 = vld [vmem:[%s4376_s2 + $0x4] ss:$0 sm:$0xff] }
  0xa4   :  { %v104_v23 = vrot.slane %v103_v22, 1  ;;  %v124_v24 = vrot.slane %v123_v21, 2 }
  0xa6   :  { %v105_v25 = vadd.f32 %v104_v23, %v103_v22  ;;  %v125_v26 = vadd.f32 %v124_v24, %v123_v21 }
  0xa8   :  { %2880 = vpush %v105_v25  ;;  %v126_v27 = vrot.slane %v125_v26, 1  ;;  %v2928_v25 = vld [vmem:[%s4377_s8 + $0x4] ss:$8 sps:$4 sm:$0xff]  }
  0xa9   :  { %2569 = vmatprep.mubr.msk.bf16.mxu0 %vm417_vm0, %v2928_v25  ;;  %v2926_v25 = vld [vmem:[%s4377_s8] ss:$8 sps:$4 sm:$0xff]  }
  0xaa   :  { %v127_v28 = vadd.f32 %v126_v27, %v125_v26  ;;  %v313_v26 = vld [vmem:[%s4378_s9 + $0x8] sm:$0xff]  ;;  %v312_v27 = vld [vmem:[%s4378_s9] sm:$0xff] }
  0xac   :  { %2882 = vpush %v127_v28  ;;  %v316_v28 = vld [vmem:[%s4378_s9 + $0x20] sm:$0xff] }
  0xd9   :  { %s2881_s5 = spop %2880 }
  0xda   :  { %v107_v29 = vstv %s2881_s5 }
  0xdb   :  { %v108_v30 = vmul.f32 0.0009765625, %v107_v29  ;;  %v317_v29 = vld [vmem:[%s4378_s9 + $0x28] sm:$0xff] }
  0xdd   :  { %s2883_s26 = spop %2882  ;;  %v109_v33 = vmul.f32 %v108_v30, %v3117_v2  ;;  %v314_v30 = vld [vmem:[%s4378_s9 + $0x10] sm:$0xff] }
  0xde   :  { %v129_v31 = vstv %s2883_s26 }
  0xdf   :  { %v130_v32 = vmul.f32 0.0009765625, %v129_v31  ;;  %v318_v31 = vld [vmem:[%s4378_s9 + $0x30] sm:$0xff] }
  0xe1   :  { %v131_v34 = vmul.f32 %v130_v32, %v3122_v3  ;;  %v315_v32 = vld [vmem:[%s4378_s9 + $0x18] sm:$0xff] }
  0xe3   :  { %v132_v35 = vadd.f32 %v131_v34, %v109_v33  ;;  %v319_v33 = vld [vmem:[%s4378_s9 + $0x38] sm:$0xff]  ;;  %v2557_v34 = vld [vmem:[%s4376_s2 + $0x7] ss:$0 sm:$0xff] }
  0xe5   :  { %v137_v36 = vrot.slane %v132_v35, %v3124_v4 }
  0xe7   :  { %v139_v37 = vsub.f32 %v63_v5, %v137_v36  ;;  %v140_v38 = vsub.f32 %v64_v6, %v137_v36 }
  0xe9   :  { %v141_v39 = vmul.f32 %v139_v37, %v139_v37  ;;  %v142_v40 = vmul.f32 %v140_v38, %v140_v38 }
  0xeb   :  { %v143_v41 = vmul.f32 %v141_v39, %v3134_v7  ;;  %v144_v42 = vmul.f32 %v142_v40, %v3134_v7  ;;  %v159_v44 = vmul.f32 %v141_v39, %v3138_v8  ;;  %v160_v45 = vmul.f32 %v142_v40, %v3138_v8 }
  0xed   :  { %v145_v43 = vadd.f32 %v144_v42, %v143_v41  ;;  %v161_v46 = vadd.f32 %v160_v45, %v159_v44  ;;  %v2556_v42 = vld [vmem:[%s4376_s2 + $0x6] ss:$0 sm:$0xff] }
  0xef   :  { %146 = vadd.xlane.f32.xlu1 %v145_v43 }
  0xf3   :  { %162 = vadd.xlane.f32.xlu1 %v161_v46  ;;  %v2555_v46 = vld [vmem:[%s4376_s2 + $0x5] ss:$0 sm:$0xff] }
 0x178   :  { %v147_v47 = vpop.xlane.xlu1 %146 }
 0x179   :  { %v148_v48 = vrot.slane %v147_v47, 4 }
 0x17b   :  { %v149_v49 = vadd.f32 %v148_v48, %v147_v47 }
 0x17c   :  { %v163_v50 = vpop.xlane.xlu1 %162 }
 0x17d   :  { %v164_v51 = vrot.slane %v163_v50, 4  ;;  %v150_v52 = vrot.slane %v149_v49, 2 }
 0x17f   :  { %v165_v53 = vadd.f32 %v164_v51, %v163_v50  ;;  %v151_v54 = vadd.f32 %v150_v52, %v149_v49 }
 0x181   :  { %v152_v55 = vrot.slane %v151_v54, 1  ;;  %v166_v56 = vrot.slane %v165_v53, 2 }
 0x183   :  { %v153_v57 = vadd.f32 %v152_v55, %v151_v54  ;;  %v167_v58 = vadd.f32 %v166_v56, %v165_v53  ;;  %v2553_v55 = vld [vmem:[%s4376_s2 + $0x3] ss:$0 sm:$0xff] }
 0x185   :  { %2884 = vpush %v153_v57  ;;  %v168_v59 = vrot.slane %v167_v58, 1 }
 0x187   :  { %v169_v60 = vadd.f32 %v168_v59, %v167_v58  ;;  %v2552_v59 = vld [vmem:[%s4376_s2 + $0x2] ss:$0 sm:$0xff] }
 0x189   :  { %2886 = vpush %v169_v60 }
 0x1b6   :  { %s2885_s27 = spop %2884 }
 0x1b7   :  { %v155_v61 = vstv %s2885_s27 }
 0x1b8   :  { %v156_v62 = vmul.f32 0.0009765625, %v155_v61 }
 0x1ba   :  { %s2887_s28 = spop %2886  ;;  %v157_v1 = vmul.f32 %v156_v62, %v3117_v2  ;;  %v86_v2 = vld [vmem:[%s4442_s30 + $0x8] sm:$0xff]  ;;  %s3006_s30 = smov 1  }
 0x1bb   :  { %v171_v63 = vstv %s2887_s28  ;;  %s3003_s28 = smov 120  }
 0x1bc   :  { %v172_v0 = vmul.f32 0.0009765625, %v171_v63 }
 0x1be   :  { %v173_v5 = vmul.f32 %v172_v0, %v3122_v3 }
 0x1c0   :  { %v174_v6 = vadd.f32 %v173_v5, %v157_v1  ;;  %v2551_v1 = vld [vmem:[%s4376_s2 + $0x1] ss:$0 sm:$0xff] }
 0x1c2   :  { %v175_v9 = vadd.f32 1e-05, %v174_v6 }
 0x1c4   :  { %2948 = vrsqrt.f32 %v175_v9 }
 0x1d1   :  { %v2949_v11 = vpop.eup %2948 }
 0x1d2   :  { %v181_v12 = vrot.slane %v2949_v11, %v3124_v4 }
 0x1d4   :  { %v183_v3 = vmul.f32 %v181_v12, %v139_v37  ;;  %v184_v14 = vmul.f32 %v181_v12, %v140_v38 }
 0x1d6   :  { %v185_v17 = vmul.f32 %v183_v3, %v85_v13  ;;  %v186_v18 = vmul.f32 %v184_v14, %v86_v2  ;;  %v2550_v13 = vld [vmem:[%s4376_s2] ss:$0 sm:$0xff] }
 0x1d8   :  { %v3174_v20 = vadd.f32 %v185_v17, %v87_v15  ;;  %v3176_v21 = vadd.f32 %v186_v18, %v88_v16  ;;  %v2558_v16 = vld [vmem:[%s4376_s2 + $0x8] ss:$0 sm:$0xff] }
 0x1da   :  { %271 = vrot.lane.b32.xlu1 %v3176_v21, %s3003_s28  ;;  %269 = vrot.lane.b32.xlu0 %v3174_v20, %s3003_s28  ;;  %v3184_v22 = vmul.f32 %v3172_v19, %v3174_v20  ;;  %v3188_v23 = vmul.f32 %v3172_v19, %v3176_v21 }
 0x1dc   :  { %v307_v24 = vpack.c.bf16 %v3188_v23, %v3184_v22 }
 0x1de   :  { %257 = vrot.lane.b32.xlu1 %v3174_v20, %s3004_s29  ;;  %245 = vrot.lane.b32.xlu0 %v3174_v20, %s4400_s1 }
 0x1e2   :  { %259 = vrot.lane.b32.xlu1 %v3176_v21, %s3004_s29  ;;  %225 = vrot.lane.b32.xlu0 %v3174_v20, %s3006_s30 }
 0x1e6   :  { %247 = vrot.lane.b32.xlu1 %v3176_v21, %s4400_s1  ;;  %213 = vrot.lane.b32.xlu0 %v3174_v20, %s4404_s21 }
 0x1ea   :  { %227 = vrot.lane.b32.xlu1 %v3176_v21, %s3006_s30  ;;  %201 = vrot.lane.b32.xlu0 %v3174_v20, %s4396_s0 }
 0x1ee   :  { %215 = vrot.lane.b32.xlu1 %v3176_v21, %s4404_s21  ;;  %189 = vrot.lane.b32.xlu0 %v3174_v20, %s4398_s22 }
 0x1f2   :  { %203 = vrot.lane.b32.xlu1 %v3176_v21, %s4396_s0  ;;  %281 = vrot.lane.b32.xlu0 %v3174_v20, %s4402_s4  ;;  %s4451_s0 = smov 119  }
 0x1f6   :  { %191 = vrot.lane.b32.xlu1 %v3176_v21, %s4398_s22  ;;  %324 = vperm.xlu0 %2924, %v312_v27   ;;  %v2931_v27 = vld [vmem:[%s4377_s8 + $0x10] ss:$8 sps:$4 sm:$0xff]  }
 0x1fa   :  { %283 = vrot.lane.b32.xlu1 %v3176_v21, %s4402_s4  ;;  %349 = vperm.xlu0 %2924, %v317_v29   ;;  %v2934_v29 = vld [vmem:[%s4377_s8 + $0x20] ss:$8 sps:$4 sm:$0xff]  }
 0x1fe   :  { %329 = vperm.xlu1 %2925, %v313_v26   ;;  %354 = vperm.xlu0 %2924, %v318_v31   ;;  %v2929_v26 = vld [vmem:[%s4377_s8 + $0x14] ss:$8 sps:$4 sm:$0xff]   ;;  %v2937_v31 = vld [vmem:[%s4377_s8 + $0x30] ss:$8 sps:$4 sm:$0xff]  }
 0x202   :  { %344 = vperm.xlu1 %2925, %v316_v28   ;;  %359 = vperm.xlu0 %2924, %v319_v33   ;;  %v2932_v28 = vld [vmem:[%s4377_s8 + $0x24] ss:$8 sps:$4 sm:$0xff]   ;;  %v2940_v33 = vld [vmem:[%s4377_s8 + $0x40] ss:$8 sps:$4 sm:$0xff]  }
 0x206   :  { %334 = vperm.xlu1 %2925, %v314_v30   ;;  %v2935_v30 = vld [vmem:[%s4377_s8 + $0x34] ss:$8 sps:$4 sm:$0xff]  }
 0x20a   :  { %339 = vperm.xlu1 %2925, %v315_v32   ;;  %v2938_v32 = vld [vmem:[%s4377_s8 + $0x44] ss:$8 sps:$4 sm:$0xff]   ;;  %s4450_s8 = smov 9  }
 0x24c   :  { %v272_v35 = vpop.permute.xlu1 %271  ;;  %v270_v36 = vpop.permute.xlu0 %269 }
 0x24d   :  { %v280_v37 = vmul.f32 %v2557_v34, %v272_v35  ;;  %v279_v38 = vmul.f32 %v2557_v34, %v270_v36 }
 0x24f   :  { %v310_v39 = vpack.c.bf16 %v280_v37, %v279_v38 }
 0x250   :  { %v258_v40 = vpop.permute.xlu1 %257  ;;  %v246_v41 = vpop.permute.xlu0 %245 }
 0x251   :  { %434 = vmatpush1.bf16.msra.mxu0 %v310_v39  ;;  %v267_v44 = vmul.f32 %v2556_v42, %v258_v40  ;;  %v255_v50 = vmul.f32 %v2555_v46, %v246_v41 }
 0x252   :  { %435 = vmatprep.subr.bf16.mxu0 %v4406_v10 }
 0x254   :  { %v260_v43 = vpop.permute.xlu1 %259  ;;  %v226_v47 = vpop.permute.xlu0 %225 }
 0x255   :  { %v268_v45 = vmul.f32 %v2556_v42, %v260_v43  ;;  %v235_v58 = vmul.f32 %v2553_v55, %v226_v47 }
 0x257   :  { %v309_v48 = vpack.c.bf16 %v268_v45, %v267_v44 }
 0x258   :  { %v248_v49 = vpop.permute.xlu1 %247  ;;  %v214_v53 = vpop.permute.xlu0 %213 }
 0x259   :  { %v256_v51 = vmul.f32 %v2555_v46, %v248_v49  ;;  %436 = vmatpush1.bf16.msra.mxu0 %v309_v48  ;;  %v223_v0 = vmul.f32 %v2552_v59, %v214_v53 }
 0x25a   :  { %437 = vmatprep.subr.bf16.mxu0 %v4406_v10 }
 0x25b   :  { %v308_v52 = vpack.c.bf16 %v256_v51, %v255_v50 }
 0x25c   :  { %v228_v54 = vpop.permute.xlu1 %227  ;;  %v202_v60 = vpop.permute.xlu0 %201 }
 0x25d   :  { %438 = vmatpush1.bf16.msra.mxu0 %v308_v52  ;;  %v236_v56 = vmul.f32 %v2553_v55, %v228_v54  ;;  %v211_v12 = vmul.f32 %v2551_v1, %v202_v60 }
 0x25e   :  { %439 = vmatprep.subr.bf16.mxu0 %v4406_v10 }
 0x25f   :  { %v306_v61 = vpack.c.bf16 %v236_v56, %v235_v58 }
 0x260   :  { %v216_v57 = vpop.permute.xlu1 %215  ;;  %v190_v9 = vpop.permute.xlu0 %189 }
 0x261   :  { %440 = vmatpush1.bf16.msra.mxu0 %v307_v24  ;;  %v224_v62 = vmul.f32 %v2552_v59, %v216_v57  ;;  %v199_v15 = vmul.f32 %v2550_v13, %v190_v9 }
 0x262   :  { %441 = vmatprep.subr.bf16.mxu0 %v4406_v10 }
 0x263   :  { %v305_v5 = vpack.c.bf16 %v224_v62, %v223_v0 }
 0x264   :  { %v204_v63 = vpop.permute.xlu1 %203  ;;  %v282_v17 = vpop.permute.xlu0 %281 }
 0x265   :  { %442 = vmatpush1.bf16.msra.mxu0 %v306_v61  ;;  %v212_v6 = vmul.f32 %v2551_v1, %v204_v63  ;;  %v291_v23 = vmul.f32 %v2558_v16, %v282_v17 }
 0x266   :  { %443 = vmatprep.subr.bf16.mxu0 %v4406_v10 }
 0x267   :  { %v304_v2 = vpack.c.bf16 %v212_v6, %v211_v12 }
 0x268   :  { %v192_v11 = vpop.permute.xlu1 %191 }
 0x269   :  { %444 = vmatpush1.bf16.msra.mxu0 %v305_v5  ;;  %v200_v3 = vmul.f32 %v2550_v13, %v192_v11 }
 0x26a   :  { %445 = vmatprep.subr.bf16.mxu0 %v4406_v10 }
 0x26b   :  { %v303_v18 = vpack.c.bf16 %v200_v3, %v199_v15 }
 0x26c   :  { %v284_v14 = vpop.permute.xlu1 %283 }
 0x26d   :  { %446 = vmatpush1.bf16.msra.mxu0 %v304_v2  ;;  %v292_v22 = vmul.f32 %v2558_v16, %v284_v14 }
 0x26e   :  { %447 = vmatprep.subr.bf16.mxu0 %v4406_v10 }
 0x26f   :  { %v311_v24 = vpack.c.bf16 %v292_v22, %v291_v23 }
 0x271   :  { %448 = vmatpush1.bf16.msra.mxu0 %v303_v18  ;;  %v325_v35 = vpop.permute.xlu0 %324 }
 0x272   :  { %463 = vmatprep.subr.bf16.mxu0 %v4406_v10 }
 0x275   :  { %464 = vmatpush2.bf16.msra.mxu0 %v311_v24  ;;  %v350_v62 = vpop.permute.xlu0 %349 }
 0x278   :  { %466 = vmatmul.mubr.bf16.vlgmr.msra.gmra.mxu0 %v2926_v25 }
 0x279   :  { %2570 = vmatprep.mubr.msk.bf16.mxu0 %vm417_vm0, %v2929_v26  ;;  %v330_v34 = vpop.permute.xlu1 %329  ;;  %v355_v15 = vpop.permute.xlu0 %354 }
 0x27d   :  { %v345_v37 = vpop.permute.xlu1 %344 }
 0x280   :  { %474 = vmatmul.mubr.bf16.gmra.mxu0 %v2931_v27  ;;  %v360_v27 = vpop.permute.xlu0 %359 }
 0x281   :  { %2571 = vmatprep.mubr.msk.bf16.mxu0 %vm417_vm0, %v2932_v28  ;;  %v335_v42 = vpop.permute.xlu1 %334 }
 0x285   :  { %v340_v52 = vpop.permute.xlu1 %339 }
 0x288   :  { %482 = vmatmul.mubr.bf16.gmra.mxu0 %v2934_v29 }
 0x289   :  { %2572 = vmatprep.mubr.msk.bf16.mxu0 %vm417_vm0, %v2935_v30 }
 0x290   :  { %490 = vmatmul.mubr.bf16.gmra.mxu0 %v2937_v31 }
 0x291   :  { %2573 = vmatprep.mubr.msk.bf16.mxu0 %vm417_vm0, %v2938_v32 }
 0x298   :  { %498 = vmatmul.mubr.bf16.gmra.mxu0 %v2940_v33 }
 0x338   :  { %v467_v36 = vpop.f32.mrf.mxu0 }
 0x339   :  { %v468_v39 = vadd.f32 %v467_v36, %v325_v35 }
 0x33a   :  { %v469_v38 = vpop.f32.mrf.mxu0 }
 0x33b   :  { %v506_v44 = vmax.f32 %v468_v39, 0.0 }
 0x33c   :  { %v470_v40 = vpop.f32.mrf.mxu0 }
 0x33d   :  { %v471_v41 = vadd.f32 %v470_v40, %v330_v34  ;;  %v3316_v50 = vmul.f32 %v506_v44, %v506_v44 }
 0x33e   :  { %v472_v43 = vpop.f32.mrf.mxu0 }
 0x33f   :  { %v507_v45 = vmax.f32 %v471_v41, 0.0  ;;  %v534_v58 = vmul.f32 %v3316_v50, %v3316_v50  ;;  %v320_v41 = vld [vmem:[%s4378_s9 + $0x40] sm:$0xff] }
 0x340   :  { %v475_v46 = vpop.f32.mrf.mxu0 }
 0x341   :  { %v3314_v47 = vmul.f32 %v507_v45, %v507_v45  ;;  %v476_v48 = vadd.f32 %v475_v46, %v335_v42 }
 0x342   :  { %v477_v49 = vpop.f32.mrf.mxu0 }
 0x343   :  { %v508_v51 = vmax.f32 %v476_v48, 0.0  ;;  %v535_v54 = vmul.f32 %v3314_v47, %v3314_v47  ;;  %v514_v60 = vadd.f32 %v3314_v47, %v3316_v50 }
 0x344   :  { %v478_v53 = vpop.f32.mrf.mxu0 }
 0x345   :  { %v3320_v55 = vmul.f32 %v508_v51, %v508_v51  ;;  %v479_v56 = vadd.f32 %v478_v53, %v340_v52  ;;  %v538_v5 = vadd.f32 %v535_v54, %v534_v58  ;;  %v321_v52 = vld [vmem:[%s4378_s9 + $0x48] sm:$0xff]  ;;  %v1673_v53 = vmul.f32 %v3174_v20, %v3134_v7 }
 0x346   :  { %v480_v57 = vpop.f32.mrf.mxu0  ;;  %v1685_v54 = vmul.f32 %v3174_v20, %v3138_v8 }
 0x347   :  { %v509_v59 = vmax.f32 %v479_v56, 0.0  ;;  %v536_v61 = vmul.f32 %v3320_v55, %v3320_v55  ;;  %v515_v1 = vadd.f32 %v514_v60, %v3320_v55  ;;  %v1674_v56 = vmul.f32 %v3176_v21, %v3134_v7 }
 0x348   :  { %v483_v63 = vpop.f32.mrf.mxu0  ;;  %v1686_v57 = vmul.f32 %v3176_v21, %v3138_v8 }
 0x349   :  { %v3328_v0 = vmul.f32 %v509_v59, %v509_v59  ;;  %v539_v12 = vadd.f32 %v538_v5, %v536_v61  ;;  %v484_v2 = vadd.f32 %v483_v63, %v345_v37 }
 0x34a   :  { %v485_v6 = vpop.f32.mrf.mxu0 }
 0x34b   :  { %v516_v9 = vadd.f32 %v515_v1, %v3328_v0  ;;  %v537_v11 = vmul.f32 %v3328_v0, %v3328_v0  ;;  %v565_v22 = vmax.f32 %v484_v2, 0.0 }
 0x34c   :  { %v486_v13 = vpop.f32.mrf.mxu0 }
 0x34d   :  { %v487_v3 = vadd.f32 %v486_v13, %v350_v62  ;;  %517 = vadd.xlane.f32.xlu1 %v516_v9  ;;  %v540_v14 = vadd.f32 %v539_v12, %v537_v11  ;;  %v3336_v29 = vmul.f32 %v565_v22, %v565_v22 }
 0x34e   :  { %v488_v16 = vpop.f32.mrf.mxu0 }
 0x34f   :  { %v566_v17 = vmax.f32 %v487_v3, 0.0  ;;  %541 = vadd.xlane.f32.xlu0 %v540_v14  ;;  %v593_v36 = vmul.f32 %v3336_v29, %v3336_v29 }
 0x350   :  { %v491_v18 = vpop.f32.mrf.mxu0 }
 0x351   :  { %v492_v23 = vadd.f32 %v491_v18, %v355_v15  ;;  %v3334_v25 = vmul.f32 %v566_v17, %v566_v17 }
 0x352   :  { %v493_v24 = vpop.f32.mrf.mxu0 }
 0x353   :  { %v567_v26 = vmax.f32 %v492_v23, 0.0  ;;  %v594_v33 = vmul.f32 %v3334_v25, %v3334_v25  ;;  %v573_v35 = vadd.f32 %v3334_v25, %v3336_v29 }
 0x354   :  { %v494_v28 = vpop.f32.mrf.mxu0 }
 0x355   :  { %v3338_v30 = vmul.f32 %v567_v26, %v567_v26  ;;  %v495_v31 = vadd.f32 %v494_v28, %v360_v27  ;;  %v597_v43 = vadd.f32 %v594_v33, %v593_v36  ;;  %v4408_v36 = vmov 0.0  }
 0x356   :  { %v496_v32 = vpop.f32.mrf.mxu0 }
 0x357   :  { %v568_v34 = vmax.f32 %v495_v31, 0.0  ;;  %v574_v38 = vadd.f32 %v573_v35, %v3338_v30  ;;  %v595_v39 = vmul.f32 %v3338_v30, %v3338_v30 }
 0x358   :  { %v499_v44 = vpop.f32.mrf.mxu0 }
 0x359   :  { %v3346_v37 = vmul.f32 %v568_v34, %v568_v34  ;;  %v598_v45 = vadd.f32 %v597_v43, %v595_v39 }
 0x35a   :  { %v501_v46 = vpop.f32.mrf.mxu0 }
 0x35b   :  { %v575_v40 = vadd.f32 %v574_v38, %v3346_v37  ;;  %v596_v42 = vmul.f32 %v3346_v37, %v3346_v37 }
 0x35c   :  { %v502_v49 = vpop.f32.mrf.mxu0 }
 0x35d   :  { %576 = vadd.xlane.f32.xlu0 %v575_v40  ;;  %v599_v48 = vadd.f32 %v598_v45, %v596_v42 }
 0x35e   :  { %364 = vperm.xlu1 %2925, %v320_v41   ;;  %v504_v51 = vpop.f32.mrf.mxu0 }
 0x361   :  { %600 = vadd.xlane.f32.xlu0 %v599_v48 }
 0x377   :  { %369 = vperm.xlu0 %2924, %v321_v52  }
 0x382   :  { %1675 = vadd.xlane.f32.xlu1 %v1673_v53 }
 0x386   :  { %1687 = vadd.xlane.f32.xlu1 %v1685_v54 }
 0x396   :  { %1677 = vadd.xlane.f32.xlu0 %v1674_v56 }
 0x39a   :  { %1689 = vadd.xlane.f32.xlu0 %v1686_v57 }
 0x3d6   :  { %v518_v58 = vpop.xlane.xlu1 %517 }
 0x3d7   :  { %v519_v59 = vrot.slane %v518_v58, 4 }
 0x3d8   :  { %v542_v60 = vpop.xlane.xlu0 %541 }
 0x3d9   :  { %v520_v61 = vadd.f32 %v519_v59, %v518_v58  ;;  %v543_v62 = vrot.slane %v542_v60, 4 }
 0x3da   :  { %v365_v24 = vpop.permute.xlu1 %364 }
 0x3db   :  { %v521_v63 = vrot.slane %v520_v61, 2  ;;  %v544_v1 = vadd.f32 %v543_v62, %v542_v60  ;;  %v500_v31 = vadd.f32 %v499_v44, %v365_v24 }
 0x3dd   :  { %v545_v5 = vrot.slane %v544_v1, 2  ;;  %v522_v6 = vadd.f32 %v521_v63, %v520_v61 }
 0x3df   :  { %v523_v9 = vrot.slane %v522_v6, 1  ;;  %v546_v20 = vadd.f32 %v545_v5, %v544_v1 }
 0x3e1   :  { %v524_v11 = vadd.f32 %v523_v9, %v522_v6  ;;  %v547_v12 = vrot.slane %v546_v20, 1 }
 0x3e3   :  { %2888 = vpush %v524_v11  ;;  %v548_v13 = vadd.f32 %v547_v12, %v546_v20 }
 0x3e5   :  { %2890 = vpush %v548_v13 }
 0x3e6   :  { %v577_v2 = vpop.xlane.xlu0 %576 }
 0x3e7   :  { %v578_v3 = vrot.slane %v577_v2, 4 }
 0x3e9   :  { %v579_v21 = vadd.f32 %v578_v3, %v577_v2 }
 0x3ea   :  { %v601_v14 = vpop.xlane.xlu0 %600 }
 0x3eb   :  { %v580_v15 = vrot.slane %v579_v21, 2  ;;  %v602_v16 = vrot.slane %v601_v14, 4 }
 0x3ed   :  { %v603_v17 = vadd.f32 %v602_v16, %v601_v14  ;;  %v581_v18 = vadd.f32 %v580_v15, %v579_v21 }
 0x3ef   :  { %v604_v22 = vrot.slane %v603_v17, 2  ;;  %v582_v23 = vrot.slane %v581_v18, 1 }
 0x3f1   :  { %v583_v26 = vadd.f32 %v582_v23, %v581_v18  ;;  %v605_v27 = vadd.f32 %v604_v22, %v603_v17  ;;  %v816_v17 = vld [vmem:[%s4381_s10 + $0x10] sm:$0xff] }
 0x3f2   :  { %v370_v28 = vpop.permute.xlu0 %369 }
 0x3f3   :  { %v503_v32 = vadd.f32 %v502_v49, %v370_v28  ;;  %2892 = vpush %v583_v26  ;;  %v606_v33 = vrot.slane %v605_v27, 1 }
 0x3f5   :  { %v3368_v34 = vpack.c.bf16 %v503_v32, %v500_v31  ;;  %v607_v35 = vadd.f32 %v606_v33, %v605_v27 }
 0x3f7   :  { %2894 = vpush %v607_v35  ;;  %2770 = vmatprep.subr.bf16.mxu0 %v3368_v34  ;;  %2878 = vmatprep.subr.bf16.mxu1 %v3368_v34 }
 0x3f8   :  { %2771 = vmatpush3.bf16.xpose.msra.mxu0 %v3368_v34  ;;  %2879 = vmatpush3.bf16.xpose.msra.mxu1 %v3368_v34 }
 0x3f9   :  { %2808 = vmatprep.subr.bf16.mxu0 %v3368_v34  ;;  %2846 = vmatprep.subr.bf16.mxu1 %v4408_v36 }
 0x40b   :  { %v1676_v20 = vpop.xlane.xlu1 %1675 }
 0x40c   :  { %v1679_v28 = vmul.f32 0.015625, %v1676_v20 }
 0x40f   :  { %v1688_v18 = vpop.xlane.xlu1 %1687 }
 0x410   :  { %v1691_v24 = vmul.f32 0.015625, %v1688_v18 }
 0x412   :  { %v1693_v35 = vmul.f32 %v1691_v24, %v3138_v8 }
 0x414   :  { %s2889_s9 = spop %2888 }
 0x415   :  { %v526_v39 = vstv %s2889_s9 }
 0x416   :  { %s2891_s27 = spop %2890  ;;  %vm529_vm3 = vcmp.eq.f32.partialorder %v526_v39, inf  ;;  %v532_v54 = vand.u32 2147483648, %v526_v39  ;;  %vm531_vm4 = vcmp.eq.f32.partialorder %v526_v39, 0.0 }
 0x417   :  { %v550_v38 = vstv %s2891_s27  ;;  %s4448_s27 = smov 127  }
 0x418   :  { %2950 = vrsqrt.f32 %v550_v38  ;;  %vm553_vm1 = vcmp.eq.f32.partialorder %v550_v38, inf  ;;  %v556_v42 = vand.u32 2147483648, %v550_v38  ;;  %vm555_vm2 = vcmp.eq.f32.partialorder %v550_v38, 0.0 }
 0x419   :  { %2952 = vrsqrt.f32 %v526_v39 }
 0x424   :  { %s2893_s1 = spop %2892 }
 0x425   :  { %v2951_v40 = vpop.eup %2950  ;;  %v3376_v51 = vstv %s2893_s1  ;;  %s4449_s1 = smov 8  }
 0x426   :  { %v552_v41 = vmul.f32 %v2951_v40, %v550_v38  ;;  %v2953_v48 = vpop.eup %2952  ;;  %vm588_vm7 = vcmp.eq.f32.partialorder %v3376_v51, inf  ;;  %v591_v32 = vand.u32 2147483648, %v3376_v51  ;;  %vm590_vm8 = vcmp.eq.f32.partialorder %v3376_v51, 0.0 }
 0x427   :  { %v528_v49 = vmul.f32 %v2953_v48, %v526_v39 }
 0x428   :  { %v554_v43 = vsel %vm553_vm1, %v550_v38, %v552_v41  ;;  %s2895_s22 = spop %2894  ;;  %v1681_v41 = vmul.f32 %v1679_v28, %v3134_v7 }
 0x429   :  { %v557_v44 = vsel %vm555_vm2, %v556_v42, %v554_v43  ;;  %v609_v45 = vstv %s2895_s22  ;;  %v530_v52 = vsel %vm529_vm3, %v526_v39, %v528_v49  ;;  %v2574_v43 = vld [vmem:[%s4380_s3] ss:$0 sm:$0xff] }
 0x42a   :  { %v558_v46 = vmax.f32 %v557_v44, 1e-30  ;;  %2954 = vrsqrt.f32 %v609_v45  ;;  %v533_v58 = vsel %vm531_vm4, %v532_v54, %v530_v52  ;;  %vm612_vm5 = vcmp.eq.f32.partialorder %v609_v45, inf  ;;  %v2575_v44 = vld [vmem:[%s4380_s3 + $0x1] ss:$0 sm:$0xff] }
 0x42b   :  { %v615_v59 = vand.u32 2147483648, %v609_v45  ;;  %vm614_vm6 = vcmp.eq.f32.partialorder %v609_v45, 0.0 }
 0x42c   :  { %2956 = vrcp.f32 %v558_v46 }
 0x42d   :  { %2958 = vrsqrt.f32 %v3376_v51 }
 0x437   :  { %v2955_v53 = vpop.eup %2954 }
 0x438   :  { %v611_v56 = vmul.f32 %v2955_v53, %v609_v45 }
 0x439   :  { %v2957_v57 = vpop.eup %2956 }
 0x43a   :  { %v560_v60 = vmul.f32 %v2957_v57, %v533_v58  ;;  %v613_v61 = vsel %vm612_vm5, %v609_v45, %v611_v56  ;;  %v2959_v14 = vpop.eup %2958  ;;  %v2576_v57 = vld [vmem:[%s4380_s3 + $0x2] ss:$0 sm:$0xff] }
 0x43b   :  { %v616_v62 = vsel %vm614_vm6, %v615_v59, %v613_v61  ;;  %v587_v23 = vmul.f32 %v2959_v14, %v3376_v51 }
 0x43c   :  { %v3380_v63 = vmul.f32 %v560_v60, %v3316_v50  ;;  %v3383_v1 = vmul.f32 %v560_v60, %v3314_v47  ;;  %v3386_v5 = vmul.f32 %v560_v60, %v3320_v55  ;;  %v3389_v6 = vmul.f32 %v560_v60, %v3328_v0  ;;  %v1678_v0 = vpop.xlane.xlu0 %1677 }
 0x43d   :  { %v617_v9 = vmax.f32 %v616_v62, 1e-30  ;;  %v589_v27 = vsel %vm588_vm7, %v3376_v51, %v587_v23  ;;  %v1680_v31 = vmul.f32 0.015625, %v1678_v0  ;;  %v1695_v51 = vadd.f32 %v1693_v35, %v1681_v41 }
 0x43e   :  { %796 = vrot.lane.b32.xlu0 %v3389_v6, %s3003_s28  ;;  %794 = vrot.lane.b32.xlu1 %v3386_v5, %s3003_s28  ;;  %v764_v50 = vmul.f32 %v3172_v19, %v3386_v5  ;;  %v765_v47 = vmul.f32 %v3172_v19, %v3389_v6  ;;  %v3401_v55 = vmul.f32 %v3172_v19, %v3380_v63 }
 0x43f   :  { %2960 = vrcp.f32 %v617_v9  ;;  %v3405_v11 = vmul.f32 %v3172_v19, %v3383_v1  ;;  %v592_v39 = vsel %vm590_vm8, %v591_v32, %v589_v27  ;;  %v1682_v42 = vmul.f32 %v1680_v31, %v3134_v7 }
 0x440   :  { %v3408_v12 = vmul.f32 %v764_v50, %v3134_v7  ;;  %v3411_v13 = vmul.f32 %v765_v47, %v3134_v7  ;;  %v3414_v2 = vmul.f32 %v764_v50, %v3138_v8  ;;  %v3417_v3 = vmul.f32 %v765_v47, %v3138_v8  ;;  %v1690_v22 = vpop.xlane.xlu0 %1689 }
 0x441   :  { %v3421_v21 = vmul.f32 %v3401_v55, %v3138_v8  ;;  %v3431_v15 = vmul.f32 %v3405_v11, %v3138_v8  ;;  %v1692_v26 = vmul.f32 0.015625, %v1690_v22 }
 0x442   :  { %4444 = vst [vmem:[#allocation5_spill] sm:$0xff] %v3414_v2  ;;  %754 = vrot.lane.b32.xlu1 %v3386_v5, %s3006_s30  ;;  %792 = vrot.lane.b32.xlu0 %v3383_v1, %s3003_s28  ;;  %v1646_v19 = vpack.c.bf16 %v3411_v13, %v3408_v12 }
 0x443   :  { %4445 = vst [vmem:[#allocation6_spill] sm:$0xff] %v3421_v21  ;;  %4446 = vst [vmem:[#allocation7_spill] sm:$0xff] %v3431_v15  ;;  %v1694_v38 = vmul.f32 %v1692_v26, %v3138_v8  ;;  %v2577_v26 = vld [vmem:[%s4380_s3 + $0x3] ss:$0 sm:$0xff] }
 0x445   :  { %v1696_v52 = vadd.f32 %v1694_v38, %v1682_v42 }
 0x446   :  { %756 = vrot.lane.b32.xlu1 %v3389_v6, %s3006_s30  ;;  %752 = vrot.lane.b32.xlu0 %v3383_v1, %s3006_s30 }
 0x447   :  { %v1699_v38 = vpack.c.bf16 %v1696_v52, %v1695_v51 }
 0x44a   :  { %784 = vrot.lane.b32.xlu0 %v3389_v6, %s3004_s29  ;;  %790 = vrot.lane.b32.xlu1 %v3380_v63, %s3003_s28 }
 0x44c   :  { %v2961_v33 = vpop.eup %2960 }
 0x44d   :  { %v619_v40 = vmul.f32 %v2961_v33, %v592_v39 }
 0x44e   :  { %744 = vrot.lane.b32.xlu0 %v3389_v6, %s4447_s24  ;;  %750 = vrot.lane.b32.xlu1 %v3380_v63, %s3006_s30 }
 0x44f   :  { %v3465_v45 = vmul.f32 %v619_v40, %v3336_v29  ;;  %v3468_v46 = vmul.f32 %v619_v40, %v3334_v25  ;;  %v3471_v48 = vmul.f32 %v619_v40, %v3338_v30  ;;  %v3474_v49 = vmul.f32 %v619_v40, %v3346_v37 }
 0x451   :  { %v630_v53 = vmul.f32 %v2574_v43, %v3465_v45  ;;  %v631_v54 = vmul.f32 %v2574_v43, %v3468_v46  ;;  %v640_v56 = vmul.f32 %v2575_v44, %v3465_v45  ;;  %v641_v29 = vmul.f32 %v2575_v44, %v3468_v46 }
 0x452   :  { %780 = vrot.lane.b32.xlu0 %v3383_v1, %s3004_s29  ;;  %782 = vrot.lane.b32.xlu1 %v3386_v5, %s3004_s29  ;;  %v632_v25 = vmul.f32 %v2574_v43, %v3471_v48  ;;  %v633_v30 = vmul.f32 %v2574_v43, %v3474_v49  ;;  %v3487_v37 = vmul.f32 %v2575_v44, %v3471_v48 }
 0x453   :  { %v851_v58 = vmul.f32 %v630_v53, %v3134_v7  ;;  %v852_v59 = vmul.f32 %v631_v54, %v3134_v7  ;;  %v855_v60 = vmul.f32 %v640_v56, %v3134_v7  ;;  %v856_v61 = vmul.f32 %v641_v29, %v3134_v7 }
 0x454   :  { %v853_v62 = vmul.f32 %v632_v25, %v3134_v7  ;;  %v854_v9 = vmul.f32 %v633_v30, %v3134_v7  ;;  %v643_v50 = vmul.f32 %v2575_v44, %v3474_v49  ;;  %v857_v47 = vmul.f32 %v3487_v37, %v3134_v7 }
 0x455   :  { %v887_v20 = vpack.c.bf16 %v852_v59, %v851_v58  ;;  %v889_v0 = vpack.c.bf16 %v856_v61, %v855_v60  ;;  %v650_v14 = vmul.f32 %v2576_v57, %v3465_v45  ;;  %v651_v18 = vmul.f32 %v2576_v57, %v3468_v46 }
 0x456   :  { %740 = vrot.lane.b32.xlu0 %v3383_v1, %s4447_s24  ;;  %742 = vrot.lane.b32.xlu1 %v3386_v5, %s4447_s24  ;;  %v888_v22 = vpack.c.bf16 %v854_v9, %v853_v62  ;;  %v858_v23 = vmul.f32 %v643_v50, %v3134_v7  ;;  %v1226_v24 = vmul.f32 %v630_v53, %v3138_v8 }
 0x457   :  { %2772 = vmatprep.mubr.bf16.mxu0 %v887_v20  ;;  %2776 = vmatprep.mubr.bf16.mxu1 %v889_v0  ;;  %v859_v27 = vmul.f32 %v650_v14, %v3134_v7  ;;  %v860_v28 = vmul.f32 %v651_v18, %v3134_v7  ;;  %v1227_v31 = vmul.f32 %v631_v54, %v3138_v8 }
 0x458   :  { %2773 = vmatmul.mubr.bf16.vlgmr.msra.gmra.mxu0 %v888_v22  ;;  %v890_v32 = vpack.c.bf16 %v858_v23, %v857_v47  ;;  %v3516_v33 = vmul.f32 %v2576_v57, %v3471_v48  ;;  %v3519_v35 = vmul.f32 %v2576_v57, %v3474_v49  ;;  %v1228_v40 = vmul.f32 %v632_v25, %v3138_v8 }
 0x459   :  { %2809 = vmatpush3.bf16.xpose.msra.mxu0 %v3368_v34  ;;  %v891_v39 = vpack.c.bf16 %v860_v28, %v859_v27  ;;  %v660_v41 = vmul.f32 %v2577_v26, %v3465_v45  ;;  %v1262_v42 = vpack.c.bf16 %v1227_v31, %v1226_v24  ;;  %v1229_v43 = vmul.f32 %v633_v30, %v3138_v8  ;;  %v2578_v30 = vld [vmem:[%s4380_s3 + $0x4] ss:$0 sm:$0xff] }
 0x45a   :  { %2777 = vmatmul.mubr.bf16.vlgmr.msra.gmra.mxu1 %v890_v32  ;;  %772 = vrot.lane.b32.xlu0 %v3389_v6, %s4448_s27  ;;  %v661_v44 = vmul.f32 %v2577_v26, %v3468_v46  ;;  %v1230_v51 = vmul.f32 %v640_v56, %v3138_v8  ;;  %v861_v34 = vmul.f32 %v3516_v33, %v3134_v7 }
 0x45b   :  { %2847 = vmatpush3.bf16.msra.mxu1 %v1699_v38  ;;  %2780 = vmatprep.mubr.bf16.mxu1 %v891_v39  ;;  %v862_v52 = vmul.f32 %v3519_v35, %v3134_v7  ;;  %v1231_v53 = vmul.f32 %v641_v29, %v3138_v8  ;;  %v863_v54 = vmul.f32 %v660_v41, %v3134_v7 }
 0x45c   :  { %2810 = vmatprep.mubr.bf16.mxu0 %v1262_v42  ;;  %778 = vrot.lane.b32.xlu1 %v3380_v63, %s3004_s29  ;;  %v864_v25 = vmul.f32 %v661_v44, %v3134_v7  ;;  %v1263_v56 = vpack.c.bf16 %v1229_v43, %v1228_v40  ;;  %v662_v29 = vmul.f32 %v2577_v26, %v3471_v48 }
 0x45d   :  { %2852 = vmatprep.subr.bf16.mxu0 %v4408_v36  ;;  %v1264_v57 = vpack.c.bf16 %v1231_v53, %v1230_v51  ;;  %v892_v58 = vpack.c.bf16 %v862_v52, %v861_v34  ;;  %v663_v59 = vmul.f32 %v2577_v26, %v3474_v49  ;;  %v670_v61 = vmul.f32 %v2578_v30, %v3465_v45 }
 0x45e   :  { %732 = vrot.lane.b32.xlu0 %v3389_v6, %s4449_s1  ;;  %v893_v60 = vpack.c.bf16 %v864_v25, %v863_v54  ;;  %v671_v62 = vmul.f32 %v2578_v30, %v3468_v46  ;;  %v1232_v9 = vmul.f32 %v3487_v37, %v3138_v8  ;;  %v1233_v47 = vmul.f32 %v643_v50, %v3138_v8  ;;  %v2579_v50 = vld [vmem:[%s4380_s3 + $0x5] ss:$0 sm:$0xff] }
 0x45f   :  { %v1234_v20 = vmul.f32 %v650_v14, %v3138_v8  ;;  %v1235_v0 = vmul.f32 %v651_v18, %v3138_v8  ;;  %v865_v22 = vmul.f32 %v662_v29, %v3134_v7  ;;  %v866_v23 = vmul.f32 %v663_v59, %v3134_v7 }
 0x460   :  { %738 = vrot.lane.b32.xlu1 %v3380_v63, %s4447_s24  ;;  %2811 = vmatmul.mubr.bf16.vlgmr.msra.gmra.mxu0 %v1263_v56  ;;  %v867_v24 = vmul.f32 %v670_v61, %v3134_v7  ;;  %v868_v26 = vmul.f32 %v671_v62, %v3134_v7  ;;  %v1265_v37 = vpack.c.bf16 %v1233_v47, %v1232_v9 }
 0x461   :  { %2814 = vmatprep.mubr.bf16.mxu0 %v1264_v57  ;;  %v1266_v14 = vpack.c.bf16 %v1235_v0, %v1234_v20  ;;  %v894_v18 = vpack.c.bf16 %v866_v23, %v865_v22  ;;  %v672_v27 = vmul.f32 %v2578_v30, %v3471_v48  ;;  %v673_v28 = vmul.f32 %v2578_v30, %v3474_v49 }
 0x462   :  { %2781 = vmatmul.mubr.bf16.gmra.mxu1 %v892_v58  ;;  %768 = vrot.lane.b32.xlu0 %v3383_v1, %s4448_s27  ;;  %v895_v31 = vpack.c.bf16 %v868_v26, %v867_v24  ;;  %v680_v32 = vmul.f32 %v2579_v50, %v3465_v45  ;;  %v681_v38 = vmul.f32 %v2579_v50, %v3468_v46 }
 0x463   :  { %2784 = vmatprep.mubr.bf16.mxu1 %v893_v60  ;;  %v1236_v39 = vmul.f32 %v3516_v33, %v3138_v8  ;;  %v1237_v40 = vmul.f32 %v3519_v35, %v3138_v8  ;;  %v1238_v42 = vmul.f32 %v660_v41, %v3138_v8  ;;  %v1239_v43 = vmul.f32 %v661_v44, %v3138_v8  ;;  %v2580_v35 = vld [vmem:[%s4380_s3 + $0x6] ss:$0 sm:$0xff] }
 0x464   :  { %770 = vrot.lane.b32.xlu1 %v3386_v5, %s4448_s27  ;;  %v869_v51 = vmul.f32 %v672_v27, %v3134_v7  ;;  %v870_v34 = vmul.f32 %v673_v28, %v3134_v7  ;;  %v871_v52 = vmul.f32 %v680_v32, %v3134_v7  ;;  %v872_v53 = vmul.f32 %v681_v38, %v3134_v7 }
 0x465   :  { %v1267_v33 = vpack.c.bf16 %v1237_v40, %v1236_v39  ;;  %v1268_v41 = vpack.c.bf16 %v1239_v43, %v1238_v42  ;;  %v682_v54 = vmul.f32 %v2579_v50, %v3471_v48  ;;  %v683_v25 = vmul.f32 %v2579_v50, %v3474_v49 }
 0x466   :  { %728 = vrot.lane.b32.xlu0 %v3383_v1, %s4449_s1  ;;  %v896_v44 = vpack.c.bf16 %v870_v34, %v869_v51  ;;  %v897_v56 = vpack.c.bf16 %v872_v53, %v871_v52  ;;  %v690_v30 = vmul.f32 %v2580_v35, %v3465_v45  ;;  %v691_v57 = vmul.f32 %v2580_v35, %v3468_v46 }
 0x467   :  { %v1240_v58 = vmul.f32 %v662_v29, %v3138_v8  ;;  %v1241_v60 = vmul.f32 %v663_v59, %v3138_v8  ;;  %v1242_v9 = vmul.f32 %v670_v61, %v3138_v8  ;;  %v1243_v47 = vmul.f32 %v671_v62, %v3138_v8  ;;  %v2581_v59 = vld [vmem:[%s4380_s3 + $0x7] ss:$0 sm:$0xff] }
 0x468   :  { %730 = vrot.lane.b32.xlu1 %v3386_v5, %s4449_s1  ;;  %2815 = vmatmul.mubr.bf16.gmra.mxu0 %v1265_v37  ;;  %v873_v20 = vmul.f32 %v682_v54, %v3134_v7  ;;  %v874_v0 = vmul.f32 %v683_v25, %v3134_v7  ;;  %v875_v22 = vmul.f32 %v690_v30, %v3134_v7 }
 0x469   :  { %2818 = vmatprep.mubr.bf16.mxu0 %v1266_v14  ;;  %v1269_v29 = vpack.c.bf16 %v1241_v60, %v1240_v58  ;;  %v1270_v61 = vpack.c.bf16 %v1243_v47, %v1242_v9  ;;  %v692_v23 = vmul.f32 %v2580_v35, %v3471_v48  ;;  %v693_v24 = vmul.f32 %v2580_v35, %v3474_v49 }
 0x46a   :  { %2785 = vmatmul.mubr.bf16.gmra.mxu1 %v894_v18  ;;  %720 = vrot.lane.b32.xlu0 %v3389_v6, %s4450_s8  ;;  %v898_v62 = vpack.c.bf16 %v874_v0, %v873_v20  ;;  %v700_v37 = vmul.f32 %v2581_v59, %v3465_v45  ;;  %v1244_v50 = vmul.f32 %v672_v27, %v3138_v8  ;;  %v2582_v27 = vld [vmem:[%s4380_s3 + $0x8] ss:$0 sm:$0xff] }
 0x46b   :  { %2788 = vmatprep.mubr.bf16.mxu1 %v895_v31  ;;  %v1245_v14 = vmul.f32 %v673_v28, %v3138_v8  ;;  %v1246_v18 = vmul.f32 %v680_v32, %v3138_v8  ;;  %v1247_v31 = vmul.f32 %v681_v38, %v3138_v8  ;;  %v877_v39 = vmul.f32 %v692_v23, %v3134_v7 }
 0x46c   :  { %766 = vrot.lane.b32.xlu1 %v3380_v63, %s4448_s27  ;;  %v878_v40 = vmul.f32 %v693_v24, %v3134_v7  ;;  %v879_v42 = vmul.f32 %v700_v37, %v3134_v7  ;;  %v703_v38 = vmul.f32 %v2581_v59, %v3474_v49  ;;  %v710_v52 = vmul.f32 %v2582_v27, %v3465_v45 }
 0x46d   :  { %v1271_v51 = vpack.c.bf16 %v1245_v14, %v1244_v50  ;;  %v1272_v28 = vpack.c.bf16 %v1247_v31, %v1246_v18  ;;  %v711_v53 = vmul.f32 %v2582_v27, %v3468_v46  ;;  %v1249_v35 = vmul.f32 %v683_v25, %v3138_v8 }
 0x46e   :  { %716 = vrot.lane.b32.xlu0 %v3383_v1, %s4450_s8  ;;  %v900_v32 = vpack.c.bf16 %v878_v40, %v877_v39  ;;  %v883_v58 = vmul.f32 %v710_v52, %v3134_v7  ;;  %v713_v25 = vmul.f32 %v2582_v27, %v3474_v49  ;;  %v1254_v20 = vmul.f32 %v700_v37, %v3138_v8  ;;  %v2982_v39 = vld [vmem:[%s4376_s2 + $0x7] ss:$0 sm:$0xff] }
 0x46f   :  { %v884_v45 = vmul.f32 %v711_v53, %v3134_v7 }
 0x470   :  { %726 = vrot.lane.b32.xlu1 %v3380_v63, %s4449_s1  ;;  %2819 = vmatmul.mubr.bf16.gmra.mxu0 %v1267_v33  ;;  %v1248_v33 = vmul.f32 %v682_v54, %v3138_v8  ;;  %v712_v54 = vmul.f32 %v2582_v27, %v3471_v48  ;;  %v1261_v50 = vmul.f32 %v713_v25, %v3138_v8 }
 0x471   :  { %2822 = vmatprep.mubr.bf16.mxu0 %v1268_v41  ;;  %v1251_v41 = vmul.f32 %v691_v57, %v3138_v8  ;;  %v903_v47 = vpack.c.bf16 %v884_v45, %v883_v58 }
 0x472   :  { %2789 = vmatmul.mubr.bf16.gmra.mxu1 %v896_v44  ;;  %808 = vrot.lane.b32.xlu0 %v3389_v6, %s4451_s0  ;;  %v876_v6 = vmul.f32 %v691_v57, %v3134_v7  ;;  %v1273_v60 = vpack.c.bf16 %v1249_v35, %v1248_v33  ;;  %v1253_v57 = vmul.f32 %v693_v24, %v3138_v8 }
 0x473   :  { %2792 = vmatprep.mubr.bf16.mxu1 %v897_v56  ;;  %v882_v56 = vmul.f32 %v703_v38, %v3134_v7 }
 0x474   :  { %718 = vrot.lane.b32.xlu1 %v3386_v5, %s4450_s8  ;;  %v899_v26 = vpack.c.bf16 %v876_v6, %v875_v22  ;;  %v885_v22 = vmul.f32 %v712_v54, %v3134_v7  ;;  %v886_v6 = vmul.f32 %v713_v25, %v3134_v7 }
 0x476   :  { %804 = vrot.lane.b32.xlu0 %v3383_v1, %s4451_s0  ;;  %v701_v1 = vmul.f32 %v2581_v59, %v3468_v46 }
 0x478   :  { %714 = vrot.lane.b32.xlu1 %v3380_v63, %s4450_s8  ;;  %2823 = vmatmul.mubr.bf16.gmra.mxu0 %v1269_v29  ;;  %v880_v43 = vmul.f32 %v701_v1, %v3134_v7  ;;  %v1255_v0 = vmul.f32 %v701_v1, %v3138_v8  ;;  %v1260_v1 = vmul.f32 %v712_v54, %v3138_v8 }
 0x479   :  { %2826 = vmatprep.mubr.bf16.mxu0 %v1270_v61  ;;  %v1257_v61 = vmul.f32 %v703_v38, %v3138_v8 }
 0x47a   :  { %2793 = vmatmul.mubr.bf16.gmra.mxu1 %v898_v62  ;;  %v901_v34 = vpack.c.bf16 %v880_v43, %v879_v42  ;;  %v1258_v62 = vmul.f32 %v710_v52, %v3138_v8  ;;  %v1279_v14 = vpack.c.bf16 %v1261_v50, %v1260_v1  ;;  %v2983_v52 = vld [vmem:[%s4376_s2 + $0x3] ss:$0 sm:$0xff] }
 0x47b   :  { %2796 = vmatprep.mubr.bf16.mxu1 %v899_v26  ;;  %v2941_v26 = vld [vmem:[%s4379_s11] sm:$0xff]  }
 0x47c   :  { %806 = vrot.lane.b32.xlu1 %v3386_v5, %s4451_s0  ;;  %v702_v5 = vmul.f32 %v2581_v59, %v3471_v48  ;;  %v1276_v48 = vpack.c.bf16 %v1255_v0, %v1254_v20  ;;  %v904_v59 = vpack.c.bf16 %v886_v6, %v885_v22 }
 0x47e   :  { %v881_v44 = vmul.f32 %v702_v5, %v3134_v7  ;;  %v1256_v49 = vmul.f32 %v702_v5, %v3138_v8 }
 0x480   :  { %802 = vrot.lane.b32.xlu1 %v3380_v63, %s4451_s0  ;;  %2827 = vmatmul.mubr.bf16.gmra.mxu0 %v1271_v51  ;;  %v1250_v63 = vmul.f32 %v690_v30, %v3138_v8  ;;  %v902_v9 = vpack.c.bf16 %v882_v56, %v881_v44  ;;  %v1252_v30 = vmul.f32 %v692_v23, %v3138_v8 }
 0x481   :  { %2830 = vmatprep.mubr.bf16.mxu0 %v1272_v28  ;;  %v1259_v23 = vmul.f32 %v711_v53, %v3138_v8  ;;  %v1277_v24 = vpack.c.bf16 %v1257_v61, %v1256_v49 }
 0x482   :  { %2797 = vmatmul.mubr.bf16.gmra.mxu1 %v900_v32  ;;  %v1274_v46 = vpack.c.bf16 %v1251_v41, %v1250_v63  ;;  %v1275_v29 = vpack.c.bf16 %v1253_v57, %v1252_v30 }
 0x483   :  { %2800 = vmatprep.mubr.bf16.mxu1 %v901_v34  ;;  %v1278_v37 = vpack.c.bf16 %v1259_v23, %v1258_v62 }
 0x488   :  { %2831 = vmatmul.mubr.bf16.gmra.mxu0 %v1273_v60 }
 0x489   :  { %2834 = vmatprep.mubr.bf16.mxu0 %v1274_v46 }
 0x48a   :  { %2801 = vmatmul.mubr.bf16.gmra.mxu1 %v902_v9 }
 0x48b   :  { %2804 = vmatprep.mubr.bf16.mxu1 %v903_v47 }
 0x490   :  { %2835 = vmatmul.mubr.bf16.gmra.mxu0 %v1275_v29 }
 0x491   :  { %2838 = vmatprep.mubr.bf16.mxu0 %v1276_v48 }
 0x492   :  { %2805 = vmatmul.mubr.bf16.gmra.mxu1 %v904_v59  ;;  %v2984_v59 = vld [vmem:[%s4376_s2 + $0x6] ss:$0 sm:$0xff] }
 0x493   :  { %2848 = vmatprep.mubr.msk.bf16.mxu1 %vm3012_vm9, %v4408_v36 }
 0x498   :  { %2839 = vmatmul.mubr.bf16.gmra.mxu0 %v1277_v24 }
 0x499   :  { %2842 = vmatprep.mubr.bf16.mxu0 %v1278_v37 }
 0x49a   :  { %2849 = vmatmul.mubr.msk.bf16.vlgmr.msra.gmra.mxu1 %vm417_vm0, %v2941_v26 }
 0x4a0   :  { %2843 = vmatmul.mubr.bf16.gmra.mxu0 %v1279_v14  ;;  %v2985_v14 = vld [vmem:[%s4376_s2 + $0x2] ss:$0 sm:$0xff] }
 0x4a1   :  { %2860 = vmatprep.mubr.msk.bf16.mxu0 %vm3012_vm9, %v4408_v36 }
 0x4b0   :  { %v797_v18 = vpop.permute.xlu0 %796  ;;  %v795_v31 = vpop.permute.xlu1 %794 }
 0x4b1   :  { %v801_v40 = vmul.f32 %v2982_v39, %v797_v18  ;;  %v800_v42 = vmul.f32 %v2982_v39, %v795_v31 }
 0x4b3   :  { %v1221_v43 = vmul.f32 %v801_v40, %v3134_v7  ;;  %v3676_v51 = vmul.f32 %v801_v40, %v3138_v8  ;;  %v1220_v27 = vmul.f32 %v800_v42, %v3134_v7  ;;  %v3680_v28 = vmul.f32 %v800_v42, %v3138_v8 }
 0x4b4   :  { %v793_v32 = vpop.permute.xlu0 %792  ;;  %v755_v5 = vpop.permute.xlu1 %754 }
 0x4b5   :  { %v1670_v38 = vpack.c.bf16 %v3676_v51, %v3680_v28  ;;  %v1652_v34 = vpack.c.bf16 %v1221_v43, %v1220_v27  ;;  %v760_v53 = vmul.f32 %v2983_v52, %v755_v5  ;;  %v3687_v41 = vmul.f32 %v2982_v39, %v793_v32  ;;  %v814_v51 = vld [vmem:[%s4381_s10] sm:$0xff] }
 0x4b7   :  { %2715 = vmatprep.subr.bf16.mxu1 %v1652_v34  ;;  %v1204_v44 = vmul.f32 %v760_v53, %v3134_v7  ;;  %v3691_v56 = vmul.f32 %v760_v53, %v3138_v8  ;;  %v1219_v30 = vmul.f32 %v3687_v41, %v3134_v7 }
 0x4b8   :  { %v753_v33 = vpop.permute.xlu0 %752  ;;  %v757_v35 = vpop.permute.xlu1 %756 }
 0x4b9   :  { %v761_v63 = vmul.f32 %v2983_v52, %v757_v35  ;;  %4452 = vst [vmem:[#allocation8_spill] sm:$0xff] %v3691_v56  ;;  %v759_v47 = vmul.f32 %v2983_v52, %v753_v33 }
 0x4bb   :  { %v1205_v58 = vmul.f32 %v761_v63, %v3134_v7  ;;  %v3695_v45 = vmul.f32 %v761_v63, %v3138_v8  ;;  %v1203_v29 = vmul.f32 %v759_v47, %v3134_v7  ;;  %v3707_v48 = vmul.f32 %v759_v47, %v3138_v8 }
 0x4bc   :  { %v785_v60 = vpop.permute.xlu0 %784  ;;  %v791_v46 = vpop.permute.xlu1 %790 }
 0x4bd   :  { %4453 = vst [vmem:[#allocation9_spill] sm:$0xff] %v3695_v45  ;;  %v1644_v9 = vpack.c.bf16 %v1205_v58, %v1204_v44  ;;  %v3697_v54 = vmul.f32 %v2982_v39, %v791_v46  ;;  %4454 = vst [vmem:[#allocation10_spill] sm:$0xff] %v3707_v48  ;;  %v3712_v49 = vmul.f32 %v2984_v59, %v785_v60 }
 0x4bf   :  { %v1218_v57 = vmul.f32 %v3697_v54, %v3134_v7  ;;  %2716 = vmatpush3.bf16.msra.mxu1 %v1644_v9  ;;  %v1217_v50 = vmul.f32 %v3712_v49, %v3134_v7 }
 0x4c0   :  { %v745_v20 = vpop.permute.xlu0 %744  ;;  %v751_v0 = vpop.permute.xlu1 %750 }
 0x4c1   :  { %v758_v22 = vmul.f32 %v2983_v52, %v751_v0  ;;  %v1651_v6 = vpack.c.bf16 %v1219_v30, %v1218_v57  ;;  %v749_v18 = vmul.f32 %v2985_v14, %v745_v20 }
 0x4c3   :  { %v1202_v61 = vmul.f32 %v758_v22, %v3134_v7  ;;  %v3716_v62 = vmul.f32 %v758_v22, %v3138_v8  ;;  %2717 = vmatprep.subr.bf16.mxu1 %v1651_v6  ;;  %v1201_v27 = vmul.f32 %v749_v18, %v3134_v7  ;;  %v3731_v32 = vmul.f32 %v749_v18, %v3138_v8 }
 0x4c4   :  { %v781_v23 = vpop.permute.xlu0 %780  ;;  %v783_v24 = vpop.permute.xlu1 %782 }
 0x4c5   :  { %4455 = vst [vmem:[#allocation11_spill] sm:$0xff] %v3716_v62  ;;  %v1643_v26 = vpack.c.bf16 %v1203_v29, %v1202_v61  ;;  %v3718_v37 = vmul.f32 %v2984_v59, %v783_v24  ;;  %v787_v53 = vmul.f32 %v2984_v59, %v781_v23  ;;  %v2986_v24 = vld [vmem:[%s4376_s2 + $0x5] ss:$0 sm:$0xff] }
 0x4c7   :  { %v1216_v31 = vmul.f32 %v3718_v37, %v3134_v7  ;;  %2718 = vmatpush3.bf16.msra.mxu1 %v1643_v26  ;;  %v1215_v60 = vmul.f32 %v787_v53, %v3134_v7  ;;  %v3745_v30 = vmul.f32 %v787_v53, %v3138_v8 }
 0x4c8   :  { %v741_v39 = vpop.permute.xlu0 %740  ;;  %v743_v40 = vpop.permute.xlu1 %742 }
 0x4c9   :  { %v748_v42 = vmul.f32 %v2985_v14, %v743_v40  ;;  %v1650_v43 = vpack.c.bf16 %v1217_v50, %v1216_v31  ;;  %v747_v46 = vmul.f32 %v2985_v14, %v741_v39  ;;  %v2987_v40 = vld [vmem:[%s4376_s2 + $0x1] ss:$0 sm:$0xff] }
 0x4cb   :  { %v1200_v5 = vmul.f32 %v748_v42, %v3134_v7  ;;  %v3735_v34 = vmul.f32 %v748_v42, %v3138_v8  ;;  %2719 = vmatprep.subr.bf16.mxu1 %v1650_v43  ;;  %v1199_v29 = vmul.f32 %v747_v46, %v3134_v7 }
 0x4cc   :  { %v773_v52 = vpop.permute.xlu0 %772 }
 0x4cd   :  { %v1642_v33 = vpack.c.bf16 %v1201_v27, %v1200_v5  ;;  %v777_v26 = vmul.f32 %v2986_v24, %v773_v52 }
 0x4ce   :  { %v779_v63 = vpop.permute.xlu1 %778 }
 0x4cf   :  { %v786_v44 = vmul.f32 %v2984_v59, %v779_v63  ;;  %2720 = vmatpush3.bf16.msra.mxu1 %v1642_v33  ;;  %v3751_v59 = vmul.f32 %v747_v46, %v3138_v8  ;;  %v1213_v43 = vmul.f32 %v777_v26, %v3134_v7  ;;  %v3767_v27 = vmul.f32 %v777_v26, %v3138_v8 }
 0x4d0   :  { %v733_v58 = vpop.permute.xlu0 %732 }
 0x4d1   :  { %v1214_v9 = vmul.f32 %v786_v44, %v3134_v7  ;;  %v3742_v47 = vmul.f32 %v786_v44, %v3138_v8  ;;  %v737_v42 = vmul.f32 %v2987_v40, %v733_v58 }
 0x4d2   :  { %v739_v57 = vpop.permute.xlu1 %738 }
 0x4d3   :  { %v746_v20 = vmul.f32 %v2985_v14, %v739_v57  ;;  %v1649_v0 = vpack.c.bf16 %v1215_v60, %v1214_v9  ;;  %v1197_v58 = vmul.f32 %v737_v42, %v3134_v7  ;;  %v3777_v46 = vmul.f32 %v737_v42, %v3138_v8 }
 0x4d4   :  { %v769_v22 = vpop.permute.xlu0 %768 }
 0x4d5   :  { %v1198_v61 = vmul.f32 %v746_v20, %v3134_v7  ;;  %v3755_v23 = vmul.f32 %v746_v20, %v3138_v8  ;;  %2721 = vmatprep.subr.bf16.mxu1 %v1649_v0  ;;  %v775_v20 = vmul.f32 %v2986_v24, %v769_v22 }
 0x4d6   :  { %v771_v50 = vpop.permute.xlu1 %770 }
 0x4d7   :  { %v1641_v14 = vpack.c.bf16 %v1199_v29, %v1198_v61  ;;  %v776_v31 = vmul.f32 %v2986_v24, %v771_v50 }
 0x4d8   :  { %v729_v39 = vpop.permute.xlu0 %728 }
 0x4d9   :  { %2722 = vmatpush3.bf16.msra.mxu1 %v1641_v14  ;;  %v1212_v5 = vmul.f32 %v776_v31, %v3134_v7  ;;  %v3771_v52 = vmul.f32 %v776_v31, %v3138_v8  ;;  %v735_v50 = vmul.f32 %v2987_v40, %v729_v39  ;;  %v1211_v14 = vmul.f32 %v775_v20, %v3134_v7 }
 0x4da   :  { %v731_v53 = vpop.permute.xlu1 %730  ;;  %v3787_v31 = vmul.f32 %v775_v20, %v3138_v8  ;;  %v2988_v20 = vld [vmem:[%s4376_s2] ss:$0 sm:$0xff] }
 0x4db   :  { %v736_v33 = vmul.f32 %v2987_v40, %v731_v53  ;;  %v1648_v63 = vpack.c.bf16 %v1213_v43, %v1212_v5  ;;  %v3797_v39 = vmul.f32 %v735_v50, %v3138_v8 }
 0x4dc   :  { %v721_v44 = vpop.permute.xlu0 %720 }
 0x4dd   :  { %v1196_v9 = vmul.f32 %v736_v33, %v3134_v7  ;;  %v3781_v57 = vmul.f32 %v736_v33, %v3138_v8  ;;  %2723 = vmatprep.subr.bf16.mxu1 %v1648_v63 }
 0x4de   :  { %v767_v0 = vpop.permute.xlu1 %766 }
 0x4df   :  { %v1640_v29 = vpack.c.bf16 %v1197_v58, %v1196_v9  ;;  %v774_v26 = vmul.f32 %v2986_v24, %v767_v0  ;;  %v1195_v24 = vmul.f32 %v735_v50, %v3134_v7  ;;  %v725_v0 = vmul.f32 %v2988_v20, %v721_v44 }
 0x4e0   :  { %v717_v22 = vpop.permute.xlu0 %716  ;;  %v1206_v50 = vmul.f32 %v3401_v55, %v3134_v7 }
 0x4e1   :  { %2724 = vmatpush3.bf16.msra.mxu1 %v1640_v29  ;;  %v1210_v42 = vmul.f32 %v774_v26, %v3134_v7  ;;  %v3791_v43 = vmul.f32 %v774_v26, %v3138_v8  ;;  %v1193_v10 = vmul.f32 %v725_v0, %v3134_v7  ;;  %v3814_v44 = vmul.f32 %v725_v0, %v3138_v8  ;;  %v3828_v0 = vld [vmem:[%s4376_s2 + $0x8] ss:$0 sm:$0xff] }
 0x4e2   :  { %v727_v5 = vpop.permute.xlu1 %726  ;;  %4458 = vst [vmem:[#allocation14_spill] sm:$0xff] %v3828_v0 }
 0x4e3   :  { %v734_v53 = vmul.f32 %v2987_v40, %v727_v5  ;;  %v1647_v33 = vpack.c.bf16 %v1211_v14, %v1210_v42  ;;  %v1207_v14 = vmul.f32 %v3405_v11, %v3134_v7  ;;  %4456 = vst [vmem:[#allocation12_spill] sm:$0xff] %v3814_v44 }
 0x4e4   :  { %v809_v42 = vpop.permute.xlu0 %808 }
 0x4e5   :  { %v1194_v58 = vmul.f32 %v734_v53, %v3134_v7  ;;  %v3801_v9 = vmul.f32 %v734_v53, %v3138_v8  ;;  %2725 = vmatprep.subr.bf16.mxu1 %v1647_v33  ;;  %v723_v53 = vmul.f32 %v2988_v20, %v717_v22  ;;  %v1591_v22 = vmul.f32 %v3718_v37, %v3138_v8 }
 0x4e6   :  { %v719_v40 = vpop.permute.xlu1 %718 }
 0x4e7   :  { %v1639_v29 = vpack.c.bf16 %v1195_v24, %v1194_v58  ;;  %v724_v5 = vmul.f32 %v2988_v20, %v719_v40  ;;  %v1645_v58 = vpack.c.bf16 %v1207_v14, %v1206_v50  ;;  %v813_v40 = vmul.f32 %v3828_v0, %v809_v42 }
 0x4e8   :  { %v1191_v12 = vmul.f32 %v723_v53, %v3134_v7  ;;  %v3835_v13 = vmul.f32 %v723_v53, %v3138_v8  ;;  %v805_v50 = vpop.permute.xlu0 %804 }
 0x4e9   :  { %2726 = vmatpush3.bf16.msra.mxu1 %v1639_v29  ;;  %v1192_v33 = vmul.f32 %v724_v5, %v3134_v7  ;;  %v3818_v24 = vmul.f32 %v724_v5, %v3138_v8  ;;  %v3847_v53 = vmul.f32 %v813_v40, %v3134_v7  ;;  %v811_v1 = vmul.f32 %v3828_v0, %v805_v50 }
 0x4ea   :  { %2727 = vmatprep.subr.bf16.mxu1 %v1646_v19  ;;  %v715_v55 = vpop.permute.xlu1 %714  ;;  %4459 = vst [vmem:[#allocation15_spill] sm:$0xff] %v3835_v13 }
 0x4eb   :  { %4457 = vst [vmem:[#allocation13_spill] sm:$0xff] %v3818_v24  ;;  %v722_v11 = vmul.f32 %v2988_v20, %v715_v55  ;;  %v1638_v29 = vpack.c.bf16 %v1193_v10, %v1192_v33  ;;  %v1592_v20 = vmul.f32 %v3712_v49, %v3138_v8  ;;  %4461 = vst [vmem:[#allocation17_spill] sm:$0xff] %v3847_v53 }
 0x4ed   :  { %v1190_v19 = vmul.f32 %v722_v11, %v3134_v7  ;;  %v3839_v37 = vmul.f32 %v722_v11, %v3138_v8  ;;  %2728 = vmatpush3.bf16.msra.mxu1 %v1638_v29  ;;  %v1668_v55 = vpack.c.bf16 %v1592_v20, %v1591_v22  ;;  %v1600_v11 = vmul.f32 %v813_v40, %v3138_v8 }
 0x4ee   :  { %v807_v14 = vpop.permute.xlu1 %806  ;;  %2729 = vmatprep.subr.bf16.mxu1 %v1645_v58  ;;  %v3859_v22 = vmul.f32 %v811_v1, %v3134_v7  ;;  %v1598_v40 = vmul.f32 %v811_v1, %v3138_v8  ;;  %v1594_v1 = vmul.f32 %v3687_v41, %v3138_v8  ;;  %v815_v41 = vld [vmem:[%s4381_s10 + $0x8] sm:$0xff] }
 0x4ef   :  { %4460 = vst [vmem:[#allocation16_spill] sm:$0xff] %v3839_v37  ;;  %v1637_v10 = vpack.c.bf16 %v1191_v12, %v1190_v19  ;;  %v812_v33 = vmul.f32 %v3828_v0, %v807_v14 }
 0x4f0   :  { %4463 = vst [vmem:[#allocation19_spill] sm:$0xff] %v3859_v22 }
 0x4f1   :  { %v3852_v49 = vmul.f32 %v812_v33, %v3134_v7  ;;  %v1599_v29 = vmul.f32 %v812_v33, %v3138_v8  ;;  %2730 = vmatpush3.bf16.msra.mxu1 %v1637_v10 }
 0x4f2   :  { %v803_v12 = vpop.permute.xlu1 %802  ;;  %2737 = vmatprep.subr.bf16.mxu1 %v1668_v55  ;;  %v1593_v55 = vmul.f32 %v3697_v54, %v3138_v8 }
 0x4f3   :  { %4462 = vst [vmem:[#allocation18_spill] sm:$0xff] %v3852_v49  ;;  %v1672_v19 = vpack.c.bf16 %v1600_v11, %v1599_v29  ;;  %v810_v14 = vmul.f32 %v3828_v0, %v803_v12 }
 0x4f4   :  { %v1669_v11 = vpack.c.bf16 %v1594_v1, %v1593_v55 }
 0x4f5   :  { %v3863_v20 = vmul.f32 %v810_v14, %v3134_v7  ;;  %v1597_v50 = vmul.f32 %v810_v14, %v3138_v8  ;;  %2853 = vmatpush3.bf16.msra.mxu0 %v1672_v19 }
 0x4f6   :  { %2854 = vmatprep.subr.bf16.mxu0 %v4408_v36 }
 0x4f7   :  { %4464 = vst [vmem:[#allocation20_spill] sm:$0xff] %v3863_v20  ;;  %v1671_v33 = vpack.c.bf16 %v1598_v40, %v1597_v50 }
 0x4f9   :  { %2855 = vmatpush3.bf16.msra.mxu0 %v1671_v33 }
 0x4fa   :  { %2856 = vmatprep.subr.bf16.mxu0 %v4408_v36 }
 0x4fd   :  { %2857 = vmatpush3.bf16.msra.mxu0 %v1670_v38 }
 0x4fe   :  { %2858 = vmatprep.subr.bf16.mxu0 %v4408_v36 }
 0x501   :  { %2859 = vmatpush3.bf16.msra.mxu0 %v1669_v11  ;;  %v817_v11 = vld [vmem:[%s4381_s10 + $0x18] sm:$0xff] }
 0x518   :  { %v2774_v29 = vpop.f32.mrf.mxu0 }
 0x51a   :  { %v3878_v12 = vpop.f32.mrf.mxu1  ;;  %v939_v19 = vpop.f32.mrf.mxu0 }
 0x51b   :  { %v2583_v50 = vclamps-f32 %v939_v19, 3.5555556  ;;  %v2585_v19 = vclamps-f32 %v2774_v29, 3.5555556  ;;  %v819_v29 = vld [vmem:[%s4381_s10 + $0x28] sm:$0xff] }
 0x51c   :  { %v955_v14 = vpop.f32.mrf.mxu1  ;;  %v2775_v40 = vpop.f32.mrf.mxu0 }
 0x51d   :  { %v2586_v38 = vclamps-f32 %v2775_v40, 3.5555556  ;;  %v1154_v10 = vmul.f32 %v2583_v50, %v814_v51  ;;  %v2587_v61 = vclamps-f32 %v955_v14, 3.5555556  ;;  %v2589_v14 = vclamps-f32 %v3878_v12, 3.5555556 }
 0x51e   :  { %v2779_v33 = vpop.f32.mrf.mxu1  ;;  %v942_v54 = vpop.f32.mrf.mxu0 }
 0x51f   :  { %v2584_v28 = vclamps-f32 %v942_v54, 3.5555556  ;;  %v1157_v5 = vmul.f32 %v2586_v38, %v817_v11  ;;  %v818_v38 = vld [vmem:[%s4381_s10 + $0x20] sm:$0xff]  ;;  %v2590_v6 = vclamps-f32 %v2779_v33, 3.5555556  ;;  %v820_v33 = vld [vmem:[%s4381_s10 + $0x30] sm:$0xff] }
 0x520   :  { %v958_v55 = vpop.f32.mrf.mxu1  ;;  %v2812_v1 = vpop.f32.mrf.mxu0 }
 0x521   :  { %v1155_v36 = vmul.f32 %v2584_v28, %v815_v41  ;;  %v2621_v25 = vclamps-f32 %v2812_v1, 3.5555556  ;;  %v2588_v54 = vclamps-f32 %v958_v55, 3.5555556  ;;  %v1156_v28 = vmul.f32 %v2585_v19, %v816_v17 }
 0x522   :  { %v3889_v58 = vpop.f32.mrf.mxu1  ;;  %v1314_v42 = vpop.f32.mrf.mxu0  ;;  %v1158_v19 = vmul.f32 %v2587_v61, %v818_v38 }
 0x523   :  { %v3894_v40 = vmul.f32 %v2621_v25, %v816_v17  ;;  %v1601_v63 = vpack.c.bf16 %v1155_v36, %v1154_v10  ;;  %v2619_v50 = vclamps-f32 %v1314_v42, 3.5555556  ;;  %v1602_v55 = vpack.c.bf16 %v1157_v5, %v1156_v28  ;;  %v821_v17 = vld [vmem:[%s4381_s10 + $0x38] sm:$0xff] }
 0x524   :  { %v971_v16 = vpop.f32.mrf.mxu1  ;;  %v2813_v26 = vpop.f32.mrf.mxu0  ;;  %v1159_v35 = vmul.f32 %v2588_v54, %v819_v29 }
 0x525   :  { %v2622_v60 = vclamps-f32 %v2813_v26, 3.5555556  ;;  %1749 = vxpose.xlu0.c.b16.start [1/8] (narrow) %v1601_v63, 16  ;;  %v3907_v42 = vmul.f32 %v2619_v50, %v814_v51  ;;  %v823_v50 = vld [vmem:[%s4381_s10 + $0x48] sm:$0xff] }
 0x526   :  { %v2783_v1 = vpop.f32.mrf.mxu1  ;;  %v1317_v18 = vpop.f32.mrf.mxu0 }
 0x527   :  { %v2620_v25 = vclamps-f32 %v1317_v18, 3.5555556  ;;  %v3902_v36 = vmul.f32 %v2622_v60, %v817_v11  ;;  %v1603_v11 = vpack.c.bf16 %v1159_v35, %v1158_v19  ;;  %v2591_v18 = vclamps-f32 %v971_v16, 3.5555556  ;;  %v822_v35 = vld [vmem:[%s4381_s10 + $0x40] sm:$0xff] }
 0x528   :  { %v974_v10 = vpop.f32.mrf.mxu1  ;;  %v2816_v4 = vpop.f32.mrf.mxu0 }
 0x529   :  { %v3909_v63 = vmul.f32 %v2620_v25, %v815_v41  ;;  %v2625_v26 = vclamps-f32 %v2816_v4, 3.5555556  ;;  %1750 = vxpose.xlu0.c.b16.cont [2/8] (narrow) %v1602_v55, 16  ;;  %v1161_v41 = vmul.f32 %v2590_v6, %v821_v17  ;;  %v2592_v4 = vclamps-f32 %v974_v10, 3.5555556 }
 0x52a   :  { %v3914_v5 = vpop.f32.mrf.mxu1  ;;  %v1330_v60 = vpop.f32.mrf.mxu0  ;;  %v1160_v55 = vmul.f32 %v2589_v14, %v820_v33  ;;  %v2594_v6 = vclamps-f32 %v2783_v1, 3.5555556  ;;  %v2593_v1 = vclamps-f32 %v3889_v58, 3.5555556 }
 0x52b   :  { %v3921_v54 = vmul.f32 %v2625_v26, %v820_v33  ;;  %v2623_v28 = vclamps-f32 %v1330_v60, 3.5555556  ;;  %v825_v60 = vld [vmem:[%s4381_s10 + $0x58] sm:$0xff] }
 0x52c   :  { %v3923_v61 = vpop.f32.mrf.mxu1  ;;  %v2817_v12 = vpop.f32.mrf.mxu0  ;;  %v1604_v19 = vpack.c.bf16 %v1161_v41, %v1160_v55  ;;  %v1165_v55 = vmul.f32 %v2594_v6, %v825_v60 }
 0x52d   :  { %v2626_v25 = vclamps-f32 %v2817_v12, 3.5555556  ;;  %1751 = vxpose.xlu0.c.b16.cont [3/8] (narrow) %v1603_v11, 16  ;;  %v1163_v12 = vmul.f32 %v2592_v4, %v823_v50  ;;  %v3938_v33 = vmul.f32 %v2623_v28, %v818_v38  ;;  %v824_v4 = vld [vmem:[%s4381_s10 + $0x50] sm:$0xff]  ;;  %v2595_v20 = vclamps-f32 %v3923_v61, 3.5555556 }
 0x52e   :  { %v3928_v8 = vpop.f32.mrf.mxu1  ;;  %v1333_v51 = vpop.f32.mrf.mxu0 }
 0x52f   :  { %v3933_v10 = vmul.f32 %v2626_v25, %v821_v17  ;;  %v2624_v26 = vclamps-f32 %v1333_v51, 3.5555556  ;;  %v1162_v17 = vmul.f32 %v2591_v18, %v822_v35  ;;  %v827_v18 = vld [vmem:[%s4381_s10 + $0x68] sm:$0xff]  ;;  %v2598_v38 = vclamps-f32 %v3928_v8, 3.5555556  ;;  %v829_v8 = vld [vmem:[%s4381_s10 + $0x78] sm:$0xff] }
 0x530   :  { %v990_v14 = vpop.f32.mrf.mxu1  ;;  %v2820_v16 = vpop.f32.mrf.mxu0 }
 0x531   :  { %v3942_v7 = vmul.f32 %v2624_v26, %v819_v29  ;;  %v2629_v51 = vclamps-f32 %v2820_v16, 3.5555556  ;;  %1752 = vxpose.xlu0.c.b16.cont [4/8] (narrow) %v1604_v19, 16  ;;  %v1605_v28 = vpack.c.bf16 %v1163_v12, %v1162_v17  ;;  %v2596_v0 = vclamps-f32 %v990_v14, 3.5555556  ;;  %v826_v12 = vld [vmem:[%s4381_s10 + $0x60] sm:$0xff] }
 0x532   :  { %v2790_v25 = vpop.f32.mrf.mxu1  ;;  %v1346_v41 = vpop.f32.mrf.mxu0  ;;  %v1164_v16 = vmul.f32 %v2593_v1, %v824_v4  ;;  %v3965_v1 = vld [vmem:[%s4381_s10 + $0x80] sm:$0xff] }
 0x533   :  { %v3950_v11 = vmul.f32 %v2629_v51, %v824_v4  ;;  %v2627_v26 = vclamps-f32 %v1346_v41, 3.5555556  ;;  %v1167_v62 = vmul.f32 %v2596_v0, %v827_v18  ;;  %v3972_v4 = vld [vmem:[%s4381_s10 + $0x88] sm:$0xff]  ;;  %v2601_v48 = vclamps-f32 %v2790_v25, 3.5555556 }
 0x534   :  { %v1003_v29 = vpop.f32.mrf.mxu1  ;;  %v2821_v58 = vpop.f32.mrf.mxu0  ;;  %v1606_v41 = vpack.c.bf16 %v1165_v55, %v1164_v16  ;;  %v3999_v55 = vld [vmem:[%s4381_s10 + $0x90] sm:$0xff] }
 0x535   :  { %v2630_v19 = vclamps-f32 %v2821_v58, 3.5555556  ;;  %1753 = vxpose.xlu0.c.b16.cont [5/8] (narrow) %v1605_v28, 16  ;;  %v2599_v14 = vclamps-f32 %v1003_v29, 3.5555556  ;;  %v3967_v61 = vmul.f32 %v2627_v26, %v822_v35  ;;  %v1166_v26 = vmul.f32 %v2595_v20, %v826_v12 }
 0x536   :  { %v2791_v22 = vpop.f32.mrf.mxu1  ;;  %v1349_v6 = vpop.f32.mrf.mxu0  ;;  %v2597_v35 = vclamps-f32 %v3914_v5, 3.5555556  ;;  %v1169_v5 = vmul.f32 %v2598_v38, %v829_v8  ;;  %v1172_v37 = vmul.f32 %v2601_v48, %v3999_v55 }
 0x537   :  { %v3959_v17 = vmul.f32 %v2630_v19, %v825_v60  ;;  %v2628_v51 = vclamps-f32 %v1349_v6, 3.5555556  ;;  %v2602_v0 = vclamps-f32 %v2791_v22, 3.5555556  ;;  %v3987_v19 = vld [vmem:[%s4381_s10 + $0x98] sm:$0xff]  ;;  %v828_v22 = vld [vmem:[%s4381_s10 + $0x70] sm:$0xff] }
 0x538   :  { %v1006_v28 = vpop.f32.mrf.mxu1  ;;  %v3974_v60 = vpop.f32.mrf.mxu0  ;;  %v1168_v25 = vmul.f32 %v2597_v35, %v828_v22 }
 0x539   :  { %v2600_v29 = vclamps-f32 %v1006_v28, 3.5555556  ;;  %v3981_v58 = vmul.f32 %v2628_v51, %v823_v50  ;;  %1754 = vxpose.xlu0.c.b16.cont [6/8] (narrow) %v1606_v41, 16  ;;  %v1170_v28 = vmul.f32 %v2599_v14, %v3965_v1  ;;  %v1607_v51 = vpack.c.bf16 %v1167_v62, %v1166_v26  ;;  %v4006_v26 = vld [vmem:[%s4381_s10 + $0xa0] sm:$0xff] }
 0x53a   :  { %v2794_v16 = vpop.f32.mrf.mxu1  ;;  %v1362_v6 = vpop.f32.mrf.mxu0  ;;  %v1173_v53 = vmul.f32 %v2602_v0, %v3987_v19  ;;  %v1608_v38 = vpack.c.bf16 %v1169_v5, %v1168_v25  ;;  %v4011_v0 = vld [vmem:[%s4381_s10 + $0xa8] sm:$0xff] }
 0x53b   :  { %v1171_v50 = vmul.f32 %v2600_v29, %v3972_v4  ;;  %v2631_v45 = vclamps-f32 %v1362_v6, 3.5555556  ;;  %v2605_v5 = vclamps-f32 %v2794_v16, 3.5555556 }
 0x53c   :  { %v1019_v41 = vpop.f32.mrf.mxu1  ;;  %v2825_v49 = vpop.f32.mrf.mxu0 }
 0x53d   :  { %v1609_v56 = vpack.c.bf16 %v1171_v50, %v1170_v28  ;;  %1755 = vxpose.xlu0.c.b16.cont [7/8] (narrow) %v1607_v51, 16  ;;  %v2603_v20 = vclamps-f32 %v1019_v41, 3.5555556  ;;  %v2634_v21 = vclamps-f32 %v2825_v49, 3.5555556  ;;  %v1610_v28 = vpack.c.bf16 %v1173_v53, %v1172_v37 }
 0x53e   :  { %v2795_v14 = vpop.f32.mrf.mxu1  ;;  %v1365_v29 = vpop.f32.mrf.mxu0  ;;  %v2633_v51 = vclamps-f32 %v3974_v60, 3.5555556  ;;  %v1541_v41 = vmul.f32 %v2631_v45, %v826_v12 }
 0x53f   :  { %1765 = vxpose.xlu1.c.b16.start [1/8] (narrow) %v1609_v56, 16  ;;  %v2632_v62 = vclamps-f32 %v1365_v29, 3.5555556  ;;  %v2606_v13 = vclamps-f32 %v2795_v14, 3.5555556  ;;  %v4016_v56 = vld [vmem:[%s4381_s10 + $0xb8] sm:$0xff]  ;;  %v1174_v37 = vmul.f32 %v2603_v20, %v4006_v26 }
 0x540   :  { %v1022_v35 = vpop.f32.mrf.mxu1  ;;  %v2828_v6 = vpop.f32.mrf.mxu0  ;;  %v4022_v14 = vld [vmem:[%s4381_s10 + $0xb0] sm:$0xff] }
 0x541   :  { %v2604_v48 = vclamps-f32 %v1022_v35, 3.5555556  ;;  %v1542_v50 = vmul.f32 %v2632_v62, %v827_v18  ;;  %1756 = vxpose.xlu0.c.b16.end [8/8] (narrow) %v1608_v38, 16  ;;  %v1177_v29 = vmul.f32 %v2606_v13, %v4016_v56  ;;  %v1544_v18 = vmul.f32 %v2634_v21, %v829_v8  ;;  %v4031_v21 = vld [vmem:[%s4381_s10 + $0xc0] sm:$0xff]  ;;  %v4036_v8 = vld [vmem:[%s4381_s10 + $0xc8] sm:$0xff] }
 0x542   :  { %v2798_v49 = vpop.f32.mrf.mxu1  ;;  %v1378_v25 = vpop.f32.mrf.mxu0  ;;  %v1176_v38 = vmul.f32 %v2605_v5, %v4022_v14  ;;  %v1543_v35 = vmul.f32 %v2633_v51, %v828_v22 }
 0x543   :  { %v1175_v53 = vmul.f32 %v2604_v48, %v4011_v0  ;;  %1766 = vxpose.xlu1.c.b16.cont [2/8] (narrow) %v1610_v28, 16  ;;  %v1625_v60 = vpack.c.bf16 %v1542_v50, %v1541_v41  ;;  %v2635_v12 = vclamps-f32 %v1378_v25, 3.5555556  ;;  %v2637_v41 = vclamps-f32 %v2828_v6, 3.5555556  ;;  %v4043_v25 = vld [vmem:[%s4381_s10 + $0xd8] sm:$0xff] }
 0x544   :  { %v1035_v16 = vpop.f32.mrf.mxu1  ;;  %v2829_v62 = vpop.f32.mrf.mxu0  ;;  %v1612_v2 = vpack.c.bf16 %v1177_v29, %v1176_v38  ;;  %v1626_v48 = vpack.c.bf16 %v1544_v18, %v1543_v35  ;;  %v2609_v29 = vclamps-f32 %v2798_v49, 3.5555556 }
 0x545   :  { %v1611_v45 = vpack.c.bf16 %v1175_v53, %v1174_v37  ;;  %1797 = vxpose.xlu0.c.b16.start [1/8] (narrow) %v1625_v60, 16  ;;  %v2607_v44 = vclamps-f32 %v1035_v16, 3.5555556  ;;  %v2638_v13 = vclamps-f32 %v2829_v62, 3.5555556  ;;  %v1545_v50 = vmul.f32 %v2635_v12, %v3965_v1 }
 0x546   :  { %v2799_v15 = vpop.f32.mrf.mxu1  ;;  %v1381_v24 = vpop.f32.mrf.mxu0  ;;  %v1547_v49 = vmul.f32 %v2637_v41, %v3999_v55  ;;  %v4064_v55 = vld [vmem:[%s4381_s10 + $0xe8] sm:$0xff]  ;;  %v4070_v41 = vld [vmem:[%s4381_s10 + $0xf8] sm:$0xff] }
 0x547   :  { %1767 = vxpose.xlu1.c.b16.cont [3/8] (narrow) %v1611_v45, 16  ;;  %v2636_v20 = vclamps-f32 %v1381_v24, 3.5555556  ;;  %v2610_v5 = vclamps-f32 %v2799_v15, 3.5555556  ;;  %v1178_v18 = vmul.f32 %v2607_v44, %v4031_v21  ;;  %v4050_v15 = vld [vmem:[%s4381_s10 + $0xd0] sm:$0xff]  ;;  %v1548_v1 = vmul.f32 %v2638_v13, %v3987_v19 }
 0x548   :  { %v1038_v22 = vpop.f32.mrf.mxu1  ;;  %v2832_v28 = vpop.f32.mrf.mxu0  ;;  %v4059_v19 = vld [vmem:[%s4381_s10 + $0xe0] sm:$0xff] }
 0x549   :  { %v2608_v51 = vclamps-f32 %v1038_v22, 3.5555556  ;;  %v1546_v24 = vmul.f32 %v2636_v20, %v3972_v4  ;;  %1798 = vxpose.xlu0.c.b16.cont [2/8] (narrow) %v1626_v48, 16  ;;  %v1181_v60 = vmul.f32 %v2610_v5, %v4043_v25  ;;  %v1628_v48 = vpack.c.bf16 %v1548_v1, %v1547_v49 }
 0x54a   :  { %v2802_v37 = vpop.f32.mrf.mxu1  ;;  %v1394_v53 = vpop.f32.mrf.mxu0 }
 0x54b   :  { %v1179_v16 = vmul.f32 %v2608_v51, %v4036_v8  ;;  %v1627_v62 = vpack.c.bf16 %v1546_v24, %v1545_v50  ;;  %1768 = vxpose.xlu1.c.b16.cont [4/8] (narrow) %v1612_v2, 16  ;;  %v2639_v12 = vclamps-f32 %v1394_v53, 3.5555556  ;;  %v1180_v2 = vmul.f32 %v2609_v29, %v4050_v15 }
 0x54c   :  { %v1051_v4 = vpop.f32.mrf.mxu1  ;;  %v2833_v6 = vpop.f32.mrf.mxu0 }
 0x54d   :  { %v1613_v45 = vpack.c.bf16 %v1179_v16, %v1178_v18  ;;  %1799 = vxpose.xlu0.c.b16.cont [3/8] (narrow) %v1627_v62, 16  ;;  %v2611_v35 = vclamps-f32 %v1051_v4, 3.5555556  ;;  %v2642_v22 = vclamps-f32 %v2833_v6, 3.5555556  ;;  %v1614_v51 = vpack.c.bf16 %v1181_v60, %v1180_v2  ;;  %v4076_v4 = vld [vmem:[%s4381_s10 + $0xf0] sm:$0xff] }
 0x54e   :  { %v2803_v44 = vpop.f32.mrf.mxu1  ;;  %v1397_v38 = vpop.f32.mrf.mxu0  ;;  %v1549_v24 = vmul.f32 %v2639_v12, %v4006_v26  ;;  %v2613_v18 = vclamps-f32 %v2802_v37, 3.5555556  ;;  %v2641_v16 = vclamps-f32 %v2832_v28, 3.5555556 }
 0x54f   :  { %1769 = vxpose.xlu1.c.b16.cont [5/8] (narrow) %v1613_v45, 16  ;;  %v2640_v20 = vclamps-f32 %v1397_v38, 3.5555556  ;;  %v2614_v13 = vclamps-f32 %v2803_v44, 3.5555556  ;;  %v1182_v26 = vmul.f32 %v2611_v35, %v4059_v19 }
 0x550   :  { %v1054_v50 = vpop.f32.mrf.mxu1  ;;  %v2836_v5 = vpop.f32.mrf.mxu0  ;;  %v1184_v44 = vmul.f32 %v2613_v18, %v4076_v4  ;;  %v1551_v38 = vmul.f32 %v2641_v16, %v4022_v14 }
 0x551   :  { %v2612_v53 = vclamps-f32 %v1054_v50, 3.5555556  ;;  %v1550_v29 = vmul.f32 %v2640_v20, %v4011_v0  ;;  %1800 = vxpose.xlu0.c.b16.cont [4/8] (narrow) %v1628_v48, 16  ;;  %v1185_v45 = vmul.f32 %v2614_v13, %v4070_v41  ;;  %v1552_v0 = vmul.f32 %v2642_v22, %v4016_v56  ;;  %v846_v56 = vld [vmem:[%s4381_s10 + $0x100] sm:$0xff]  ;;  %v847_v22 = vld [vmem:[%s4381_s10 + $0x108] sm:$0xff] }
 0x552   :  { %v2806_v62 = vpop.f32.mrf.mxu1  ;;  %v1410_v1 = vpop.f32.mrf.mxu0 }
 0x553   :  { %v1183_v6 = vmul.f32 %v2612_v53, %v4064_v55  ;;  %v1629_v60 = vpack.c.bf16 %v1550_v29, %v1549_v24  ;;  %1770 = vxpose.xlu1.c.b16.cont [6/8] (narrow) %v1614_v51, 16  ;;  %v2643_v49 = vclamps-f32 %v1410_v1, 3.5555556  ;;  %v1616_v50 = vpack.c.bf16 %v1185_v45, %v1184_v44 }
 0x554   :  { %v1067_v37 = vpop.f32.mrf.mxu1  ;;  %v2837_v28 = vpop.f32.mrf.mxu0  ;;  %v1630_v51 = vpack.c.bf16 %v1552_v0, %v1551_v38  ;;  %v2645_v1 = vclamps-f32 %v2836_v5, 3.5555556 }
 0x555   :  { %v1615_v12 = vpack.c.bf16 %v1183_v6, %v1182_v26  ;;  %1801 = vxpose.xlu0.c.b16.cont [5/8] (narrow) %v1629_v60, 16  ;;  %v2615_v35 = vclamps-f32 %v1067_v37, 3.5555556  ;;  %v2646_v13 = vclamps-f32 %v2837_v28, 3.5555556  ;;  %v1553_v14 = vmul.f32 %v2643_v49, %v4031_v21  ;;  %v849_v26 = vld [vmem:[%s4381_s10 + $0x118] sm:$0xff] }
 0x556   :  { %v2807_v2 = vpop.f32.mrf.mxu1  ;;  %v1413_v20 = vpop.f32.mrf.mxu0  ;;  %v2617_v60 = vclamps-f32 %v2806_v62, 3.5555556  ;;  %v848_v21 = vld [vmem:[%s4381_s10 + $0x110] sm:$0xff]  ;;  %v1555_v44 = vmul.f32 %v2645_v1, %v4050_v15 }
 0x557   :  { %1771 = vxpose.xlu1.c.b16.cont [7/8] (narrow) %v1615_v12, 16  ;;  %v2644_v48 = vclamps-f32 %v1413_v20, 3.5555556  ;;  %v2618_v29 = vclamps-f32 %v2807_v2, 3.5555556  ;;  %v1186_v45 = vmul.f32 %v2615_v35, %v846_v56  ;;  %v1556_v28 = vmul.f32 %v2646_v13, %v4043_v25 }
 0x558   :  { %v1070_v24 = vpop.f32.mrf.mxu1  ;;  %v2840_v53 = vpop.f32.mrf.mxu0  ;;  %v1188_v2 = vmul.f32 %v2617_v60, %v848_v21 }
 0x559   :  { %v2616_v18 = vclamps-f32 %v1070_v24, 3.5555556  ;;  %v1554_v16 = vmul.f32 %v2644_v48, %v4036_v8  ;;  %1802 = vxpose.xlu0.c.b16.cont [6/8] (narrow) %v1630_v51, 16  ;;  %v1189_v8 = vmul.f32 %v2618_v29, %v849_v26  ;;  %v1632_v20 = vpack.c.bf16 %v1556_v28, %v1555_v44  ;;  %v4487_v44 = vld [vmem:[#allocation16_spill] sm:$0xff] }
 0x55a   :  { %v1426_v6 = vpop.f32.mrf.mxu0  ;;  %v2649_v25 = vclamps-f32 %v2840_v53, 3.5555556 }
 0x55b   :  { %v1187_v0 = vmul.f32 %v2616_v18, %v847_v22  ;;  %v1631_v37 = vpack.c.bf16 %v1554_v16, %v1553_v14  ;;  %1772 = vxpose.xlu1.c.b16.end [8/8] (narrow) %v1616_v50, 16  ;;  %v2647_v5 = vclamps-f32 %v1426_v6, 3.5555556  ;;  %v1618_v50 = vpack.c.bf16 %v1189_v8, %v1188_v2  ;;  %v4493_v2 = vld [vmem:[#allocation18_spill] sm:$0xff] }
 0x55c   :  { %v2841_v12 = vpop.f32.mrf.mxu0  ;;  %v1559_v16 = vmul.f32 %v2649_v25, %v4076_v4  ;;  %v4465_v6 = vpack.c.bf16 %v3909_v63, %v3907_v42  ;;  %v4468_v63 = vpack.c.bf16 %v3933_v10, %v3921_v54  ;;  %v4474_v8 = vpack.c.bf16 %v3767_v27, %v3771_v52  ;;  %v4483_v52 = vld [vmem:[#allocation7_spill] sm:$0xff] }
 0x55d   :  { %v1617_v49 = vpack.c.bf16 %v1187_v0, %v1186_v45  ;;  %1803 = vxpose.xlu0.c.b16.cont [7/8] (narrow) %v1631_v37, 16  ;;  %v2650_v35 = vclamps-f32 %v2841_v12, 3.5555556  ;;  %v1557_v51 = vmul.f32 %v2647_v5, %v4059_v19  ;;  %v4467_v12 = vpack.c.bf16 %v3942_v7, %v3938_v33  ;;  %v1742_v7 = vpop.f32.mrf.mxu1  ;;  %v1957_v33 = vld [vmem:[%s4382_s12 + $0x8] sm:$0xff] }
 0x55e   :  { %v1429_v38 = vpop.f32.mrf.mxu0  ;;  %v4475_v5 = vpack.c.bf16 %v3777_v46, %v3781_v57  ;;  %v4486_v57 = vld [vmem:[#allocation15_spill] sm:$0xff]  ;;  %v4501_v25 = vmov 0  }
 0x55f   :  { %1781 = vxpose.xlu1.c.b16.start [1/8] (narrow) %v1617_v49, 16  ;;  %v2648_v62 = vclamps-f32 %v1429_v38, 3.5555556  ;;  %v1560_v15 = vmul.f32 %v2650_v35, %v4070_v41  ;;  %v4466_v41 = vpack.c.bf16 %v3902_v36, %v3894_v40  ;;  %v4470_v40 = vpack.c.bf16 %v3959_v17, %v3950_v11  ;;  %v1956_v36 = vld [vmem:[%s4382_s12] sm:$0xff]  ;;  %v2850_v54 = vpop.f32.mrf.mxu1  ;;  %v4490_v38 = vld [vmem:[#allocation8_spill] sm:$0xff] }
 0x560   :  { %v2844_v48 = vpop.f32.mrf.mxu0  ;;  %v4471_v11 = vpack.c.bf16 %v3731_v32, %v3735_v34  ;;  %v4472_v17 = vpack.c.bf16 %v3745_v30, %v3742_v47  ;;  %v4476_v32 = vpack.c.bf16 %v3787_v31, %v3791_v43  ;;  %v4477_v34 = vpack.c.bf16 %v3797_v39, %v3801_v9  ;;  %v4478_v47 = vld [vmem:[#allocation5_spill] sm:$0xff]  ;;  %v4484_v49 = vld [vmem:[#allocation6_spill] sm:$0xff] }
 0x561   :  { %v1558_v24 = vmul.f32 %v2648_v62, %v4064_v55  ;;  %1804 = vxpose.xlu0.c.b16.end [8/8] (narrow) %v1632_v20, 16  ;;  %v1634_v60 = vpack.c.bf16 %v1560_v15, %v1559_v16  ;;  %v2653_v0 = vclamps-f32 %v2844_v48, 3.5555556  ;;  %v1745_v10 = vpop.f32.mrf.mxu1  ;;  %v4479_v30 = vpack.c.bf16 %v3417_v3, %v4478_v47  ;;  %v4489_v43 = vld [vmem:[#allocation9_spill] sm:$0xff]  ;;  %v4495_v62 = vld [vmem:[#allocation10_spill] sm:$0xff]  ;;  %v4496_v20 = vld [vmem:[#allocation11_spill] sm:$0xff] }
 0x562   :  { %v1442_v13 = vpop.f32.mrf.mxu0  ;;  %v4485_v46 = vpack.c.bf16 %v4483_v52, %v4484_v49  ;;  %v4488_v31 = vpack.c.bf16 %v4486_v57, %v4487_v44  ;;  %v4491_v39 = vpack.c.bf16 %v4489_v43, %v4490_v38  ;;  %v4492_v9 = vld [vmem:[#allocation17_spill] sm:$0xff]  ;;  %v4497_v35 = vpack.c.bf16 %v4495_v62, %v4496_v20  ;;  %v4498_v48 = vld [vmem:[#allocation19_spill] sm:$0xff] }
 0x563   :  { %1782 = vxpose.xlu1.c.b16.cont [2/8] (narrow) %v1618_v50, 16  ;;  %v1633_v14 = vpack.c.bf16 %v1558_v24, %v1557_v51  ;;  %v2651_v18 = vclamps-f32 %v1442_v13, 3.5555556  ;;  %v1563_v4 = vmul.f32 %v2653_v0, %v848_v21  ;;  %v4494_v3 = vpack.c.bf16 %v4492_v9, %v4493_v2  ;;  %v4499_v50 = vld [vmem:[#allocation20_spill] sm:$0xff] }
 0x564   :  { %v2845_v29 = vpop.f32.mrf.mxu0  ;;  %v4500_v51 = vpack.c.bf16 %v4498_v48, %v4499_v50 }
 0x565   :  { %1813 = vxpose.xlu0.c.b16.start [1/4] (short) (narrow) %v1633_v14, 16  ;;  %v2654_v55 = vclamps-f32 %v2845_v29, 3.5555556  ;;  %v1561_v53 = vmul.f32 %v2651_v18, %v846_v56  ;;  %v4469_v56 = vpack.c.bf16 %v3981_v58, %v3967_v61 }
 0x566   :  { %v1445_v1 = vpop.f32.mrf.mxu0 }
 0x567   :  { %1783 = vxpose.xlu1.c.b16.cont [3/8] (narrow) %v4465_v6, 16  ;;  %v2652_v19 = vclamps-f32 %v1445_v1, 3.5555556  ;;  %v1564_v28 = vmul.f32 %v2654_v55, %v849_v26  ;;  %v4473_v26 = vpack.c.bf16 %v3751_v59, %v3755_v23  ;;  %v4480_v59 = vld [vmem:[#allocation12_spill] sm:$0xff]  ;;  %v4481_v23 = vld [vmem:[#allocation13_spill] sm:$0xff] }
 0x568   :  { %v4482_v27 = vpack.c.bf16 %v4480_v59, %v4481_v23 }
 0x569   :  { %v1562_v45 = vmul.f32 %v2652_v19, %v847_v22  ;;  %1814 = vxpose.xlu0.c.b16.cont [2/4] (short) (narrow) %v1634_v60, 16  ;;  %v1636_v42 = vpack.c.bf16 %v1564_v28, %v1563_v4  ;;  %v2851_v22 = vpop.f32.mrf.mxu1 }
 0x56b   :  { %v1635_v37 = vpack.c.bf16 %v1562_v45, %v1561_v53  ;;  %1784 = vxpose.xlu1.c.b16.cont [4/8] (narrow) %v4466_v41, 16 }
 0x56d   :  { %1815 = vxpose.xlu0.c.b16.cont [3/4] (short) (narrow) %v1635_v37, 16 }
 0x56f   :  { %1785 = vxpose.xlu1.c.b16.cont [5/8] (narrow) %v4467_v12, 16 }
 0x571   :  { %1816 = vxpose.xlu0.c.b16.end [4/4] (short) (narrow) %v1636_v42, 16 }
 0x573   :  { %1786 = vxpose.xlu1.c.b16.cont [6/8] (narrow) %v4468_v63, 16 }
 0x577   :  { %1787 = vxpose.xlu1.c.b16.cont [7/8] (narrow) %v4469_v56, 16 }
 0x57b   :  { %1788 = vxpose.xlu1.c.b16.end [8/8] (narrow) %v4470_v40, 16 }
 0x57f   :  { %1960 = vperm.xlu1 %2925, %v1956_v36  }
 0x583   :  { %1965 = vperm.xlu1 %2925, %v1957_v33  }
 0x587   :  { %v1757_v61 = vpop.trf.xlu0 }
 0x5a1   :  { %v1773_v58 = vpop.trf.xlu1 }
 0x5a2   :  { %1865 = vmatprep.mubr.bf16.mxu1 %v1773_v58 }
 0x5a3   :  { %1866 = vmatmul.mubr.bf16.vlgmr.msra.gmra.mxu1 %v1757_v61 }
 0x5a4   :  { %2738 = vmatpush3.bf16.msra.mxu1 %v4471_v11  ;;  %v2032_v11 = vld [vmem:[%s4383_s14 + $0x8] sm:$0xff] }
 0x5a5   :  { %2739 = vmatprep.subr.bf16.mxu1 %v4472_v17  ;;  %v2942_v17 = vld [vmem:[%s4384_s13 + $0x4] ss:$8 sps:$4 sm:$0xff]  }
 0x5a7   :  { %v1805_v21 = vpop.trf.xlu0 }
 0x5a8   :  { %2740 = vmatpush3.bf16.msra.mxu1 %v4473_v26  ;;  %1906 = vmatprep.mubr.bf16.mxu1 %v1805_v21  ;;  %v2031_v26 = vld [vmem:[%s4383_s14] sm:$0xff] }
 0x5a9   :  { %2741 = vmatprep.subr.bf16.mxu1 %v4474_v8 }
 0x5ac   :  { %2742 = vmatpush3.bf16.msra.mxu1 %v4475_v5 }
 0x5ad   :  { %2743 = vmatprep.subr.bf16.mxu1 %v4476_v32  ;;  %v2991_v32 = vld [vmem:[%s4376_s2 + $0x7] ss:$0 sm:$0xff] }
 0x5b0   :  { %2744 = vmatpush3.bf16.msra.mxu1 %v4477_v34 }
 0x5b1   :  { %2745 = vmatprep.subr.bf16.mxu1 %v4479_v30 }
 0x5b4   :  { %2746 = vmatpush3.bf16.msra.mxu1 %v4482_v27  ;;  %v2992_v27 = vld [vmem:[%s4376_s2 + $0x6] ss:$0 sm:$0xff] }
 0x5b5   :  { %2747 = vmatprep.subr.bf16.mxu1 %v4485_v46 }
 0x5b8   :  { %2748 = vmatpush3.bf16.msra.mxu1 %v4488_v31  ;;  %v2993_v31 = vld [vmem:[%s4376_s2 + $0x5] ss:$0 sm:$0xff] }
 0x5b9   :  { %2749 = vmatprep.subr.bf16.mxu1 %v4491_v39 }
 0x5bc   :  { %2750 = vmatpush3.bf16.msra.mxu1 %v4494_v3  ;;  %v2994_v3 = vld [vmem:[%s4376_s2 + $0x3] ss:$0 sm:$0xff] }
 0x5bd   :  { %2751 = vmatprep.subr.bf16.mxu1 %v4497_v35 }
 0x5c0   :  { %2752 = vmatpush3.bf16.msra.mxu1 %v4500_v51  ;;  %v2995_v51 = vld [vmem:[%s4376_s2 + $0x2] ss:$0 sm:$0xff] }
 0x5c1   :  { %v1789_v24 = vpop.trf.xlu1  ;;  %2055 = vmatprep.subr.bf16.mxu1 %v4501_v25 }
 0x5c3   :  { %1907 = vmatmul.mubr.bf16.vlgmr.msra.gmra.mxu1 %v1789_v24 }
 0x5c4   :  { %2660 = vmatprep.mubr.msk.bf16.mxu1 %vm417_vm0, %v2942_v17 }
 0x5c7   :  { %v1821_v13 = vpop.trf.xlu0 }
 0x5c8   :  { %2861 = vmatmul.mubr.msk.bf16.vlgmr.msra.gmra.mxu0 %vm1829_vm10, %v1821_v13 }
 0x5fa   :  { %v1961_v45 = vpop.permute.xlu1 %1960 }
 0x5fe   :  { %v1966_v33 = vpop.permute.xlu1 %1965 }
 0x663   :  { %v2731_v14 = vpop.f32.mrf.mxu1 }
 0x665   :  { %v2732_v15 = vpop.f32.mrf.mxu1 }
 0x666   :  { %v2733_v16 = vadd.f32 %v2732_v15, %v2731_v14 }
 0x667   :  { %v2734_v29 = vpop.f32.mrf.mxu1 }
 0x668   :  { %v1868_v19 = vadd.f32 %v2733_v16, %v1742_v7 }
 0x669   :  { %v2735_v18 = vpop.f32.mrf.mxu1 }
 0x66a   :  { %v2736_v60 = vadd.f32 %v2735_v18, %v2734_v29  ;;  %v2996_v29 = vld [vmem:[%s4376_s2 + $0x1] ss:$0 sm:$0xff] }
 0x66c   :  { %v1871_v28 = vadd.f32 %v2736_v60, %v1745_v10  ;;  %v2990_v10 = vld [vmem:[%s4376_s2 + $0x4] ss:$0 sm:$0xff]  ;;  %v2997_v60 = vld [vmem:[%s4376_s2] ss:$0 sm:$0xff] }
 0x683   :  { %v2753_v1 = vpop.f32.mrf.mxu1 }
 0x685   :  { %v2754_v6 = vpop.f32.mrf.mxu1 }
 0x686   :  { %v2755_v55 = vadd.f32 %v2754_v6, %v2753_v1 }
 0x687   :  { %v2756_v53 = vpop.f32.mrf.mxu1 }
 0x688   :  { %v1909_v0 = vadd.f32 %v2755_v55, %v1868_v19  ;;  %v1949_v41 = vpop.f32.mrf.mxu0 }
 0x689   :  { %v2757_v37 = vpop.f32.mrf.mxu1 }
 0x68a   :  { %v2758_v4 = vadd.f32 %v2757_v37, %v2756_v53  ;;  %v1950_v12 = vadd.f32 %v1949_v41, %v1909_v0  ;;  %v2862_v42 = vpop.f32.mrf.mxu0  ;;  %v4502_v41 = vld [vmem:[#allocation14_spill] sm:$0xff] }
 0x68b   :  { %v2944_v42 = vld [vmem:[%s4384_s13] ss:$8 sps:$4 sm:$0xff]  }
 0x68c   :  { %v1968_v63 = vadd.f32 %v1961_v45, %v1950_v12  ;;  %v1912_v56 = vadd.f32 %v2758_v4, %v1871_v28  ;;  %v1952_v40 = vpop.f32.mrf.mxu0 }
 0x68e   :  { %v1953_v36 = vadd.f32 %v1952_v40, %v1912_v56  ;;  %2008 = vrot.lane.b32.xlu1 %v1968_v63, %s3003_s28  ;;  %v2863_v54 = vpop.f32.mrf.mxu0  ;;  %v1994_v22 = vmul.f32 %v2990_v10, %v1968_v63 }
 0x690   :  { %v1969_v7 = vadd.f32 %v1966_v33, %v1953_v36 }
 0x692   :  { %2002 = vrot.lane.b32.xlu1 %v1968_v63, %s3004_s29  ;;  %2010 = vrot.lane.b32.xlu0 %v1969_v7, %s3003_s28  ;;  %v1995_v61 = vmul.f32 %v2990_v10, %v1969_v7 }
 0x694   :  { %v2026_v58 = vpack.c.bf16 %v1995_v61, %v1994_v22  ;;  %v4503_v22 = vld [vmem:[#allocation3_spill] sm:$0xff] }
 0x696   :  { %2004 = vrot.lane.b32.xlu1 %v1969_v7, %s3004_s29  ;;  %1998 = vrot.lane.b32.xlu0 %v1969_v7, %s4448_s27 }
 0x69a   :  { %1996 = vrot.lane.b32.xlu1 %v1968_v63, %s4448_s27  ;;  %1990 = vrot.lane.b32.xlu0 %v1969_v7, %s3006_s30 }
 0x69e   :  { %1988 = vrot.lane.b32.xlu1 %v1968_v63, %s3006_s30  ;;  %1984 = vrot.lane.b32.xlu0 %v1969_v7, %s4447_s24 }
 0x6a2   :  { %1982 = vrot.lane.b32.xlu1 %v1968_v63, %s4447_s24  ;;  %1978 = vrot.lane.b32.xlu0 %v1969_v7, %s4449_s1 }
 0x6a6   :  { %1976 = vrot.lane.b32.xlu1 %v1968_v63, %s4449_s1  ;;  %1972 = vrot.lane.b32.xlu0 %v1969_v7, %s4450_s8 }
 0x6aa   :  { %1970 = vrot.lane.b32.xlu1 %v1968_v63, %s4450_s8  ;;  %2016 = vrot.lane.b32.xlu0 %v1969_v7, %s4451_s0 }
 0x6ae   :  { %2014 = vrot.lane.b32.xlu1 %v1968_v63, %s4451_s0  ;;  %2040 = vperm.xlu0 %2924, %v2032_v11  }
 0x6b2   :  { %2035 = vperm.xlu1 %2925, %v2031_v26  }
 0x700   :  { %v2009_v21 = vpop.permute.xlu1 %2008 }
 0x701   :  { %v2012_v34 = vmul.f32 %v2991_v32, %v2009_v21 }
 0x704   :  { %v2011_v8 = vpop.permute.xlu0 %2010  ;;  %v2003_v5 = vpop.permute.xlu1 %2002 }
 0x705   :  { %v2013_v47 = vmul.f32 %v2991_v32, %v2011_v8  ;;  %v2006_v52 = vmul.f32 %v2992_v27, %v2003_v5 }
 0x707   :  { %v2029_v30 = vpack.c.bf16 %v2013_v47, %v2012_v34 }
 0x708   :  { %v1999_v59 = vpop.permute.xlu0 %1998  ;;  %v2005_v23 = vpop.permute.xlu1 %2004 }
 0x709   :  { %v2007_v49 = vmul.f32 %v2992_v27, %v2005_v23  ;;  %2056 = vmatpush1.bf16.msra.mxu1 %v2029_v30  ;;  %v2001_v43 = vmul.f32 %v2993_v31, %v1999_v59 }
 0x70a   :  { %2057 = vmatprep.subr.bf16.mxu1 %v4501_v25 }
 0x70b   :  { %v2028_v46 = vpack.c.bf16 %v2007_v49, %v2006_v52 }
 0x70c   :  { %v1991_v57 = vpop.permute.xlu0 %1990  ;;  %v1997_v44 = vpop.permute.xlu1 %1996 }
 0x70d   :  { %v2000_v38 = vmul.f32 %v2993_v31, %v1997_v44  ;;  %2058 = vmatpush1.bf16.msra.mxu1 %v2028_v46  ;;  %v1993_v35 = vmul.f32 %v2994_v3, %v1991_v57 }
 0x70e   :  { %2059 = vmatprep.subr.bf16.mxu1 %v4501_v25 }
 0x70f   :  { %v2027_v39 = vpack.c.bf16 %v2001_v43, %v2000_v38 }
 0x710   :  { %v1985_v9 = vpop.permute.xlu0 %1984  ;;  %v1989_v2 = vpop.permute.xlu1 %1988 }
 0x711   :  { %2060 = vmatpush1.bf16.msra.mxu1 %v2027_v39  ;;  %v1992_v62 = vmul.f32 %v2994_v3, %v1989_v2  ;;  %v1987_v14 = vmul.f32 %v2995_v51, %v1985_v9  ;;  %v4244_v9 = vld [vmem:[%s4437_s20] sm:$0x1]  ;;  %v4250_v3 = vld [vmem:[%s4437_s20 + $0x1] sm:$0x1] }
 0x712   :  { %2061 = vmatprep.subr.bf16.mxu1 %v4501_v25 }
 0x713   :  { %v2025_v50 = vpack.c.bf16 %v1993_v35, %v1992_v62  ;;  %v4505_v35 = vld [vmem:[#allocation2_spill] sm:$0xff] }
 0x714   :  { %v1983_v20 = vpop.permute.xlu1 %1982  ;;  %v1979_v48 = vpop.permute.xlu0 %1978 }
 0x715   :  { %2062 = vmatpush1.bf16.msra.mxu1 %v2026_v58  ;;  %v1986_v24 = vmul.f32 %v2995_v51, %v1983_v20  ;;  %v1981_v6 = vmul.f32 %v2996_v29, %v1979_v48 }
 0x716   :  { %2063 = vmatprep.subr.bf16.mxu1 %v4501_v25 }
 0x717   :  { %v2024_v15 = vpack.c.bf16 %v1987_v14, %v1986_v24 }
 0x718   :  { %v1977_v13 = vpop.permute.xlu1 %1976  ;;  %v1973_v16 = vpop.permute.xlu0 %1972 }
 0x719   :  { %2064 = vmatpush1.bf16.msra.mxu1 %v2025_v50  ;;  %v1980_v18 = vmul.f32 %v2996_v29, %v1977_v13  ;;  %v1975_v45 = vmul.f32 %v2997_v60, %v1973_v16 }
 0x71a   :  { %2065 = vmatprep.subr.bf16.mxu1 %v4501_v25 }
 0x71b   :  { %v2023_v19 = vpack.c.bf16 %v1981_v6, %v1980_v18 }
 0x71c   :  { %v1971_v1 = vpop.permute.xlu1 %1970  ;;  %v2017_v0 = vpop.permute.xlu0 %2016 }
 0x71d   :  { %2066 = vmatpush1.bf16.msra.mxu1 %v2024_v15  ;;  %v1974_v55 = vmul.f32 %v2997_v60, %v1971_v1  ;;  %v2019_v4 = vmul.f32 %v4502_v41, %v2017_v0 }
 0x71e   :  { %2067 = vmatprep.subr.bf16.mxu1 %v4501_v25 }
 0x71f   :  { %v2022_v37 = vpack.c.bf16 %v1975_v45, %v1974_v55 }
 0x720   :  { %v2015_v53 = vpop.permute.xlu1 %2014 }
 0x721   :  { %2068 = vmatpush1.bf16.msra.mxu1 %v2023_v19  ;;  %v2018_v28 = vmul.f32 %v4502_v41, %v2015_v53 }
 0x722   :  { %2069 = vmatprep.subr.bf16.mxu1 %v4501_v25 }
 0x723   :  { %v2030_v12 = vpack.c.bf16 %v2019_v4, %v2018_v28 }
 0x725   :  { %2070 = vmatpush1.bf16.msra.mxu1 %v2022_v37 }
 0x726   :  { %2085 = vmatprep.subr.bf16.mxu1 %v4501_v25  ;;  %v4504_v25 = vld [vmem:[#allocation4_spill] sm:$0xff] }
 0x729   :  { %2086 = vmatpush2.bf16.msra.mxu1 %v2030_v12  ;;  %v2041_v33 = vpop.permute.xlu0 %2040 }
 0x72c   :  { %2088 = vmatmul.mubr.bf16.vlgmr.msra.gmra.mxu1 %v2944_v42 }
 0x72d   :  { %v2036_v56 = vpop.permute.xlu1 %2035 }
 0x7ec   :  { %v2089_v63 = vpop.f32.mrf.mxu1 }
 0x7ed   :  { %v2090_v36 = vadd.f32 %v2089_v63, %v2036_v56 }
 0x7ee   :  { %v2091_v40 = vpop.f32.mrf.mxu1 }
 0x7ef   :  { %v2096_v61 = vmul.f32 %v2090_v36, %v4503_v22  ;;  %v2112_v11 = vmul.f32 %v2090_v36, %v4504_v25 }
 0x7f0   :  { %v2092_v54 = vpop.f32.mrf.mxu1 }
 0x7f1   :  { %v2093_v7 = vadd.f32 %v2092_v54, %v2041_v33 }
 0x7f2   :  { %v2094_v10 = vpop.f32.mrf.mxu1 }
 0x7f3   :  { %v2097_v58 = vmul.f32 %v2093_v7, %v4503_v22  ;;  %v2113_v17 = vmul.f32 %v2093_v7, %v4504_v25 }
 0x7f5   :  { %v2114_v26 = vadd.f32 %v2113_v17, %v2112_v11  ;;  %v2098_v21 = vadd.f32 %v2097_v58, %v2096_v61 }
 0x7f7   :  { %2115 = vadd.xlane.f32.xlu0 %v2114_v26  ;;  %2099 = vadd.xlane.f32.xlu1 %v2098_v21  ;;  %v3000_v21 = vld [vmem:[%s4439_s23] sm:$0xff] }
 0x880   :  { %v2116_v8 = vpop.xlane.xlu0 %2115  ;;  %v2100_v5 = vpop.xlane.xlu1 %2099 }
 0x881   :  { %v2117_v32 = vrot.slane %v2116_v8, 4  ;;  %v2101_v34 = vrot.slane %v2100_v5, 4 }
 0x883   :  { %v2118_v47 = vadd.f32 %v2117_v32, %v2116_v8  ;;  %v2102_v30 = vadd.f32 %v2101_v34, %v2100_v5  ;;  %v3001_v5 = vld [vmem:[%s4439_s23 + $0x8] sm:$0xff] }
 0x885   :  { %v2119_v59 = vrot.slane %v2118_v47, 2  ;;  %v2103_v23 = vrot.slane %v2102_v30, 2 }
 0x887   :  { %v2104_v27 = vadd.f32 %v2103_v23, %v2102_v30  ;;  %v2120_v52 = vadd.f32 %v2119_v59, %v2118_v47 }
 0x889   :  { %v2105_v49 = vrot.slane %v2104_v27, 1  ;;  %v2121_v46 = vrot.slane %v2120_v52, 1 }
 0x88b   :  { %v2106_v57 = vadd.f32 %v2105_v49, %v2104_v27  ;;  %v2122_v44 = vadd.f32 %v2121_v46, %v2120_v52 }
 0x88d   :  { %2896 = vpush %v2106_v57 }
 0x88e   :  { %2898 = vpush %v2122_v44 }
 0x8be   :  { %s2897_s2 = spop %2896 }
 0x8bf   :  { %v2108_v31 = vstv %s2897_s2  ;;  %s2899_s13 = spop %2898 }
 0x8c0   :  { %v2109_v43 = vmul.f32 0.0009765625, %v2108_v31  ;;  %v2124_v38 = vstv %s2899_s13 }
 0x8c1   :  { %v2125_v39 = vmul.f32 0.0009765625, %v2124_v38 }
 0x8c2   :  { %v2110_v2 = vmul.f32 %v4244_v9, %v2109_v43 }
 0x8c3   :  { %v2126_v62 = vmul.f32 %v4250_v3, %v2125_v39 }
 0x8c5   :  { %v2127_v20 = vadd.f32 %v2126_v62, %v2110_v2 }
 0x8c7   :  { %v2132_v48 = vrot.slane %v2127_v20, %v4505_v35 }
 0x8c9   :  { %v2134_v50 = vsub.f32 %v2090_v36, %v2132_v48  ;;  %v2135_v51 = vsub.f32 %v2093_v7, %v2132_v48 }
 0x8cb   :  { %v2136_v24 = vmul.f32 %v2134_v50, %v2134_v50  ;;  %v2137_v13 = vmul.f32 %v2135_v51, %v2135_v51 }
 0x8cd   :  { %v2138_v14 = vmul.f32 %v2136_v24, %v4503_v22  ;;  %v2139_v15 = vmul.f32 %v2137_v13, %v4503_v22  ;;  %v2154_v18 = vmul.f32 %v2136_v24, %v4504_v25  ;;  %v2155_v16 = vmul.f32 %v2137_v13, %v4504_v25 }
 0x8cf   :  { %v2140_v29 = vadd.f32 %v2139_v15, %v2138_v14  ;;  %v2156_v1 = vadd.f32 %v2155_v16, %v2154_v18 }
 0x8d1   :  { %2141 = vadd.xlane.f32.xlu0 %v2140_v29 }
 0x8d5   :  { %2157 = vadd.xlane.f32.xlu0 %v2156_v1 }
 0x95a   :  { %v2142_v6 = vpop.xlane.xlu0 %2141 }
 0x95b   :  { %v2143_v19 = vrot.slane %v2142_v6, 4 }
 0x95d   :  { %v2144_v60 = vadd.f32 %v2143_v19, %v2142_v6 }
 0x95e   :  { %v2158_v55 = vpop.xlane.xlu0 %2157 }
 0x95f   :  { %v2145_v53 = vrot.slane %v2144_v60, 2  ;;  %v2159_v45 = vrot.slane %v2158_v55, 4 }
 0x961   :  { %v2160_v0 = vadd.f32 %v2159_v45, %v2158_v55  ;;  %v2146_v37 = vadd.f32 %v2145_v53, %v2144_v60 }
 0x963   :  { %v2161_v41 = vrot.slane %v2160_v0, 2  ;;  %v2147_v28 = vrot.slane %v2146_v37, 1 }
 0x965   :  { %v2148_v4 = vadd.f32 %v2147_v28, %v2146_v37  ;;  %v2162_v12 = vadd.f32 %v2161_v41, %v2160_v0  ;;  %v2281_v28 = vld [vmem:[%s4385_s16 + $0x10] sm:$0xff] }
 0x967   :  { %2900 = vpush %v2148_v4  ;;  %v2163_v42 = vrot.slane %v2162_v12, 1  ;;  %v2279_v4 = vld [vmem:[%s4385_s16] sm:$0xff] }
 0x969   :  { %v2164_v63 = vadd.f32 %v2163_v42, %v2162_v12  ;;  %v2481_v12 = vld [vmem:[%s4386_s18 + $0x8] sm:$0xff]  ;;  %v2480_v42 = vld [vmem:[%s4386_s18] sm:$0xff] }
 0x96b   :  { %2902 = vpush %v2164_v63  ;;  %v2945_v63 = vld [vmem:[%s4387_s15] sm:$0xff]  }
 0x96c   :  { %2866 = vmatprep.mubr.msk.bf16.mxu0 %vm417_vm0, %v2945_v63 }
 0x998   :  { %s2901_s20 = spop %2900 }
 0x999   :  { %v2150_v56 = vstv %s2901_s20 }
 0x99a   :  { %v2151_v40 = vmul.f32 0.0009765625, %v2150_v56 }
 0x99c   :  { %s2903_s8 = spop %2902  ;;  %v2152_v54 = vmul.f32 %v4244_v9, %v2151_v40 }
 0x99d   :  { %v2166_v36 = vstv %s2903_s8 }
 0x99e   :  { %v2167_v33 = vmul.f32 0.0009765625, %v2166_v36 }
 0x9a0   :  { %v2168_v7 = vmul.f32 %v4250_v3, %v2167_v33 }
 0x9a2   :  { %v2169_v10 = vadd.f32 %v2168_v7, %v2152_v54 }
 0x9a4   :  { %v2170_v61 = vadd.f32 1e-05, %v2169_v10 }
 0x9a6   :  { %2962 = vrsqrt.f32 %v2170_v61 }
 0x9b3   :  { %v2963_v58 = vpop.eup %2962 }
 0x9b4   :  { %v2176_v11 = vrot.slane %v2963_v58, %v4505_v35 }
 0x9b6   :  { %v2178_v17 = vmul.f32 %v2176_v11, %v2134_v50  ;;  %v2179_v26 = vmul.f32 %v2176_v11, %v2135_v51 }
 0x9b8   :  { %v2180_v8 = vadd.f32 %v3000_v21, %v2178_v17  ;;  %v2181_v32 = vadd.f32 %v3001_v5, %v2179_v26 }
 0x9ba   :  { %v2202_v34 = vmul.f32 %v2180_v8, %v4504_v25  ;;  %v2203_v47 = vmul.f32 %v2181_v32, %v4504_v25  ;;  %v2186_v30 = vmul.f32 %v2180_v8, %v4503_v22  ;;  %v2187_v59 = vmul.f32 %v2181_v32, %v4503_v22 }
 0x9bc   :  { %v2204_v23 = vadd.f32 %v2203_v47, %v2202_v34  ;;  %v2188_v27 = vadd.f32 %v2187_v59, %v2186_v30 }
 0x9be   :  { %2205 = vadd.xlane.f32.xlu0 %v2204_v23  ;;  %2189 = vadd.xlane.f32.xlu1 %v2188_v27 }
 0xa47   :  { %v2206_v52 = vpop.xlane.xlu0 %2205  ;;  %v2190_v49 = vpop.xlane.xlu1 %2189 }
 0xa48   :  { %v2207_v46 = vrot.slane %v2206_v52, 4  ;;  %v2191_v57 = vrot.slane %v2190_v49, 4 }
 0xa4a   :  { %v2208_v44 = vadd.f32 %v2207_v46, %v2206_v52  ;;  %v2192_v31 = vadd.f32 %v2191_v57, %v2190_v49  ;;  %v2182_v46 = vld [vmem:[%s4388_s6] sm:$0xff]  ;;  %v2183_v57 = vld [vmem:[%s4388_s6 + $0x8] sm:$0xff] }
 0xa4c   :  { %v2209_v43 = vrot.slane %v2208_v44, 2  ;;  %v2193_v38 = vrot.slane %v2192_v31, 2 }
 0xa4e   :  { %v2194_v39 = vadd.f32 %v2193_v38, %v2192_v31  ;;  %v2210_v2 = vadd.f32 %v2209_v43, %v2208_v44 }
 0xa50   :  { %v2195_v62 = vrot.slane %v2194_v39, 1  ;;  %v2211_v20 = vrot.slane %v2210_v2, 1 }
 0xa52   :  { %v2196_v48 = vadd.f32 %v2195_v62, %v2194_v39  ;;  %v2212_v50 = vadd.f32 %v2211_v20, %v2210_v2  ;;  %v2946_v62 = vld [vmem:[%s4387_s15 + $0x8] sm:$0xff]   ;;  %v4506_v20 = vmov 0.0  }
 0xa54   :  { %2904 = vpush %v2196_v48 }
 0xa55   :  { %2906 = vpush %v2212_v50 }
 0xa85   :  { %s2905_s23 = spop %2904 }
 0xa86   :  { %v2198_v51 = vstv %s2905_s23  ;;  %s2907_s22 = spop %2906 }
 0xa87   :  { %v2199_v24 = vmul.f32 0.0009765625, %v2198_v51  ;;  %v2214_v13 = vstv %s2907_s22 }
 0xa88   :  { %v2215_v14 = vmul.f32 0.0009765625, %v2214_v13 }
 0xa89   :  { %v2200_v15 = vmul.f32 %v4244_v9, %v2199_v24 }
 0xa8a   :  { %v2216_v29 = vmul.f32 %v4250_v3, %v2215_v14 }
 0xa8c   :  { %v2217_v18 = vadd.f32 %v2216_v29, %v2200_v15 }
 0xa8e   :  { %v2222_v16 = vrot.slane %v2217_v18, %v4505_v35 }
 0xa90   :  { %v2224_v1 = vsub.f32 %v2180_v8, %v2222_v16  ;;  %v2225_v6 = vsub.f32 %v2181_v32, %v2222_v16 }
 0xa92   :  { %v2226_v19 = vmul.f32 %v2224_v1, %v2224_v1  ;;  %v2227_v60 = vmul.f32 %v2225_v6, %v2225_v6 }
 0xa94   :  { %v2244_v55 = vmul.f32 %v2226_v19, %v4504_v25  ;;  %v2245_v53 = vmul.f32 %v2227_v60, %v4504_v25  ;;  %v2228_v45 = vmul.f32 %v2226_v19, %v4503_v22  ;;  %v2229_v0 = vmul.f32 %v2227_v60, %v4503_v22  ;;  %v2282_v25 = vld [vmem:[%s4385_s16 + $0x18] sm:$0xff]  ;;  %v2280_v22 = vld [vmem:[%s4385_s16 + $0x8] sm:$0xff] }
 0xa96   :  { %v2246_v37 = vadd.f32 %v2245_v53, %v2244_v55  ;;  %v2230_v41 = vadd.f32 %v2229_v0, %v2228_v45 }
 0xa98   :  { %2247 = vadd.xlane.f32.xlu0 %v2246_v37  ;;  %2231 = vadd.xlane.f32.xlu1 %v2230_v41 }
 0xaa9   :  { %2295 = vperm.xlu1 %2925, %v2281_v28  }
 0xaad   :  { %2285 = vperm.xlu1 %2925, %v2279_v4  }
 0xaae   :  { %2300 = vperm.xlu0 %2924, %v2282_v25  }
 0xab1   :  { %2290 = vperm.xlu1 %2925, %v2280_v22  }
 0xab2   :  { %2489 = vperm.xlu0 %2924, %v2481_v12  }
 0xab5   :  { %2484 = vperm.xlu1 %2925, %v2480_v42  }
 0xb21   :  { %v2248_v56 = vpop.xlane.xlu0 %2247  ;;  %v2232_v40 = vpop.xlane.xlu1 %2231 }
 0xb22   :  { %v2249_v36 = vrot.slane %v2248_v56, 4  ;;  %v2233_v33 = vrot.slane %v2232_v40, 4 }
 0xb24   :  { %v2250_v54 = vadd.f32 %v2249_v36, %v2248_v56  ;;  %v2234_v7 = vadd.f32 %v2233_v33, %v2232_v40 }
 0xb25   :  { %v2296_v48 = vpop.permute.xlu1 %2295 }
 0xb26   :  { %v2251_v10 = vrot.slane %v2250_v54, 2  ;;  %v2235_v61 = vrot.slane %v2234_v7, 2 }
 0xb28   :  { %v2236_v58 = vadd.f32 %v2235_v61, %v2234_v7  ;;  %v2252_v11 = vadd.f32 %v2251_v10, %v2250_v54 }
 0xb29   :  { %v2286_v51 = vpop.permute.xlu1 %2285  ;;  %v2301_v18 = vpop.permute.xlu0 %2300 }
 0xb2a   :  { %v2237_v17 = vrot.slane %v2236_v58, 1  ;;  %v2253_v26 = vrot.slane %v2252_v11, 1 }
 0xb2c   :  { %v2238_v21 = vadd.f32 %v2237_v17, %v2236_v58  ;;  %v2254_v8 = vadd.f32 %v2253_v26, %v2252_v11 }
 0xb2d   :  { %v2291_v60 = vpop.permute.xlu1 %2290 }
 0xb2e   :  { %2908 = vpush %v2238_v21 }
 0xb2f   :  { %2910 = vpush %v2254_v8 }
 0xb5f   :  { %s2909_s16 = spop %2908 }
 0xb60   :  { %v2240_v5 = vstv %s2909_s16  ;;  %s2911_s18 = spop %2910 }
 0xb61   :  { %v2241_v32 = vmul.f32 0.0009765625, %v2240_v5  ;;  %v2256_v34 = vstv %s2911_s18 }
 0xb62   :  { %v2257_v47 = vmul.f32 0.0009765625, %v2256_v34 }
 0xb63   :  { %v2242_v30 = vmul.f32 %v4244_v9, %v2241_v32  ;;  %v2184_v9 = vld [vmem:[%s4389_s7] sm:$0xff] }
 0xb64   :  { %v2258_v59 = vmul.f32 %v4250_v3, %v2257_v47  ;;  %v2185_v3 = vld [vmem:[%s4389_s7 + $0x8] sm:$0xff] }
 0xb66   :  { %v2259_v23 = vadd.f32 %v2258_v59, %v2242_v30 }
 0xb68   :  { %v2260_v27 = vadd.f32 1e-05, %v2259_v23 }
 0xb6a   :  { %2964 = vrsqrt.f32 %v2260_v27 }
 0xb77   :  { %v2965_v52 = vpop.eup %2964 }
 0xb78   :  { %v2266_v49 = vrot.slane %v2965_v52, %v4505_v35 }
 0xb7a   :  { %v2268_v44 = vmul.f32 %v2266_v49, %v2224_v1  ;;  %v2269_v31 = vmul.f32 %v2266_v49, %v2225_v6 }
 0xb7c   :  { %v2270_v43 = vmul.f32 %v2268_v44, %v2182_v46  ;;  %v2271_v35 = vmul.f32 %v2269_v31, %v2183_v57 }
 0xb7e   :  { %v4315_v38 = vadd.f32 %v2270_v43, %v2184_v9  ;;  %v4317_v39 = vadd.f32 %v2271_v35, %v2185_v3 }
 0xb80   :  { %v2278_v2 = vpack.c.bf16 %v4317_v39, %v4315_v38 }
 0xb82   :  { %2864 = vmatprep.subr.bf16.mxu0 %v2278_v2 }
 0xb83   :  { %2865 = vmatpush3.bf16.msra.mxu0 %v2278_v2 }
 0xb84   :  { %2870 = vmatprep.subr.bf16.mxu0 %v4506_v20 }
 0xb86   :  { %2867 = vmatmul.mubr.msk.bf16.vlgmr.msra.gmra.mxu0 %vm417_vm0, %v2946_v62 }
 0xb87   :  { %2874 = vmatprep.mubr.msk.bf16.mxu0 %vm3012_vm9, %v4506_v20 }
 0xc46   :  { %v2868_v50 = vpop.f32.mrf.mxu0 }
 0xc47   :  { %v4328_v24 = vadd.f32 %v2868_v50, %v2296_v48 }
 0xc48   :  { %v2353_v13 = vpop.f32.mrf.mxu0 }
 0xc49   :  { %v4331_v14 = vmul.f32 0.70710677, %v4328_v24  ;;  %v4333_v15 = vadd.f32 %v2353_v13, %v2286_v51 }
 0xc4a   :  { %v2869_v29 = vpop.f32.mrf.mxu0 }
 0xc4b   :  { %v2386_v16 = vand.u32 2147483647, %v4331_v14  ;;  %v4337_v1 = vmul.f32 0.70710677, %v4333_v15  ;;  %v4339_v6 = vadd.f32 %v2869_v29, %v2301_v18  ;;  %vm2378_vm11 = vcmp.ge.f32.partialorder %v4331_v14, 0.0 }
 0xc4c   :  { %v2356_v19 = vpop.f32.mrf.mxu0 }
 0xc4d   :  { %v2390_v55 = vmul.f32 0.3275911, %v2386_v16  ;;  %v2384_v53 = vand.u32 2147483647, %v4337_v1  ;;  %v4343_v45 = vmul.f32 0.70710677, %v4339_v6  ;;  %v4345_v0 = vadd.f32 %v2356_v19, %v2291_v60 }
 0xc4e   :  { %v2442_v56 = vsub.f32 0.0, %v2386_v16  ;;  %vm2376_vm12 = vcmp.ge.f32.partialorder %v4337_v1, 0.0  ;;  %v2370_v1 = vmul.f32 0.5, %v4328_v24 }
 0xc4f   :  { %v2394_v37 = vadd.f32 1.0, %v2390_v55  ;;  %v2388_v41 = vmul.f32 0.3275911, %v2384_v53  ;;  %v2387_v28 = vand.u32 2147483647, %v4343_v45  ;;  %v2440_v36 = vsub.f32 0.0, %v2384_v53 }
 0xc50   :  { %v4349_v4 = vmul.f32 0.70710677, %v4345_v0  ;;  %v2446_v33 = vmul.f32 %v2442_v56, %v2386_v16  ;;  %vm2379_vm13 = vcmp.ge.f32.partialorder %v4343_v45, 0.0 }
 0xc51   :  { %2966 = vrcp.f32 %v2394_v37  ;;  %v2392_v25 = vadd.f32 1.0, %v2388_v41  ;;  %v2391_v22 = vmul.f32 0.3275911, %v2387_v28  ;;  %v2443_v54 = vsub.f32 0.0, %v2387_v28 }
 0xc52   :  { %v2385_v12 = vand.u32 2147483647, %v4349_v4  ;;  %v2444_v10 = vmul.f32 %v2440_v36, %v2384_v53  ;;  %v2452_v58 = vmul.f32 1.442695, %v2446_v33  ;;  %vm2377_vm14 = vcmp.ge.f32.partialorder %v4349_v4, 0.0 }
 0xc53   :  { %2968 = vrcp.f32 %v2392_v25  ;;  %v2395_v42 = vadd.f32 1.0, %v2391_v22  ;;  %v2447_v17 = vmul.f32 %v2443_v54, %v2387_v28  ;;  %v3013_v54 = vmov -1.0  }
 0xc54   :  { %v2389_v63 = vmul.f32 0.3275911, %v2385_v12  ;;  %v2441_v11 = vsub.f32 0.0, %v2385_v12  ;;  %v2448_v5 = vmul.f32 1.442695, %v2444_v10  ;;  %v2382_v10 = vsel %vm2378_vm11, 1.0, %v3013_v54 }
 0xc55   :  { %2970 = vrcp.f32 %v2395_v42  ;;  %v2454_v23 = vmul.f32 1.442695, %v2447_v17  ;;  %v2368_v4 = vmul.f32 0.5, %v4333_v15 }
 0xc56   :  { %v2393_v40 = vadd.f32 1.0, %v2389_v63  ;;  %v2445_v47 = vmul.f32 %v2441_v11, %v2385_v12 }
 0xc58   :  { %2972 = vrcp.f32 %v2393_v40  ;;  %v2450_v31 = vmul.f32 1.442695, %v2445_v47 }
 0xc59   :  { %2974 = vpow2.f32 %v2452_v58 }
 0xc5a   :  { %2976 = vpow2.f32 %v2448_v5 }
 0xc5b   :  { %2978 = vpow2.f32 %v2454_v23 }
 0xc5c   :  { %2980 = vpow2.f32 %v2450_v31 }
 0xc5e   :  { %v2967_v7 = vpop.eup %2966 }
 0xc5f   :  { %v2406_v61 = vmul.f32 1.0614054, %v2967_v7 }
 0xc60   :  { %v2969_v26 = vpop.eup %2968 }
 0xc61   :  { %v2667_v21 = vadd.f32 -1.4531521, %v2406_v61  ;;  %v2404_v8 = vmul.f32 1.0614054, %v2969_v26 }
 0xc62   :  { %v2971_v32 = vpop.eup %2970 }
 0xc63   :  { %v2414_v34 = vmul.f32 %v2967_v7, %v2667_v21  ;;  %v2665_v30 = vadd.f32 -1.4531521, %v2404_v8  ;;  %v2407_v59 = vmul.f32 1.0614054, %v2971_v32  ;;  %v2380_v21 = vsel %vm2376_vm12, 1.0, %v3013_v54 }
 0xc64   :  { %v2383_v8 = vsel %vm2379_vm13, 1.0, %v3013_v54 }
 0xc65   :  { %v2418_v27 = vadd.f32 1.4214138, %v2414_v34  ;;  %v2973_v52 = vpop.eup %2972  ;;  %v2412_v49 = vmul.f32 %v2969_v26, %v2665_v30  ;;  %v2668_v46 = vadd.f32 -1.4531521, %v2407_v59  ;;  %v2371_v59 = vmul.f32 0.5, %v4339_v6  ;;  %v2947_v6 = vld [vmem:[%s4390_s17] sm:$0xff]  }
 0xc66   :  { %v2405_v44 = vmul.f32 1.0614054, %v2973_v52  ;;  %v2975_v53 = vpop.eup %2974 }
 0xc67   :  { %v2422_v57 = vmul.f32 %v2967_v7, %v2418_v27  ;;  %v2416_v9 = vadd.f32 1.4214138, %v2412_v49  ;;  %v2415_v3 = vmul.f32 %v2971_v32, %v2668_v46  ;;  %v2977_v42 = vpop.eup %2976  ;;  %v2381_v27 = vsel %vm2377_vm14, 1.0, %v3013_v54 }
 0xc68   :  { %v2666_v35 = vadd.f32 -1.4531521, %v2405_v44  ;;  %v2979_v33 = vpop.eup %2978 }
 0xc69   :  { %v2671_v43 = vadd.f32 -0.28449672, %v2422_v57  ;;  %v2420_v2 = vmul.f32 %v2969_v26, %v2416_v9  ;;  %v2419_v62 = vadd.f32 1.4214138, %v2415_v3  ;;  %v2981_v14 = vpop.eup %2980  ;;  %v2369_v57 = vmul.f32 0.5, %v4345_v0 }
 0xc6a   :  { %v2413_v50 = vmul.f32 %v2973_v52, %v2666_v35 }
 0xc6b   :  { %v2430_v48 = vmul.f32 %v2967_v7, %v2671_v43  ;;  %v2669_v51 = vadd.f32 -0.28449672, %v2420_v2  ;;  %v2423_v13 = vmul.f32 %v2971_v32, %v2419_v62  ;;  %v2485_v43 = vpop.permute.xlu1 %2484  ;;  %v2490_v62 = vpop.permute.xlu0 %2489 }
 0xc6c   :  { %v2417_v18 = vadd.f32 1.4214138, %v2413_v50 }
 0xc6d   :  { %v2434_v29 = vadd.f32 0.2548296, %v2430_v48  ;;  %v2428_v16 = vmul.f32 %v2969_v26, %v2669_v51  ;;  %v2672_v19 = vadd.f32 -0.28449672, %v2423_v13 }
 0xc6e   :  { %v2421_v55 = vmul.f32 %v2973_v52, %v2417_v18 }
 0xc6f   :  { %v2438_v60 = vmul.f32 %v2967_v7, %v2434_v29  ;;  %v2432_v37 = vadd.f32 0.2548296, %v2428_v16  ;;  %v2431_v41 = vmul.f32 %v2971_v32, %v2672_v19 }
 0xc70   :  { %v2670_v25 = vadd.f32 -0.28449672, %v2421_v55 }
 0xc71   :  { %v2458_v28 = vmul.f32 %v2975_v53, %v2438_v60  ;;  %v2436_v22 = vmul.f32 %v2969_v26, %v2432_v37  ;;  %v2435_v12 = vadd.f32 0.2548296, %v2431_v41 }
 0xc72   :  { %v2429_v56 = vmul.f32 %v2973_v52, %v2670_v25 }
 0xc73   :  { %v2462_v63 = vsub.f32 1.0, %v2458_v28  ;;  %v2456_v40 = vmul.f32 %v2977_v42, %v2436_v22  ;;  %v2439_v36 = vmul.f32 %v2971_v32, %v2435_v12 }
 0xc74   :  { %v2433_v7 = vadd.f32 0.2548296, %v2429_v56 }
 0xc75   :  { %v2466_v61 = vmul.f32 %v2462_v63, %v2382_v10  ;;  %v2460_v58 = vsub.f32 1.0, %v2456_v40  ;;  %v2459_v11 = vmul.f32 %v2979_v33, %v2439_v36 }
 0xc76   :  { %v2437_v17 = vmul.f32 %v2973_v52, %v2433_v7 }
 0xc77   :  { %v2463_v26 = vsub.f32 1.0, %v2459_v11  ;;  %v2470_v32 = vadd.f32 1.0, %v2466_v61  ;;  %v2464_v34 = vmul.f32 %v2460_v58, %v2380_v21 }
 0xc78   :  { %v2457_v5 = vmul.f32 %v2981_v14, %v2437_v17 }
 0xc79   :  { %v2467_v47 = vmul.f32 %v2463_v26, %v2383_v8  ;;  %v2474_v49 = vmul.f32 %v2470_v32, %v2370_v1  ;;  %v2468_v52 = vadd.f32 1.0, %v2464_v34 }
 0xc7a   :  { %v2461_v30 = vsub.f32 1.0, %v2457_v5 }
 0xc7b   :  { %v2471_v23 = vadd.f32 1.0, %v2467_v47  ;;  %v2472_v3 = vmul.f32 %v2468_v52, %v2368_v4 }
 0xc7c   :  { %v2465_v45 = vmul.f32 %v2461_v30, %v2381_v27 }
 0xc7d   :  { %v2475_v46 = vmul.f32 %v2471_v23, %v2371_v59 }
 0xc7e   :  { %v2469_v44 = vadd.f32 1.0, %v2465_v45 }
 0xc7f   :  { %v2479_v31 = vpack.c.bf16 %v2475_v46, %v2474_v49 }
 0xc80   :  { %v2473_v9 = vmul.f32 %v2469_v44, %v2369_v57 }
 0xc81   :  { %2871 = vmatpush3.bf16.msra.mxu0 %v2479_v31 }
 0xc82   :  { %2872 = vmatprep.subr.bf16.mxu0 %v4506_v20  ;;  %v2478_v24 = vpack.c.bf16 %v2473_v9, %v2472_v3 }
 0xc85   :  { %2873 = vmatpush3.bf16.msra.mxu0 %v2478_v24 }
 0xc88   :  { %2875 = vmatmul.mubr.msk.bf16.vlgmr.msra.gmra.mxu0 %vm2497_vm15, %v2947_v6 }
 0xd48   :  { %v2535_v35 = vpop.f32.mrf.mxu0 }
 0xd49   :  { %v2536_v0 = vadd.f32 %v2535_v35, %v2485_v43 }
 0xd4a   :  { %v2876_v2 = vpop.f32.mrf.mxu0 }
 0xd4b   :  { %v2542_v15 = vadd.f32 %v2536_v0, %v4315_v38 }
 0xd4c   :  { %v2538_v48 = vpop.f32.mrf.mxu0 }
 0xd4d   :  { %2544 = vst [vmem:[%s4391_s19] sm:$0xff] %v2542_v15  ;;  %v2539_v20 = vadd.f32 %v2538_v48, %v2490_v62 }
 0xd4e   :  { %v2877_v50 = vpop.f32.mrf.mxu0 }
 0xd4f   :  { %v2543_v51 = vadd.f32 %v2539_v20, %v4317_v39 }
 0xd51   :  { %2545 = vst [vmem:[%s4391_s19 + $0x8] sm:$0xff] %v2543_v51 }

</bundles_post_ra>
